<compile_context>
chip_gen: v7x
topology: tpu7x:2x2x1
jax: 0.10.0
libtpu: 0.0.40
codegen_flags: <defaults>
</compile_context>

<pallas_src>
import math
from functools import partial

import jax
import jax.numpy as jnp
from jax import lax
from jax.experimental import pallas as pl
from jax.experimental.pallas import tpu as pltpu


def _attn_kernel(x_ref, wqkv_ref, wproj_ref, o_ref, qkv_scr, y_scr, *,
                 B, T, C, n_head, heads_per_group):
    hs = C // n_head

    # ---- Fused QKV projection, per batch (leading-axis addressing only, so
    # bf16 sublane packing never sees an offset row slice). bf16 in / f32 acc
    # on the MXU; 1/sqrt(hs) is already folded into the Q columns of wqkv.
    for b in range(B):
        qkv = jnp.dot(x_ref[b], wqkv_ref[...],
                      preferred_element_type=jnp.float32)        # (T, 3C) f32
        qkv_scr[b] = qkv.astype(jnp.bfloat16)                    # one cast, lane-dense store

    # ---- Causal additive bias built in-kernel (no (T,T) HBM DMA), hoisted
    # out of all loops and reused by every (batch, head) pair.
    row = lax.broadcasted_iota(jnp.int32, (T, T), 0)
    col = lax.broadcasted_iota(jnp.int32, (T, T), 1)
    neg_bias = jnp.where(row >= col, 0.0, -1e30).astype(jnp.float32)  # (T, T)

    # ---- Attention. q/k/v are static slices of the scratch Ref (free); a
    # head-group's outputs (128 lanes for hs=64) are written with one
    # lane-dense store into y_scr.
    for b in range(B):
        for g in range(n_head // heads_per_group):
            outs = []
            for j in range(heads_per_group):
                h = g * heads_per_group + j
                c0 = h * hs
                q = qkv_scr[b, :, 0 * C + c0:0 * C + c0 + hs]    # (T, hs) bf16
                k = qkv_scr[b, :, 1 * C + c0:1 * C + c0 + hs]
                v = qkv_scr[b, :, 2 * C + c0:2 * C + c0 + hs]

                # s = q @ k^T via dot_general dimension numbers (no explicit .T).
                s = lax.dot_general(q, k, (((1,), (1,)), ((), ())),
                                    preferred_element_type=jnp.float32)  # (T, T)
                s = s + neg_bias

                m = jnp.max(s, axis=-1, keepdims=True)
                e = jnp.exp(s - m)
                denom = jnp.sum(e, axis=-1, keepdims=True)
                # approx reciprocal (EUP): rows sum to 1 +/- ~1e-3; fine for
                # inference / the 5e-2 test tolerance.
                p = e * pl.reciprocal(denom, approx=True)

                o = jnp.dot(p.astype(jnp.bfloat16), v,
                            preferred_element_type=jnp.float32)          # (T, hs)
                outs.append(o)

            o_grp = outs[0] if len(outs) == 1 else jnp.concatenate(outs, axis=-1)
            gc0 = g * heads_per_group * hs
            y_scr[b, :, gc0:gc0 + heads_per_group * hs] = o_grp.astype(jnp.bfloat16)

    # ---- Output projection per batch: (T, C) @ (C, C), bf16 in / f32 acc,
    # lane-dense output stores.
    for b in range(B):
        out = jnp.dot(y_scr[b], wproj_ref[...],
                      preferred_element_type=jnp.float32)
        o_ref[b] = out.astype(o_ref.dtype)


def make_causal_self_attention(B, T, C, n_head, out_dtype=jnp.float32):
    assert C % n_head == 0
    hs = C // n_head
    scale = 1.0 / math.sqrt(hs)

    # Group heads so that each group's output fills a full 128-lane window
    # (hs=64 -> 2 heads per group). Falls back to per-head stores otherwise.
    heads_per_group = 1
    if hs < 128 and 128 % hs == 0 and n_head % (128 // hs) == 0:
        heads_per_group = 128 // hs

    kernel = partial(_attn_kernel, B=B, T=T, C=C, n_head=n_head,
                     heads_per_group=heads_per_group)

    pallas_fn = pl.pallas_call(
        kernel,
        out_shape=jax.ShapeDtypeStruct((B, T, C), out_dtype),
        in_specs=[
            pl.BlockSpec(memory_space=pltpu.MemorySpace.VMEM),  # x        (B, T, C)  bf16
            pl.BlockSpec(memory_space=pltpu.MemorySpace.VMEM),  # W_attn^T (C, 3C)    bf16
            pl.BlockSpec(memory_space=pltpu.MemorySpace.VMEM),  # W_proj^T (C, C)     bf16
        ],
        out_specs=pl.BlockSpec(memory_space=pltpu.MemorySpace.VMEM),
        scratch_shapes=[
            pltpu.VMEM((B, T, 3 * C), jnp.bfloat16),   # qkv slab (sliced per head)
            pltpu.VMEM((B, T, C), jnp.bfloat16),       # attention outputs
        ],
    )

    def fn(x, w_attn, w_proj):
        # One-time layout plumbing OUTSIDE the kernel:
        #   * PyTorch (out, in) -> (in, out) so the kernel never transposes,
        #   * fold 1/sqrt(head_size) into the Q columns (free at matmul time),
        #   * cast weights and activations to bf16: 2x MXU rate, half the DMA.
        w_qkv_t = jnp.transpose(w_attn)                 # (C, 3C)
        w_qkv_t = w_qkv_t.at[:, :C].multiply(scale)     # scale Q output columns
        w_qkv_t = w_qkv_t.astype(jnp.bfloat16)
        w_proj_t = jnp.transpose(w_proj).astype(jnp.bfloat16)   # (C, C)
        x_bf = x.astype(jnp.bfloat16)                   # (B, T, C)
        return pallas_fn(x_bf, w_qkv_t, w_proj_t)

    return fn


def reference_attention(x, w_attn, w_proj, n_head):
    # Pure-JAX f32 reference mirroring the PyTorch forward (stage_1=False)
    # with a causal (tril) attention mask.
    B, T, C = x.shape
    hs = C // n_head
    qkv = jnp.einsum("btc,oc->bto", x, w_attn)          # (B, T, 3C)
    q, k, v = jnp.split(qkv, 3, axis=-1)

    def heads(t):                                       # (B, T, C) -> (B, H, T, hs)
        return t.reshape(B, T, n_head, hs).transpose(0, 2, 1, 3)

    q, k, v = heads(q), heads(k), heads(v)
    s = jnp.einsum("bhqd,bhkd->bhqk", q, k) / math.sqrt(hs)
    tril = jnp.tril(jnp.ones((T, T), dtype=bool))
    s = jnp.where(tril[None, None], s, -jnp.inf)
    p = jax.nn.softmax(s, axis=-1)
    y = jnp.einsum("bhqk,bhkd->bhqd", p, v)
    y = y.transpose(0, 2, 1, 3).reshape(B, T, C)
    return jnp.einsum("btc,oc->bto", y, w_proj)


if __name__ == "__main__":
    # Small shapes consistent with the module's sample input (x: (1, 4, 128*3)),
    # with batch=2 / seq=8 to also exercise batching and the causal mask.
    B, T, C, n_head = 2, 8, 384, 6

    key = jax.random.PRNGKey(0)
    kx, ka, kp = jax.random.split(key, 3)
    x = jax.random.normal(kx, (B, T, C), dtype=jnp.float32)
    # nn.Linear default init ~ U(-1/sqrt(fan_in), 1/sqrt(fan_in)); deterministic.
    bound = 1.0 / math.sqrt(C)
    w_attn = jax.random.uniform(ka, (3 * C, C), minval=-bound, maxval=bound,
                                dtype=jnp.float32)
    w_proj = jax.random.uniform(kp, (C, C), minval=-bound, maxval=bound,
                                dtype=jnp.float32)

    attn = jax.jit(make_causal_self_attention(B, T, C, n_head))
    out = jax.block_until_ready(attn(x, w_attn, w_proj))

    ref = reference_attention(x, w_attn, w_proj, n_head)
    assert out.shape == (B, T, C)
    # Loose tolerance: kernel uses bf16 activations/weights/intermediates with
    # f32 accumulation plus an approximate reciprocal, so it is not
    # bit-identical to the f32 reference.
    max_err = jnp.max(jnp.abs(out - ref))
    assert jnp.allclose(out, ref, atol=5e-2, rtol=5e-2), f"max abs err {max_err}"

    print("KERNEL_OK")
</pallas_src>

<mosaic_0001>
module attributes {stable_mosaic.version = 11 : i64} {
  func.func @_attn_kernel(%arg0: memref<2x8x384xbf16, #tpu.memory_space<vmem>>, %arg1: memref<384x1152xbf16, #tpu.memory_space<vmem>>, %arg2: memref<384x384xbf16, #tpu.memory_space<vmem>>, %arg3: memref<2x8x384xf32, #tpu.memory_space<vmem>>, %arg4: memref<2x8x1152xbf16, #tpu.memory_space<vmem>>, %arg5: memref<2x8x384xbf16, #tpu.memory_space<vmem>>) attributes {dimension_semantics = [], scalar_prefetch = 0 : i64, scratch_operands = 2 : i64, tpu.core_type = #tpu.core_type<tc>} {
    %c0 = arith.constant 0 : index
    %c0_0 = arith.constant 0 : index
    %c0_1 = arith.constant 0 : index
    %0 = vector.load %arg0[%c0, %c0_0, %c0_1] : memref<2x8x384xbf16, #tpu.memory_space<vmem>>, vector<1x8x384xbf16>
    %1 = vector.shape_cast %0 : vector<1x8x384xbf16> to vector<8x384xbf16>
    %c0_2 = arith.constant 0 : index
    %c0_3 = arith.constant 0 : index
    %2 = vector.load %arg1[%c0_2, %c0_3] : memref<384x1152xbf16, #tpu.memory_space<vmem>>, vector<384x1152xbf16>
    %cst = arith.constant dense<0.000000e+00> : vector<8x1152xf32>
    %3 = tpu.matmul %1, %2, %cst {dimension_numbers = #tpu.dot_dimension_numbers<[1], [0], [0], [1], [0, 0, 1, 1], [], []>} : vector<8x384xbf16>, vector<384x1152xbf16>, vector<8x1152xf32> -> vector<8x1152xf32>
    %4 = arith.truncf %3 : vector<8x1152xf32> to vector<8x1152xbf16>
    %c0_4 = arith.constant 0 : index
    %c0_5 = arith.constant 0 : index
    %c0_6 = arith.constant 0 : index
    %5 = vector.load %arg4[%c0_4, %c0_5, %c0_6] : memref<2x8x1152xbf16, #tpu.memory_space<vmem>>, vector<1x8x1152xbf16>
    %6 = vector.shape_cast %5 : vector<1x8x1152xbf16> to vector<8x1152xbf16>
    %7 = vector.shape_cast %4 : vector<8x1152xbf16> to vector<1x8x1152xbf16>
    tpu.vector_store %arg4[%c0_4, %c0_5, %c0_6], %7 {strides = array<i32>} : memref<2x8x1152xbf16, #tpu.memory_space<vmem>>, vector<1x8x1152xbf16>,
    %c1 = arith.constant 1 : index
    %c0_7 = arith.constant 0 : index
    %c0_8 = arith.constant 0 : index
    %8 = vector.load %arg0[%c1, %c0_7, %c0_8] : memref<2x8x384xbf16, #tpu.memory_space<vmem>>, vector<1x8x384xbf16>
    %9 = vector.shape_cast %8 : vector<1x8x384xbf16> to vector<8x384xbf16>
    %c0_9 = arith.constant 0 : index
    %c0_10 = arith.constant 0 : index
    %10 = vector.load %arg1[%c0_9, %c0_10] : memref<384x1152xbf16, #tpu.memory_space<vmem>>, vector<384x1152xbf16>
    %cst_11 = arith.constant dense<0.000000e+00> : vector<8x1152xf32>
    %11 = tpu.matmul %9, %10, %cst_11 {dimension_numbers = #tpu.dot_dimension_numbers<[1], [0], [0], [1], [0, 0, 1, 1], [], []>} : vector<8x384xbf16>, vector<384x1152xbf16>, vector<8x1152xf32> -> vector<8x1152xf32>
    %12 = arith.truncf %11 : vector<8x1152xf32> to vector<8x1152xbf16>
    %c1_12 = arith.constant 1 : index
    %c0_13 = arith.constant 0 : index
    %c0_14 = arith.constant 0 : index
    %13 = vector.load %arg4[%c1_12, %c0_13, %c0_14] : memref<2x8x1152xbf16, #tpu.memory_space<vmem>>, vector<1x8x1152xbf16>
    %14 = vector.shape_cast %13 : vector<1x8x1152xbf16> to vector<8x1152xbf16>
    %15 = vector.shape_cast %12 : vector<8x1152xbf16> to vector<1x8x1152xbf16>
    tpu.vector_store %arg4[%c1_12, %c0_13, %c0_14], %15 {strides = array<i32>} : memref<2x8x1152xbf16, #tpu.memory_space<vmem>>, vector<1x8x1152xbf16>,
    %16 = tpu.iota {dimensions = array<i32: 0>} : vector<8x8xi32>
    %17 = tpu.iota {dimensions = array<i32: 1>} : vector<8x8xi32>
    %18 = arith.cmpi sge, %16, %17 : vector<8x8xi32>
    %cst_15 = arith.constant 0.000000e+00 : f32
    %cst_16 = arith.constant -1.000000e+30 : f32
    %19 = vector.broadcast %cst_15 : f32 to vector<8x8xf32>
    %20 = vector.broadcast %cst_16 : f32 to vector<8x8xf32>
    %21 = arith.select %18, %19, %20 : vector<8x8xi1>, vector<8x8xf32>
    %c0_17 = arith.constant 0 : index
    %c0_18 = arith.constant 0 : index
    %c0_19 = arith.constant 0 : index
    %22 = vector.load %arg4[%c0_17, %c0_18, %c0_19] : memref<2x8x1152xbf16, #tpu.memory_space<vmem>>, vector<1x8x64xbf16>
    %23 = vector.shape_cast %22 : vector<1x8x64xbf16> to vector<8x64xbf16>
    %c0_20 = arith.constant 0 : index
    %c0_21 = arith.constant 0 : index
    %c384 = arith.constant 384 : index
    %24 = vector.load %arg4[%c0_20, %c0_21, %c384] : memref<2x8x1152xbf16, #tpu.memory_space<vmem>>, vector<1x8x64xbf16>
    %25 = vector.shape_cast %24 : vector<1x8x64xbf16> to vector<8x64xbf16>
    %c0_22 = arith.constant 0 : index
    %c0_23 = arith.constant 0 : index
    %c768 = arith.constant 768 : index
    %26 = vector.load %arg4[%c0_22, %c0_23, %c768] : memref<2x8x1152xbf16, #tpu.memory_space<vmem>>, vector<1x8x64xbf16>
    %27 = vector.shape_cast %26 : vector<1x8x64xbf16> to vector<8x64xbf16>
    %cst_24 = arith.constant dense<0.000000e+00> : vector<8x8xf32>
    %28 = tpu.matmul %23, %25, %cst_24 {dimension_numbers = #tpu.dot_dimension_numbers<[1], [1], [0], [0], [0, 0, 1, 0], [], []>} : vector<8x64xbf16>, vector<8x64xbf16>, vector<8x8xf32> -> vector<8x8xf32>
    %29 = arith.addf %28, %21 : vector<8x8xf32>
    %cst_25 = arith.constant dense<0xFF800000> : vector<8xf32>
    %30 = vector.multi_reduction <maximumf>, %29, %cst_25 [1] : vector<8x8xf32> to vector<8xf32>
    %31 = vector.shape_cast %30 : vector<8xf32> to vector<8x1xf32>
    %32 = vector.broadcast %31 : vector<8x1xf32> to vector<8x8xf32>
    %33 = arith.subf %29, %32 : vector<8x8xf32>
    %34 = math.exp %33 : vector<8x8xf32>
    %cst_26 = arith.constant dense<0.000000e+00> : vector<8xf32>
    %35 = vector.multi_reduction <add>, %34, %cst_26 [1] : vector<8x8xf32> to vector<8xf32>
    %36 = vector.shape_cast %35 : vector<8xf32> to vector<8x1xf32>
    %37 = tpu.reciprocal %36 {approx = true} : vector<8x1xf32> -> vector<8x1xf32>
    %38 = vector.broadcast %37 : vector<8x1xf32> to vector<8x8xf32>
    %39 = arith.mulf %34, %38 : vector<8x8xf32>
    %40 = arith.truncf %39 : vector<8x8xf32> to vector<8x8xbf16>
    %cst_27 = arith.constant dense<0.000000e+00> : vector<8x64xf32>
    %41 = tpu.matmul %40, %27, %cst_27 {dimension_numbers = #tpu.dot_dimension_numbers<[1], [0], [0], [1], [0, 0, 1, 1], [], []>} : vector<8x8xbf16>, vector<8x64xbf16>, vector<8x64xf32> -> vector<8x64xf32>
    %c0_28 = arith.constant 0 : index
    %c0_29 = arith.constant 0 : index
    %c64 = arith.constant 64 : index
    %42 = vector.load %arg4[%c0_28, %c0_29, %c64] : memref<2x8x1152xbf16, #tpu.memory_space<vmem>>, vector<1x8x64xbf16>
    %43 = vector.shape_cast %42 : vector<1x8x64xbf16> to vector<8x64xbf16>
    %c0_30 = arith.constant 0 : index
    %c0_31 = arith.constant 0 : index
    %c448 = arith.constant 448 : index
    %44 = vector.load %arg4[%c0_30, %c0_31, %c448] : memref<2x8x1152xbf16, #tpu.memory_space<vmem>>, vector<1x8x64xbf16>
    %45 = vector.shape_cast %44 : vector<1x8x64xbf16> to vector<8x64xbf16>
    %c0_32 = arith.constant 0 : index
    %c0_33 = arith.constant 0 : index
    %c832 = arith.constant 832 : index
    %46 = vector.load %arg4[%c0_32, %c0_33, %c832] : memref<2x8x1152xbf16, #tpu.memory_space<vmem>>, vector<1x8x64xbf16>
    %47 = vector.shape_cast %46 : vector<1x8x64xbf16> to vector<8x64xbf16>
    %cst_34 = arith.constant dense<0.000000e+00> : vector<8x8xf32>
    %48 = tpu.matmul %43, %45, %cst_34 {dimension_numbers = #tpu.dot_dimension_numbers<[1], [1], [0], [0], [0, 0, 1, 0], [], []>} : vector<8x64xbf16>, vector<8x64xbf16>, vector<8x8xf32> -> vector<8x8xf32>
    %49 = arith.addf %48, %21 : vector<8x8xf32>
    %cst_35 = arith.constant dense<0xFF800000> : vector<8xf32>
    %50 = vector.multi_reduction <maximumf>, %49, %cst_35 [1] : vector<8x8xf32> to vector<8xf32>
    %51 = vector.shape_cast %50 : vector<8xf32> to vector<8x1xf32>
    %52 = vector.broadcast %51 : vector<8x1xf32> to vector<8x8xf32>
    %53 = arith.subf %49, %52 : vector<8x8xf32>
    %54 = math.exp %53 : vector<8x8xf32>
    %cst_36 = arith.constant dense<0.000000e+00> : vector<8xf32>
    %55 = vector.multi_reduction <add>, %54, %cst_36 [1] : vector<8x8xf32> to vector<8xf32>
    %56 = vector.shape_cast %55 : vector<8xf32> to vector<8x1xf32>
    %57 = tpu.reciprocal %56 {approx = true} : vector<8x1xf32> -> vector<8x1xf32>
    %58 = vector.broadcast %57 : vector<8x1xf32> to vector<8x8xf32>
    %59 = arith.mulf %54, %58 : vector<8x8xf32>
    %60 = arith.truncf %59 : vector<8x8xf32> to vector<8x8xbf16>
    %cst_37 = arith.constant dense<0.000000e+00> : vector<8x64xf32>
    %61 = tpu.matmul %60, %47, %cst_37 {dimension_numbers = #tpu.dot_dimension_numbers<[1], [0], [0], [1], [0, 0, 1, 1], [], []>} : vector<8x8xbf16>, vector<8x64xbf16>, vector<8x64xf32> -> vector<8x64xf32>
    %62 = tpu.concatenate %41, %61 in 1 : vector<8x64xf32>, vector<8x64xf32> -> vector<8x128xf32>
    %63 = arith.truncf %62 : vector<8x128xf32> to vector<8x128xbf16>
    %c0_38 = arith.constant 0 : index
    %c0_39 = arith.constant 0 : index
    %c0_40 = arith.constant 0 : index
    %64 = vector.load %arg5[%c0_38, %c0_39, %c0_40] : memref<2x8x384xbf16, #tpu.memory_space<vmem>>, vector<1x8x128xbf16>
    %65 = vector.shape_cast %64 : vector<1x8x128xbf16> to vector<8x128xbf16>
    %66 = vector.shape_cast %63 : vector<8x128xbf16> to vector<1x8x128xbf16>
    tpu.vector_store %arg5[%c0_38, %c0_39, %c0_40], %66 {strides = array<i32>} : memref<2x8x384xbf16, #tpu.memory_space<vmem>>, vector<1x8x128xbf16>,
    %c0_41 = arith.constant 0 : index
    %c0_42 = arith.constant 0 : index
    %c128 = arith.constant 128 : index
    %67 = vector.load %arg4[%c0_41, %c0_42, %c128] : memref<2x8x1152xbf16, #tpu.memory_space<vmem>>, vector<1x8x64xbf16>
    %68 = vector.shape_cast %67 : vector<1x8x64xbf16> to vector<8x64xbf16>
    %c0_43 = arith.constant 0 : index
    %c0_44 = arith.constant 0 : index
    %c512 = arith.constant 512 : index
    %69 = vector.load %arg4[%c0_43, %c0_44, %c512] : memref<2x8x1152xbf16, #tpu.memory_space<vmem>>, vector<1x8x64xbf16>
    %70 = vector.shape_cast %69 : vector<1x8x64xbf16> to vector<8x64xbf16>
    %c0_45 = arith.constant 0 : index
    %c0_46 = arith.constant 0 : index
    %c896 = arith.constant 896 : index
    %71 = vector.load %arg4[%c0_45, %c0_46, %c896] : memref<2x8x1152xbf16, #tpu.memory_space<vmem>>, vector<1x8x64xbf16>
    %72 = vector.shape_cast %71 : vector<1x8x64xbf16> to vector<8x64xbf16>
    %cst_47 = arith.constant dense<0.000000e+00> : vector<8x8xf32>
    %73 = tpu.matmul %68, %70, %cst_47 {dimension_numbers = #tpu.dot_dimension_numbers<[1], [1], [0], [0], [0, 0, 1, 0], [], []>} : vector<8x64xbf16>, vector<8x64xbf16>, vector<8x8xf32> -> vector<8x8xf32>
    %74 = arith.addf %73, %21 : vector<8x8xf32>
    %cst_48 = arith.constant dense<0xFF800000> : vector<8xf32>
    %75 = vector.multi_reduction <maximumf>, %74, %cst_48 [1] : vector<8x8xf32> to vector<8xf32>
    %76 = vector.shape_cast %75 : vector<8xf32> to vector<8x1xf32>
    %77 = vector.broadcast %76 : vector<8x1xf32> to vector<8x8xf32>
    %78 = arith.subf %74, %77 : vector<8x8xf32>
    %79 = math.exp %78 : vector<8x8xf32>
    %cst_49 = arith.constant dense<0.000000e+00> : vector<8xf32>
    %80 = vector.multi_reduction <add>, %79, %cst_49 [1] : vector<8x8xf32> to vector<8xf32>
    %81 = vector.shape_cast %80 : vector<8xf32> to vector<8x1xf32>
    %82 = tpu.reciprocal %81 {approx = true} : vector<8x1xf32> -> vector<8x1xf32>
    %83 = vector.broadcast %82 : vector<8x1xf32> to vector<8x8xf32>
    %84 = arith.mulf %79, %83 : vector<8x8xf32>
    %85 = arith.truncf %84 : vector<8x8xf32> to vector<8x8xbf16>
    %cst_50 = arith.constant dense<0.000000e+00> : vector<8x64xf32>
    %86 = tpu.matmul %85, %72, %cst_50 {dimension_numbers = #tpu.dot_dimension_numbers<[1], [0], [0], [1], [0, 0, 1, 1], [], []>} : vector<8x8xbf16>, vector<8x64xbf16>, vector<8x64xf32> -> vector<8x64xf32>
    %c0_51 = arith.constant 0 : index
    %c0_52 = arith.constant 0 : index
    %c192 = arith.constant 192 : index
    %87 = vector.load %arg4[%c0_51, %c0_52, %c192] : memref<2x8x1152xbf16, #tpu.memory_space<vmem>>, vector<1x8x64xbf16>
    %88 = vector.shape_cast %87 : vector<1x8x64xbf16> to vector<8x64xbf16>
    %c0_53 = arith.constant 0 : index
    %c0_54 = arith.constant 0 : index
    %c576 = arith.constant 576 : index
    %89 = vector.load %arg4[%c0_53, %c0_54, %c576] : memref<2x8x1152xbf16, #tpu.memory_space<vmem>>, vector<1x8x64xbf16>
    %90 = vector.shape_cast %89 : vector<1x8x64xbf16> to vector<8x64xbf16>
    %c0_55 = arith.constant 0 : index
    %c0_56 = arith.constant 0 : index
    %c960 = arith.constant 960 : index
    %91 = vector.load %arg4[%c0_55, %c0_56, %c960] : memref<2x8x1152xbf16, #tpu.memory_space<vmem>>, vector<1x8x64xbf16>
    %92 = vector.shape_cast %91 : vector<1x8x64xbf16> to vector<8x64xbf16>
    %cst_57 = arith.constant dense<0.000000e+00> : vector<8x8xf32>
    %93 = tpu.matmul %88, %90, %cst_57 {dimension_numbers = #tpu.dot_dimension_numbers<[1], [1], [0], [0], [0, 0, 1, 0], [], []>} : vector<8x64xbf16>, vector<8x64xbf16>, vector<8x8xf32> -> vector<8x8xf32>
    %94 = arith.addf %93, %21 : vector<8x8xf32>
    %cst_58 = arith.constant dense<0xFF800000> : vector<8xf32>
    %95 = vector.multi_reduction <maximumf>, %94, %cst_58 [1] : vector<8x8xf32> to vector<8xf32>
    %96 = vector.shape_cast %95 : vector<8xf32> to vector<8x1xf32>
    %97 = vector.broadcast %96 : vector<8x1xf32> to vector<8x8xf32>
    %98 = arith.subf %94, %97 : vector<8x8xf32>
    %99 = math.exp %98 : vector<8x8xf32>
    %cst_59 = arith.constant dense<0.000000e+00> : vector<8xf32>
    %100 = vector.multi_reduction <add>, %99, %cst_59 [1] : vector<8x8xf32> to vector<8xf32>
    %101 = vector.shape_cast %100 : vector<8xf32> to vector<8x1xf32>
    %102 = tpu.reciprocal %101 {approx = true} : vector<8x1xf32> -> vector<8x1xf32>
    %103 = vector.broadcast %102 : vector<8x1xf32> to vector<8x8xf32>
    %104 = arith.mulf %99, %103 : vector<8x8xf32>
    %105 = arith.truncf %104 : vector<8x8xf32> to vector<8x8xbf16>
    %cst_60 = arith.constant dense<0.000000e+00> : vector<8x64xf32>
    %106 = tpu.matmul %105, %92, %cst_60 {dimension_numbers = #tpu.dot_dimension_numbers<[1], [0], [0], [1], [0, 0, 1, 1], [], []>} : vector<8x8xbf16>, vector<8x64xbf16>, vector<8x64xf32> -> vector<8x64xf32>
    %107 = tpu.concatenate %86, %106 in 1 : vector<8x64xf32>, vector<8x64xf32> -> vector<8x128xf32>
    %108 = arith.truncf %107 : vector<8x128xf32> to vector<8x128xbf16>
    %c0_61 = arith.constant 0 : index
    %c0_62 = arith.constant 0 : index
    %c128_63 = arith.constant 128 : index
    %109 = vector.load %arg5[%c0_61, %c0_62, %c128_63] : memref<2x8x384xbf16, #tpu.memory_space<vmem>>, vector<1x8x128xbf16>
    %110 = vector.shape_cast %109 : vector<1x8x128xbf16> to vector<8x128xbf16>
    %111 = vector.shape_cast %108 : vector<8x128xbf16> to vector<1x8x128xbf16>
    tpu.vector_store %arg5[%c0_61, %c0_62, %c128_63], %111 {strides = array<i32>} : memref<2x8x384xbf16, #tpu.memory_space<vmem>>, vector<1x8x128xbf16>,
    %c0_64 = arith.constant 0 : index
    %c0_65 = arith.constant 0 : index
    %c256 = arith.constant 256 : index
    %112 = vector.load %arg4[%c0_64, %c0_65, %c256] : memref<2x8x1152xbf16, #tpu.memory_space<vmem>>, vector<1x8x64xbf16>
    %113 = vector.shape_cast %112 : vector<1x8x64xbf16> to vector<8x64xbf16>
    %c0_66 = arith.constant 0 : index
    %c0_67 = arith.constant 0 : index
    %c640 = arith.constant 640 : index
    %114 = vector.load %arg4[%c0_66, %c0_67, %c640] : memref<2x8x1152xbf16, #tpu.memory_space<vmem>>, vector<1x8x64xbf16>
    %115 = vector.shape_cast %114 : vector<1x8x64xbf16> to vector<8x64xbf16>
    %c0_68 = arith.constant 0 : index
    %c0_69 = arith.constant 0 : index
    %c1024 = arith.constant 1024 : index
    %116 = vector.load %arg4[%c0_68, %c0_69, %c1024] : memref<2x8x1152xbf16, #tpu.memory_space<vmem>>, vector<1x8x64xbf16>
    %117 = vector.shape_cast %116 : vector<1x8x64xbf16> to vector<8x64xbf16>
    %cst_70 = arith.constant dense<0.000000e+00> : vector<8x8xf32>
    %118 = tpu.matmul %113, %115, %cst_70 {dimension_numbers = #tpu.dot_dimension_numbers<[1], [1], [0], [0], [0, 0, 1, 0], [], []>} : vector<8x64xbf16>, vector<8x64xbf16>, vector<8x8xf32> -> vector<8x8xf32>
    %119 = arith.addf %118, %21 : vector<8x8xf32>
    %cst_71 = arith.constant dense<0xFF800000> : vector<8xf32>
    %120 = vector.multi_reduction <maximumf>, %119, %cst_71 [1] : vector<8x8xf32> to vector<8xf32>
    %121 = vector.shape_cast %120 : vector<8xf32> to vector<8x1xf32>
    %122 = vector.broadcast %121 : vector<8x1xf32> to vector<8x8xf32>
    %123 = arith.subf %119, %122 : vector<8x8xf32>
    %124 = math.exp %123 : vector<8x8xf32>
    %cst_72 = arith.constant dense<0.000000e+00> : vector<8xf32>
    %125 = vector.multi_reduction <add>, %124, %cst_72 [1] : vector<8x8xf32> to vector<8xf32>
    %126 = vector.shape_cast %125 : vector<8xf32> to vector<8x1xf32>
    %127 = tpu.reciprocal %126 {approx = true} : vector<8x1xf32> -> vector<8x1xf32>
    %128 = vector.broadcast %127 : vector<8x1xf32> to vector<8x8xf32>
    %129 = arith.mulf %124, %128 : vector<8x8xf32>
    %130 = arith.truncf %129 : vector<8x8xf32> to vector<8x8xbf16>
    %cst_73 = arith.constant dense<0.000000e+00> : vector<8x64xf32>
    %131 = tpu.matmul %130, %117, %cst_73 {dimension_numbers = #tpu.dot_dimension_numbers<[1], [0], [0], [1], [0, 0, 1, 1], [], []>} : vector<8x8xbf16>, vector<8x64xbf16>, vector<8x64xf32> -> vector<8x64xf32>
    %c0_74 = arith.constant 0 : index
    %c0_75 = arith.constant 0 : index
    %c320 = arith.constant 320 : index
    %132 = vector.load %arg4[%c0_74, %c0_75, %c320] : memref<2x8x1152xbf16, #tpu.memory_space<vmem>>, vector<1x8x64xbf16>
    %133 = vector.shape_cast %132 : vector<1x8x64xbf16> to vector<8x64xbf16>
    %c0_76 = arith.constant 0 : index
    %c0_77 = arith.constant 0 : index
    %c704 = arith.constant 704 : index
    %134 = vector.load %arg4[%c0_76, %c0_77, %c704] : memref<2x8x1152xbf16, #tpu.memory_space<vmem>>, vector<1x8x64xbf16>
    %135 = vector.shape_cast %134 : vector<1x8x64xbf16> to vector<8x64xbf16>
    %c0_78 = arith.constant 0 : index
    %c0_79 = arith.constant 0 : index
    %c1088 = arith.constant 1088 : index
    %136 = vector.load %arg4[%c0_78, %c0_79, %c1088] : memref<2x8x1152xbf16, #tpu.memory_space<vmem>>, vector<1x8x64xbf16>
    %137 = vector.shape_cast %136 : vector<1x8x64xbf16> to vector<8x64xbf16>
    %cst_80 = arith.constant dense<0.000000e+00> : vector<8x8xf32>
    %138 = tpu.matmul %133, %135, %cst_80 {dimension_numbers = #tpu.dot_dimension_numbers<[1], [1], [0], [0], [0, 0, 1, 0], [], []>} : vector<8x64xbf16>, vector<8x64xbf16>, vector<8x8xf32> -> vector<8x8xf32>
    %139 = arith.addf %138, %21 : vector<8x8xf32>
    %cst_81 = arith.constant dense<0xFF800000> : vector<8xf32>
    %140 = vector.multi_reduction <maximumf>, %139, %cst_81 [1] : vector<8x8xf32> to vector<8xf32>
    %141 = vector.shape_cast %140 : vector<8xf32> to vector<8x1xf32>
    %142 = vector.broadcast %141 : vector<8x1xf32> to vector<8x8xf32>
    %143 = arith.subf %139, %142 : vector<8x8xf32>
    %144 = math.exp %143 : vector<8x8xf32>
    %cst_82 = arith.constant dense<0.000000e+00> : vector<8xf32>
    %145 = vector.multi_reduction <add>, %144, %cst_82 [1] : vector<8x8xf32> to vector<8xf32>
    %146 = vector.shape_cast %145 : vector<8xf32> to vector<8x1xf32>
    %147 = tpu.reciprocal %146 {approx = true} : vector<8x1xf32> -> vector<8x1xf32>
    %148 = vector.broadcast %147 : vector<8x1xf32> to vector<8x8xf32>
    %149 = arith.mulf %144, %148 : vector<8x8xf32>
    %150 = arith.truncf %149 : vector<8x8xf32> to vector<8x8xbf16>
    %cst_83 = arith.constant dense<0.000000e+00> : vector<8x64xf32>
    %151 = tpu.matmul %150, %137, %cst_83 {dimension_numbers = #tpu.dot_dimension_numbers<[1], [0], [0], [1], [0, 0, 1, 1], [], []>} : vector<8x8xbf16>, vector<8x64xbf16>, vector<8x64xf32> -> vector<8x64xf32>
    %152 = tpu.concatenate %131, %151 in 1 : vector<8x64xf32>, vector<8x64xf32> -> vector<8x128xf32>
    %153 = arith.truncf %152 : vector<8x128xf32> to vector<8x128xbf16>
    %c0_84 = arith.constant 0 : index
    %c0_85 = arith.constant 0 : index
    %c256_86 = arith.constant 256 : index
    %154 = vector.load %arg5[%c0_84, %c0_85, %c256_86] : memref<2x8x384xbf16, #tpu.memory_space<vmem>>, vector<1x8x128xbf16>
    %155 = vector.shape_cast %154 : vector<1x8x128xbf16> to vector<8x128xbf16>
    %156 = vector.shape_cast %153 : vector<8x128xbf16> to vector<1x8x128xbf16>
    tpu.vector_store %arg5[%c0_84, %c0_85, %c256_86], %156 {strides = array<i32>} : memref<2x8x384xbf16, #tpu.memory_space<vmem>>, vector<1x8x128xbf16>,
    %c1_87 = arith.constant 1 : index
    %c0_88 = arith.constant 0 : index
    %c0_89 = arith.constant 0 : index
    %157 = vector.load %arg4[%c1_87, %c0_88, %c0_89] : memref<2x8x1152xbf16, #tpu.memory_space<vmem>>, vector<1x8x64xbf16>
    %158 = vector.shape_cast %157 : vector<1x8x64xbf16> to vector<8x64xbf16>
    %c1_90 = arith.constant 1 : index
    %c0_91 = arith.constant 0 : index
    %c384_92 = arith.constant 384 : index
    %159 = vector.load %arg4[%c1_90, %c0_91, %c384_92] : memref<2x8x1152xbf16, #tpu.memory_space<vmem>>, vector<1x8x64xbf16>
    %160 = vector.shape_cast %159 : vector<1x8x64xbf16> to vector<8x64xbf16>
    %c1_93 = arith.constant 1 : index
    %c0_94 = arith.constant 0 : index
    %c768_95 = arith.constant 768 : index
    %161 = vector.load %arg4[%c1_93, %c0_94, %c768_95] : memref<2x8x1152xbf16, #tpu.memory_space<vmem>>, vector<1x8x64xbf16>
    %162 = vector.shape_cast %161 : vector<1x8x64xbf16> to vector<8x64xbf16>
    %cst_96 = arith.constant dense<0.000000e+00> : vector<8x8xf32>
    %163 = tpu.matmul %158, %160, %cst_96 {dimension_numbers = #tpu.dot_dimension_numbers<[1], [1], [0], [0], [0, 0, 1, 0], [], []>} : vector<8x64xbf16>, vector<8x64xbf16>, vector<8x8xf32> -> vector<8x8xf32>
    %164 = arith.addf %163, %21 : vector<8x8xf32>
    %cst_97 = arith.constant dense<0xFF800000> : vector<8xf32>
    %165 = vector.multi_reduction <maximumf>, %164, %cst_97 [1] : vector<8x8xf32> to vector<8xf32>
    %166 = vector.shape_cast %165 : vector<8xf32> to vector<8x1xf32>
    %167 = vector.broadcast %166 : vector<8x1xf32> to vector<8x8xf32>
    %168 = arith.subf %164, %167 : vector<8x8xf32>
    %169 = math.exp %168 : vector<8x8xf32>
    %cst_98 = arith.constant dense<0.000000e+00> : vector<8xf32>
    %170 = vector.multi_reduction <add>, %169, %cst_98 [1] : vector<8x8xf32> to vector<8xf32>
    %171 = vector.shape_cast %170 : vector<8xf32> to vector<8x1xf32>
    %172 = tpu.reciprocal %171 {approx = true} : vector<8x1xf32> -> vector<8x1xf32>
    %173 = vector.broadcast %172 : vector<8x1xf32> to vector<8x8xf32>
    %174 = arith.mulf %169, %173 : vector<8x8xf32>
    %175 = arith.truncf %174 : vector<8x8xf32> to vector<8x8xbf16>
    %cst_99 = arith.constant dense<0.000000e+00> : vector<8x64xf32>
    %176 = tpu.matmul %175, %162, %cst_99 {dimension_numbers = #tpu.dot_dimension_numbers<[1], [0], [0], [1], [0, 0, 1, 1], [], []>} : vector<8x8xbf16>, vector<8x64xbf16>, vector<8x64xf32> -> vector<8x64xf32>
    %c1_100 = arith.constant 1 : index
    %c0_101 = arith.constant 0 : index
    %c64_102 = arith.constant 64 : index
    %177 = vector.load %arg4[%c1_100, %c0_101, %c64_102] : memref<2x8x1152xbf16, #tpu.memory_space<vmem>>, vector<1x8x64xbf16>
    %178 = vector.shape_cast %177 : vector<1x8x64xbf16> to vector<8x64xbf16>
    %c1_103 = arith.constant 1 : index
    %c0_104 = arith.constant 0 : index
    %c448_105 = arith.constant 448 : index
    %179 = vector.load %arg4[%c1_103, %c0_104, %c448_105] : memref<2x8x1152xbf16, #tpu.memory_space<vmem>>, vector<1x8x64xbf16>
    %180 = vector.shape_cast %179 : vector<1x8x64xbf16> to vector<8x64xbf16>
    %c1_106 = arith.constant 1 : index
    %c0_107 = arith.constant 0 : index
    %c832_108 = arith.constant 832 : index
    %181 = vector.load %arg4[%c1_106, %c0_107, %c832_108] : memref<2x8x1152xbf16, #tpu.memory_space<vmem>>, vector<1x8x64xbf16>
    %182 = vector.shape_cast %181 : vector<1x8x64xbf16> to vector<8x64xbf16>
    %cst_109 = arith.constant dense<0.000000e+00> : vector<8x8xf32>
    %183 = tpu.matmul %178, %180, %cst_109 {dimension_numbers = #tpu.dot_dimension_numbers<[1], [1], [0], [0], [0, 0, 1, 0], [], []>} : vector<8x64xbf16>, vector<8x64xbf16>, vector<8x8xf32> -> vector<8x8xf32>
    %184 = arith.addf %183, %21 : vector<8x8xf32>
    %cst_110 = arith.constant dense<0xFF800000> : vector<8xf32>
    %185 = vector.multi_reduction <maximumf>, %184, %cst_110 [1] : vector<8x8xf32> to vector<8xf32>
    %186 = vector.shape_cast %185 : vector<8xf32> to vector<8x1xf32>
    %187 = vector.broadcast %186 : vector<8x1xf32> to vector<8x8xf32>
    %188 = arith.subf %184, %187 : vector<8x8xf32>
    %189 = math.exp %188 : vector<8x8xf32>
    %cst_111 = arith.constant dense<0.000000e+00> : vector<8xf32>
    %190 = vector.multi_reduction <add>, %189, %cst_111 [1] : vector<8x8xf32> to vector<8xf32>
    %191 = vector.shape_cast %190 : vector<8xf32> to vector<8x1xf32>
    %192 = tpu.reciprocal %191 {approx = true} : vector<8x1xf32> -> vector<8x1xf32>
    %193 = vector.broadcast %192 : vector<8x1xf32> to vector<8x8xf32>
    %194 = arith.mulf %189, %193 : vector<8x8xf32>
    %195 = arith.truncf %194 : vector<8x8xf32> to vector<8x8xbf16>
    %cst_112 = arith.constant dense<0.000000e+00> : vector<8x64xf32>
    %196 = tpu.matmul %195, %182, %cst_112 {dimension_numbers = #tpu.dot_dimension_numbers<[1], [0], [0], [1], [0, 0, 1, 1], [], []>} : vector<8x8xbf16>, vector<8x64xbf16>, vector<8x64xf32> -> vector<8x64xf32>
    %197 = tpu.concatenate %176, %196 in 1 : vector<8x64xf32>, vector<8x64xf32> -> vector<8x128xf32>
    %198 = arith.truncf %197 : vector<8x128xf32> to vector<8x128xbf16>
    %c1_113 = arith.constant 1 : index
    %c0_114 = arith.constant 0 : index
    %c0_115 = arith.constant 0 : index
    %199 = vector.load %arg5[%c1_113, %c0_114, %c0_115] : memref<2x8x384xbf16, #tpu.memory_space<vmem>>, vector<1x8x128xbf16>
    %200 = vector.shape_cast %199 : vector<1x8x128xbf16> to vector<8x128xbf16>
    %201 = vector.shape_cast %198 : vector<8x128xbf16> to vector<1x8x128xbf16>
    tpu.vector_store %arg5[%c1_113, %c0_114, %c0_115], %201 {strides = array<i32>} : memref<2x8x384xbf16, #tpu.memory_space<vmem>>, vector<1x8x128xbf16>,
    %c1_116 = arith.constant 1 : index
    %c0_117 = arith.constant 0 : index
    %c128_118 = arith.constant 128 : index
    %202 = vector.load %arg4[%c1_116, %c0_117, %c128_118] : memref<2x8x1152xbf16, #tpu.memory_space<vmem>>, vector<1x8x64xbf16>
    %203 = vector.shape_cast %202 : vector<1x8x64xbf16> to vector<8x64xbf16>
    %c1_119 = arith.constant 1 : index
    %c0_120 = arith.constant 0 : index
    %c512_121 = arith.constant 512 : index
    %204 = vector.load %arg4[%c1_119, %c0_120, %c512_121] : memref<2x8x1152xbf16, #tpu.memory_space<vmem>>, vector<1x8x64xbf16>
    %205 = vector.shape_cast %204 : vector<1x8x64xbf16> to vector<8x64xbf16>
    %c1_122 = arith.constant 1 : index
    %c0_123 = arith.constant 0 : index
    %c896_124 = arith.constant 896 : index
    %206 = vector.load %arg4[%c1_122, %c0_123, %c896_124] : memref<2x8x1152xbf16, #tpu.memory_space<vmem>>, vector<1x8x64xbf16>
    %207 = vector.shape_cast %206 : vector<1x8x64xbf16> to vector<8x64xbf16>
    %cst_125 = arith.constant dense<0.000000e+00> : vector<8x8xf32>
    %208 = tpu.matmul %203, %205, %cst_125 {dimension_numbers = #tpu.dot_dimension_numbers<[1], [1], [0], [0], [0, 0, 1, 0], [], []>} : vector<8x64xbf16>, vector<8x64xbf16>, vector<8x8xf32> -> vector<8x8xf32>
    %209 = arith.addf %208, %21 : vector<8x8xf32>
    %cst_126 = arith.constant dense<0xFF800000> : vector<8xf32>
    %210 = vector.multi_reduction <maximumf>, %209, %cst_126 [1] : vector<8x8xf32> to vector<8xf32>
    %211 = vector.shape_cast %210 : vector<8xf32> to vector<8x1xf32>
    %212 = vector.broadcast %211 : vector<8x1xf32> to vector<8x8xf32>
    %213 = arith.subf %209, %212 : vector<8x8xf32>
    %214 = math.exp %213 : vector<8x8xf32>
    %cst_127 = arith.constant dense<0.000000e+00> : vector<8xf32>
    %215 = vector.multi_reduction <add>, %214, %cst_127 [1] : vector<8x8xf32> to vector<8xf32>
    %216 = vector.shape_cast %215 : vector<8xf32> to vector<8x1xf32>
    %217 = tpu.reciprocal %216 {approx = true} : vector<8x1xf32> -> vector<8x1xf32>
    %218 = vector.broadcast %217 : vector<8x1xf32> to vector<8x8xf32>
    %219 = arith.mulf %214, %218 : vector<8x8xf32>
    %220 = arith.truncf %219 : vector<8x8xf32> to vector<8x8xbf16>
    %cst_128 = arith.constant dense<0.000000e+00> : vector<8x64xf32>
    %221 = tpu.matmul %220, %207, %cst_128 {dimension_numbers = #tpu.dot_dimension_numbers<[1], [0], [0], [1], [0, 0, 1, 1], [], []>} : vector<8x8xbf16>, vector<8x64xbf16>, vector<8x64xf32> -> vector<8x64xf32>
    %c1_129 = arith.constant 1 : index
    %c0_130 = arith.constant 0 : index
    %c192_131 = arith.constant 192 : index
    %222 = vector.load %arg4[%c1_129, %c0_130, %c192_131] : memref<2x8x1152xbf16, #tpu.memory_space<vmem>>, vector<1x8x64xbf16>
    %223 = vector.shape_cast %222 : vector<1x8x64xbf16> to vector<8x64xbf16>
    %c1_132 = arith.constant 1 : index
    %c0_133 = arith.constant 0 : index
    %c576_134 = arith.constant 576 : index
    %224 = vector.load %arg4[%c1_132, %c0_133, %c576_134] : memref<2x8x1152xbf16, #tpu.memory_space<vmem>>, vector<1x8x64xbf16>
    %225 = vector.shape_cast %224 : vector<1x8x64xbf16> to vector<8x64xbf16>
    %c1_135 = arith.constant 1 : index
    %c0_136 = arith.constant 0 : index
    %c960_137 = arith.constant 960 : index
    %226 = vector.load %arg4[%c1_135, %c0_136, %c960_137] : memref<2x8x1152xbf16, #tpu.memory_space<vmem>>, vector<1x8x64xbf16>
    %227 = vector.shape_cast %226 : vector<1x8x64xbf16> to vector<8x64xbf16>
    %cst_138 = arith.constant dense<0.000000e+00> : vector<8x8xf32>
    %228 = tpu.matmul %223, %225, %cst_138 {dimension_numbers = #tpu.dot_dimension_numbers<[1], [1], [0], [0], [0, 0, 1, 0], [], []>} : vector<8x64xbf16>, vector<8x64xbf16>, vector<8x8xf32> -> vector<8x8xf32>
    %229 = arith.addf %228, %21 : vector<8x8xf32>
    %cst_139 = arith.constant dense<0xFF800000> : vector<8xf32>
    %230 = vector.multi_reduction <maximumf>, %229, %cst_139 [1] : vector<8x8xf32> to vector<8xf32>
    %231 = vector.shape_cast %230 : vector<8xf32> to vector<8x1xf32>
    %232 = vector.broadcast %231 : vector<8x1xf32> to vector<8x8xf32>
    %233 = arith.subf %229, %232 : vector<8x8xf32>
    %234 = math.exp %233 : vector<8x8xf32>
    %cst_140 = arith.constant dense<0.000000e+00> : vector<8xf32>
    %235 = vector.multi_reduction <add>, %234, %cst_140 [1] : vector<8x8xf32> to vector<8xf32>
    %236 = vector.shape_cast %235 : vector<8xf32> to vector<8x1xf32>
    %237 = tpu.reciprocal %236 {approx = true} : vector<8x1xf32> -> vector<8x1xf32>
    %238 = vector.broadcast %237 : vector<8x1xf32> to vector<8x8xf32>
    %239 = arith.mulf %234, %238 : vector<8x8xf32>
    %240 = arith.truncf %239 : vector<8x8xf32> to vector<8x8xbf16>
    %cst_141 = arith.constant dense<0.000000e+00> : vector<8x64xf32>
    %241 = tpu.matmul %240, %227, %cst_141 {dimension_numbers = #tpu.dot_dimension_numbers<[1], [0], [0], [1], [0, 0, 1, 1], [], []>} : vector<8x8xbf16>, vector<8x64xbf16>, vector<8x64xf32> -> vector<8x64xf32>
    %242 = tpu.concatenate %221, %241 in 1 : vector<8x64xf32>, vector<8x64xf32> -> vector<8x128xf32>
    %243 = arith.truncf %242 : vector<8x128xf32> to vector<8x128xbf16>
    %c1_142 = arith.constant 1 : index
    %c0_143 = arith.constant 0 : index
    %c128_144 = arith.constant 128 : index
    %244 = vector.load %arg5[%c1_142, %c0_143, %c128_144] : memref<2x8x384xbf16, #tpu.memory_space<vmem>>, vector<1x8x128xbf16>
    %245 = vector.shape_cast %244 : vector<1x8x128xbf16> to vector<8x128xbf16>
    %246 = vector.shape_cast %243 : vector<8x128xbf16> to vector<1x8x128xbf16>
    tpu.vector_store %arg5[%c1_142, %c0_143, %c128_144], %246 {strides = array<i32>} : memref<2x8x384xbf16, #tpu.memory_space<vmem>>, vector<1x8x128xbf16>,
    %c1_145 = arith.constant 1 : index
    %c0_146 = arith.constant 0 : index
    %c256_147 = arith.constant 256 : index
    %247 = vector.load %arg4[%c1_145, %c0_146, %c256_147] : memref<2x8x1152xbf16, #tpu.memory_space<vmem>>, vector<1x8x64xbf16>
    %248 = vector.shape_cast %247 : vector<1x8x64xbf16> to vector<8x64xbf16>
    %c1_148 = arith.constant 1 : index
    %c0_149 = arith.constant 0 : index
    %c640_150 = arith.constant 640 : index
    %249 = vector.load %arg4[%c1_148, %c0_149, %c640_150] : memref<2x8x1152xbf16, #tpu.memory_space<vmem>>, vector<1x8x64xbf16>
    %250 = vector.shape_cast %249 : vector<1x8x64xbf16> to vector<8x64xbf16>
    %c1_151 = arith.constant 1 : index
    %c0_152 = arith.constant 0 : index
    %c1024_153 = arith.constant 1024 : index
    %251 = vector.load %arg4[%c1_151, %c0_152, %c1024_153] : memref<2x8x1152xbf16, #tpu.memory_space<vmem>>, vector<1x8x64xbf16>
    %252 = vector.shape_cast %251 : vector<1x8x64xbf16> to vector<8x64xbf16>
    %cst_154 = arith.constant dense<0.000000e+00> : vector<8x8xf32>
    %253 = tpu.matmul %248, %250, %cst_154 {dimension_numbers = #tpu.dot_dimension_numbers<[1], [1], [0], [0], [0, 0, 1, 0], [], []>} : vector<8x64xbf16>, vector<8x64xbf16>, vector<8x8xf32> -> vector<8x8xf32>
    %254 = arith.addf %253, %21 : vector<8x8xf32>
    %cst_155 = arith.constant dense<0xFF800000> : vector<8xf32>
    %255 = vector.multi_reduction <maximumf>, %254, %cst_155 [1] : vector<8x8xf32> to vector<8xf32>
    %256 = vector.shape_cast %255 : vector<8xf32> to vector<8x1xf32>
    %257 = vector.broadcast %256 : vector<8x1xf32> to vector<8x8xf32>
    %258 = arith.subf %254, %257 : vector<8x8xf32>
    %259 = math.exp %258 : vector<8x8xf32>
    %cst_156 = arith.constant dense<0.000000e+00> : vector<8xf32>
    %260 = vector.multi_reduction <add>, %259, %cst_156 [1] : vector<8x8xf32> to vector<8xf32>
    %261 = vector.shape_cast %260 : vector<8xf32> to vector<8x1xf32>
    %262 = tpu.reciprocal %261 {approx = true} : vector<8x1xf32> -> vector<8x1xf32>
    %263 = vector.broadcast %262 : vector<8x1xf32> to vector<8x8xf32>
    %264 = arith.mulf %259, %263 : vector<8x8xf32>
    %265 = arith.truncf %264 : vector<8x8xf32> to vector<8x8xbf16>
    %cst_157 = arith.constant dense<0.000000e+00> : vector<8x64xf32>
    %266 = tpu.matmul %265, %252, %cst_157 {dimension_numbers = #tpu.dot_dimension_numbers<[1], [0], [0], [1], [0, 0, 1, 1], [], []>} : vector<8x8xbf16>, vector<8x64xbf16>, vector<8x64xf32> -> vector<8x64xf32>
    %c1_158 = arith.constant 1 : index
    %c0_159 = arith.constant 0 : index
    %c320_160 = arith.constant 320 : index
    %267 = vector.load %arg4[%c1_158, %c0_159, %c320_160] : memref<2x8x1152xbf16, #tpu.memory_space<vmem>>, vector<1x8x64xbf16>
    %268 = vector.shape_cast %267 : vector<1x8x64xbf16> to vector<8x64xbf16>
    %c1_161 = arith.constant 1 : index
    %c0_162 = arith.constant 0 : index
    %c704_163 = arith.constant 704 : index
    %269 = vector.load %arg4[%c1_161, %c0_162, %c704_163] : memref<2x8x1152xbf16, #tpu.memory_space<vmem>>, vector<1x8x64xbf16>
    %270 = vector.shape_cast %269 : vector<1x8x64xbf16> to vector<8x64xbf16>
    %c1_164 = arith.constant 1 : index
    %c0_165 = arith.constant 0 : index
    %c1088_166 = arith.constant 1088 : index
    %271 = vector.load %arg4[%c1_164, %c0_165, %c1088_166] : memref<2x8x1152xbf16, #tpu.memory_space<vmem>>, vector<1x8x64xbf16>
    %272 = vector.shape_cast %271 : vector<1x8x64xbf16> to vector<8x64xbf16>
    %cst_167 = arith.constant dense<0.000000e+00> : vector<8x8xf32>
    %273 = tpu.matmul %268, %270, %cst_167 {dimension_numbers = #tpu.dot_dimension_numbers<[1], [1], [0], [0], [0, 0, 1, 0], [], []>} : vector<8x64xbf16>, vector<8x64xbf16>, vector<8x8xf32> -> vector<8x8xf32>
    %274 = arith.addf %273, %21 : vector<8x8xf32>
    %cst_168 = arith.constant dense<0xFF800000> : vector<8xf32>
    %275 = vector.multi_reduction <maximumf>, %274, %cst_168 [1] : vector<8x8xf32> to vector<8xf32>
    %276 = vector.shape_cast %275 : vector<8xf32> to vector<8x1xf32>
    %277 = vector.broadcast %276 : vector<8x1xf32> to vector<8x8xf32>
    %278 = arith.subf %274, %277 : vector<8x8xf32>
    %279 = math.exp %278 : vector<8x8xf32>
    %cst_169 = arith.constant dense<0.000000e+00> : vector<8xf32>
    %280 = vector.multi_reduction <add>, %279, %cst_169 [1] : vector<8x8xf32> to vector<8xf32>
    %281 = vector.shape_cast %280 : vector<8xf32> to vector<8x1xf32>
    %282 = tpu.reciprocal %281 {approx = true} : vector<8x1xf32> -> vector<8x1xf32>
    %283 = vector.broadcast %282 : vector<8x1xf32> to vector<8x8xf32>
    %284 = arith.mulf %279, %283 : vector<8x8xf32>
    %285 = arith.truncf %284 : vector<8x8xf32> to vector<8x8xbf16>
    %cst_170 = arith.constant dense<0.000000e+00> : vector<8x64xf32>
    %286 = tpu.matmul %285, %272, %cst_170 {dimension_numbers = #tpu.dot_dimension_numbers<[1], [0], [0], [1], [0, 0, 1, 1], [], []>} : vector<8x8xbf16>, vector<8x64xbf16>, vector<8x64xf32> -> vector<8x64xf32>
    %287 = tpu.concatenate %266, %286 in 1 : vector<8x64xf32>, vector<8x64xf32> -> vector<8x128xf32>
    %288 = arith.truncf %287 : vector<8x128xf32> to vector<8x128xbf16>
    %c1_171 = arith.constant 1 : index
    %c0_172 = arith.constant 0 : index
    %c256_173 = arith.constant 256 : index
    %289 = vector.load %arg5[%c1_171, %c0_172, %c256_173] : memref<2x8x384xbf16, #tpu.memory_space<vmem>>, vector<1x8x128xbf16>
    %290 = vector.shape_cast %289 : vector<1x8x128xbf16> to vector<8x128xbf16>
    %291 = vector.shape_cast %288 : vector<8x128xbf16> to vector<1x8x128xbf16>
    tpu.vector_store %arg5[%c1_171, %c0_172, %c256_173], %291 {strides = array<i32>} : memref<2x8x384xbf16, #tpu.memory_space<vmem>>, vector<1x8x128xbf16>,
    %c0_174 = arith.constant 0 : index
    %c0_175 = arith.constant 0 : index
    %c0_176 = arith.constant 0 : index
    %292 = vector.load %arg5[%c0_174, %c0_175, %c0_176] : memref<2x8x384xbf16, #tpu.memory_space<vmem>>, vector<1x8x384xbf16>
    %293 = vector.shape_cast %292 : vector<1x8x384xbf16> to vector<8x384xbf16>
    %c0_177 = arith.constant 0 : index
    %c0_178 = arith.constant 0 : index
    %294 = vector.load %arg2[%c0_177, %c0_178] : memref<384x384xbf16, #tpu.memory_space<vmem>>, vector<384x384xbf16>
    %cst_179 = arith.constant dense<0.000000e+00> : vector<8x384xf32>
    %295 = tpu.matmul %293, %294, %cst_179 {dimension_numbers = #tpu.dot_dimension_numbers<[1], [0], [0], [1], [0, 0, 1, 1], [], []>} : vector<8x384xbf16>, vector<384x384xbf16>, vector<8x384xf32> -> vector<8x384xf32>
    %c0_180 = arith.constant 0 : index
    %c0_181 = arith.constant 0 : index
    %c0_182 = arith.constant 0 : index
    %296 = vector.load %arg3[%c0_180, %c0_181, %c0_182] : memref<2x8x384xf32, #tpu.memory_space<vmem>>, vector<1x8x384xf32>
    %297 = vector.shape_cast %296 : vector<1x8x384xf32> to vector<8x384xf32>
    %298 = vector.shape_cast %295 : vector<8x384xf32> to vector<1x8x384xf32>
    tpu.vector_store %arg3[%c0_180, %c0_181, %c0_182], %298 {strides = array<i32>} : memref<2x8x384xf32, #tpu.memory_space<vmem>>, vector<1x8x384xf32>,
    %c1_183 = arith.constant 1 : index
    %c0_184 = arith.constant 0 : index
    %c0_185 = arith.constant 0 : index
    %299 = vector.load %arg5[%c1_183, %c0_184, %c0_185] : memref<2x8x384xbf16, #tpu.memory_space<vmem>>, vector<1x8x384xbf16>
    %300 = vector.shape_cast %299 : vector<1x8x384xbf16> to vector<8x384xbf16>
    %c0_186 = arith.constant 0 : index
    %c0_187 = arith.constant 0 : index
    %301 = vector.load %arg2[%c0_186, %c0_187] : memref<384x384xbf16, #tpu.memory_space<vmem>>, vector<384x384xbf16>
    %cst_188 = arith.constant dense<0.000000e+00> : vector<8x384xf32>
    %302 = tpu.matmul %300, %301, %cst_188 {dimension_numbers = #tpu.dot_dimension_numbers<[1], [0], [0], [1], [0, 0, 1, 1], [], []>} : vector<8x384xbf16>, vector<384x384xbf16>, vector<8x384xf32> -> vector<8x384xf32>
    %c1_189 = arith.constant 1 : index
    %c0_190 = arith.constant 0 : index
    %c0_191 = arith.constant 0 : index
    %303 = vector.load %arg3[%c1_189, %c0_190, %c0_191] : memref<2x8x384xf32, #tpu.memory_space<vmem>>, vector<1x8x384xf32>
    %304 = vector.shape_cast %303 : vector<1x8x384xf32> to vector<8x384xf32>
    %305 = vector.shape_cast %302 : vector<8x384xf32> to vector<1x8x384xf32>
    tpu.vector_store %arg3[%c1_189, %c0_190, %c0_191], %305 {strides = array<i32>} : memref<2x8x384xf32, #tpu.memory_space<vmem>>, vector<1x8x384xf32>,
    return
  }
}

</mosaic_0001>

<bundles_post_ra>
// kernel: fn.1
= control target key start
LH: loop header
LB: loop body
LE: loop exit
PB: predicated region body
PF: predicated region fallthrough
CT: control target
= control target key end

     0   :  { %vm8327_vm0 = vmmov 0   ;;  %s8328_s13 = smov 64   ;;  %s10627_s0 = inlined_call_operand.vmem [shape: bf16[2,8,384], index: 0, kind: input, shape index: {}]   ;;  %s10628_s1 = inlined_call_operand.vmem [shape: bf16[384,1152], index: 1, kind: input, shape index: {}]   ;;  %s10629_s2 = inlined_call_operand.vmem [shape: bf16[384,384], index: 2, kind: input, shape index: {}]   ;;  %s10630_s3 = inlined_call_operand.hbm [shape: f32[2,8,384], index: 3, kind: output, shape index: {}]  }
   0x1   :  { %v7479_v0 = vld [vmem:[%s10628_s1 + $0x4] ss:$36 sps:$4 sm:$0xff]   ;;  %v7481_v1 = vld [vmem:[%s10628_s1 + $0xc] ss:$36 sps:$4 sm:$0xff]   ;;  %v7487_v5 = vld [vmem:[%s10628_s1 + $0x54] ss:$36 sps:$4 sm:$0xff]  }
   0x2   :  { %1373 = vmatprep.subr.bf16.mxu0 %v7479_v0  ;;  %v7483_v2 = vld [vmem:[%s10628_s1] ss:$36 sps:$4 sm:$0xff]   ;;  %v7484_v3 = vld [vmem:[%s10628_s1 + $0x8] ss:$36 sps:$4 sm:$0xff]   ;;  %1455 = vmatprep.subr.bf16.mxu1 %v7481_v1  ;;  %v7490_v7 = vld [vmem:[%s10628_s1 + $0x50] ss:$36 sps:$4 sm:$0xff]  }
   0x3   :  { %v7485_v4 = vld [vmem:[%s10628_s1 + $0x4c] ss:$36 sps:$4 sm:$0xff]   ;;  %1374 = vmatpush1.bf16.msra.mxu0 %v7483_v2  ;;  %1456 = vmatpush1.bf16.msra.mxu1 %v7484_v3  ;;  %v7491_v8 = vld [vmem:[%s10628_s1 + $0x94] ss:$36 sps:$4 sm:$0xff]   ;;  %v7493_v9 = vld [vmem:[%s10628_s1 + $0x9c] ss:$36 sps:$4 sm:$0xff]  }
   0x4   :  { %v7489_v6 = vld [vmem:[%s10628_s1 + $0x48] ss:$36 sps:$4 sm:$0xff]   ;;  %1375 = vmatprep.subr.bf16.mxu0 %v7485_v4  ;;  %1457 = vmatprep.subr.bf16.mxu1 %v7487_v5  ;;  %v7495_v10 = vld [vmem:[%s10628_s1 + $0x90] ss:$36 sps:$4 sm:$0xff]   ;;  %v7496_v11 = vld [vmem:[%s10628_s1 + $0x98] ss:$36 sps:$4 sm:$0xff]  }
   0x5   :  { %v7497_v12 = vld [vmem:[%s10628_s1 + $0xdc] ss:$36 sps:$4 sm:$0xff]   ;;  %v7499_v13 = vld [vmem:[%s10628_s1 + $0xe4] ss:$36 sps:$4 sm:$0xff]   ;;  %v7505_v17 = vld [vmem:[%s10628_s1 + $0x12c] ss:$36 sps:$4 sm:$0xff]  }
   0x6   :  { %v7501_v14 = vld [vmem:[%s10628_s1 + $0xd8] ss:$36 sps:$4 sm:$0xff]   ;;  %v7502_v15 = vld [vmem:[%s10628_s1 + $0xe0] ss:$36 sps:$4 sm:$0xff]   ;;  %v7508_v19 = vld [vmem:[%s10628_s1 + $0x128] ss:$36 sps:$4 sm:$0xff]  }
   0x7   :  { %1376 = vmatpush1.bf16.msra.mxu0 %v7489_v6  ;;  %1458 = vmatpush1.bf16.msra.mxu1 %v7490_v7  ;;  %v7503_v16 = vld [vmem:[%s10628_s1 + $0x124] ss:$36 sps:$4 sm:$0xff]   ;;  %v7509_v20 = vld [vmem:[%s10628_s1 + $0x16c] ss:$36 sps:$4 sm:$0xff]   ;;  %v7511_v21 = vld [vmem:[%s10628_s1 + $0x174] ss:$36 sps:$4 sm:$0xff]  }
   0x8   :  { %1377 = vmatprep.subr.bf16.mxu0 %v7491_v8  ;;  %1459 = vmatprep.subr.bf16.mxu1 %v7493_v9  ;;  %v7507_v18 = vld [vmem:[%s10628_s1 + $0x120] ss:$36 sps:$4 sm:$0xff]   ;;  %v7513_v22 = vld [vmem:[%s10628_s1 + $0x168] ss:$36 sps:$4 sm:$0xff]   ;;  %v7514_v23 = vld [vmem:[%s10628_s1 + $0x170] ss:$36 sps:$4 sm:$0xff]  }
   0x9   :  { %v7515_v24 = vld [vmem:[%s10628_s1 + $0x1b4] ss:$36 sps:$4 sm:$0xff]   ;;  %v7517_v25 = vld [vmem:[%s10628_s1 + $0x1bc] ss:$36 sps:$4 sm:$0xff]   ;;  %v7523_v29 = vld [vmem:[%s10628_s1 + $0x204] ss:$36 sps:$4 sm:$0xff]  }
   0xa   :  { %v7519_v26 = vld [vmem:[%s10628_s1 + $0x1b0] ss:$36 sps:$4 sm:$0xff]   ;;  %v7520_v27 = vld [vmem:[%s10628_s1 + $0x1b8] ss:$36 sps:$4 sm:$0xff]   ;;  %v7526_v31 = vld [vmem:[%s10628_s1 + $0x200] ss:$36 sps:$4 sm:$0xff]  }
   0xb   :  { %1378 = vmatpush1.bf16.msra.mxu0 %v7495_v10  ;;  %1460 = vmatpush1.bf16.msra.mxu1 %v7496_v11  ;;  %v7521_v28 = vld [vmem:[%s10628_s1 + $0x1fc] ss:$36 sps:$4 sm:$0xff]   ;;  %v7527_v32 = vld [vmem:[%s10628_s1 + $0x244] ss:$36 sps:$4 sm:$0xff]   ;;  %v7529_v33 = vld [vmem:[%s10628_s1 + $0x24c] ss:$36 sps:$4 sm:$0xff]  }
   0xc   :  { %1379 = vmatprep.subr.bf16.mxu0 %v7497_v12  ;;  %1461 = vmatprep.subr.bf16.mxu1 %v7499_v13  ;;  %v7525_v30 = vld [vmem:[%s10628_s1 + $0x1f8] ss:$36 sps:$4 sm:$0xff]   ;;  %v7531_v34 = vld [vmem:[%s10628_s1 + $0x240] ss:$36 sps:$4 sm:$0xff]   ;;  %v7532_v35 = vld [vmem:[%s10628_s1 + $0x248] ss:$36 sps:$4 sm:$0xff]  }
   0xd   :  { %v7533_v36 = vld [vmem:[%s10628_s1 + $0x28c] ss:$36 sps:$4 sm:$0xff]   ;;  %v7535_v37 = vld [vmem:[%s10628_s1 + $0x294] ss:$36 sps:$4 sm:$0xff]   ;;  %v7541_v41 = vld [vmem:[%s10628_s1 + $0x2dc] ss:$36 sps:$4 sm:$0xff]  }
   0xe   :  { %v7537_v38 = vld [vmem:[%s10628_s1 + $0x288] ss:$36 sps:$4 sm:$0xff]   ;;  %v7538_v39 = vld [vmem:[%s10628_s1 + $0x290] ss:$36 sps:$4 sm:$0xff]   ;;  %v7544_v43 = vld [vmem:[%s10628_s1 + $0x2d8] ss:$36 sps:$4 sm:$0xff]  }
   0xf   :  { %1380 = vmatpush1.bf16.msra.mxu0 %v7501_v14  ;;  %1462 = vmatpush1.bf16.msra.mxu1 %v7502_v15  ;;  %v7539_v40 = vld [vmem:[%s10628_s1 + $0x2d4] ss:$36 sps:$4 sm:$0xff]   ;;  %v7545_v44 = vld [vmem:[%s10628_s1 + $0x31c] ss:$36 sps:$4 sm:$0xff]   ;;  %v7547_v45 = vld [vmem:[%s10628_s1 + $0x324] ss:$36 sps:$4 sm:$0xff]  }
  0x10   :  { %1381 = vmatprep.subr.bf16.mxu0 %v7503_v16  ;;  %1463 = vmatprep.subr.bf16.mxu1 %v7505_v17  ;;  %v7543_v42 = vld [vmem:[%s10628_s1 + $0x2d0] ss:$36 sps:$4 sm:$0xff]   ;;  %v16_v46 = vld [vmem:[%s10627_s0] sm:$0xff]  ;;  %v7549_v47 = vld [vmem:[%s10628_s1 + $0x318] ss:$36 sps:$4 sm:$0xff]   ;;  %v8325_v13 = vmov 0  }
  0x11   :  { %v8497_v48 = vcombine.high %v16_v46, %v16_v46  ;;  %v7550_v49 = vld [vmem:[%s10628_s1 + $0x320] ss:$36 sps:$4 sm:$0xff]   ;;  %v7553_v51 = vld [vmem:[%s10628_s1 + $0x36c] ss:$36 sps:$4 sm:$0xff]   ;;  %v7559_v55 = vld [vmem:[%s10628_s1 + $0x3b4] ss:$36 sps:$4 sm:$0xff]   ;;  %v8561_v5 = vcombine.low %v16_v46, %v16_v46 }
  0x12   :  { %v7551_v50 = vld [vmem:[%s10628_s1 + $0x364] ss:$36 sps:$4 sm:$0xff]   ;;  %v7557_v54 = vld [vmem:[%s10628_s1 + $0x3ac] ss:$36 sps:$4 sm:$0xff]   ;;  %v7563_v58 = vld [vmem:[%s10628_s1 + $0x3f4] ss:$36 sps:$4 sm:$0xff]  }
  0x13   :  { %1382 = vmatpush1.bf16.msra.mxu0 %v7507_v18  ;;  %1464 = vmatpush1.bf16.msra.mxu1 %v7508_v19  ;;  %v7555_v52 = vld [vmem:[%s10628_s1 + $0x360] ss:$36 sps:$4 sm:$0xff]   ;;  %v7556_v53 = vld [vmem:[%s10628_s1 + $0x368] ss:$36 sps:$4 sm:$0xff]   ;;  %v7562_v57 = vld [vmem:[%s10628_s1 + $0x3b0] ss:$36 sps:$4 sm:$0xff]  }
  0x14   :  { %1383 = vmatprep.subr.bf16.mxu0 %v7509_v20  ;;  %1465 = vmatprep.subr.bf16.mxu1 %v7511_v21  ;;  %v7561_v56 = vld [vmem:[%s10628_s1 + $0x3a8] ss:$36 sps:$4 sm:$0xff]   ;;  %v7565_v59 = vld [vmem:[%s10628_s1 + $0x3fc] ss:$36 sps:$4 sm:$0xff]   ;;  %v7567_v60 = vld [vmem:[%s10628_s1 + $0x3f0] ss:$36 sps:$4 sm:$0xff]  }
  0x15   :  { %1405 = vmatprep.mubr.bf16.mxu0 %v8497_v48  ;;  %1487 = vmatprep.mubr.bf16.mxu1 %v8497_v48  ;;  %v7568_v61 = vld [vmem:[%s10628_s1 + $0x3f8] ss:$36 sps:$4 sm:$0xff]   ;;  %v7571_v63 = vld [vmem:[%s10628_s1 + $0x444] ss:$36 sps:$4 sm:$0xff]   ;;  %v7581_v3 = vld [vmem:[%s10628_s1 + $0x48c] ss:$36 sps:$4 sm:$0xff]  }
  0x16   :  { %v7569_v62 = vld [vmem:[%s10628_s1 + $0x43c] ss:$36 sps:$4 sm:$0xff]   ;;  %v7578_v2 = vld [vmem:[%s10628_s1 + $0x484] ss:$36 sps:$4 sm:$0xff]   ;;  %v7585_v7 = vld [vmem:[%s10628_s1 + $0x4cc] ss:$36 sps:$4 sm:$0xff]  }
  0x17   :  { %1384 = vmatpush1.bf16.msra.mxu0 %v7513_v22  ;;  %1466 = vmatpush1.bf16.msra.mxu1 %v7514_v23  ;;  %v7573_v0 = vld [vmem:[%s10628_s1 + $0x438] ss:$36 sps:$4 sm:$0xff]   ;;  %v7574_v1 = vld [vmem:[%s10628_s1 + $0x440] ss:$36 sps:$4 sm:$0xff]   ;;  %v7579_v6 = vld [vmem:[%s10628_s1 + $0x488] ss:$36 sps:$4 sm:$0xff]  }
  0x18   :  { %1385 = vmatprep.subr.bf16.mxu0 %v7515_v24  ;;  %1467 = vmatprep.subr.bf16.mxu1 %v7517_v25  ;;  %v7576_v4 = vld [vmem:[%s10628_s1 + $0x480] ss:$36 sps:$4 sm:$0xff]   ;;  %v7588_v8 = vld [vmem:[%s10628_s1 + $0x4d4] ss:$36 sps:$4 sm:$0xff]   ;;  %v7583_v9 = vld [vmem:[%s10628_s1 + $0x4c8] ss:$36 sps:$4 sm:$0xff]  }
  0x19   :  { %v7586_v10 = vld [vmem:[%s10628_s1 + $0x4d0] ss:$36 sps:$4 sm:$0xff]   ;;  %v7594_v12 = vld [vmem:[%s10628_s1 + $0x51c] ss:$36 sps:$4 sm:$0xff]   ;;  %v7600_v17 = vld [vmem:[%s10628_s1 + $0x564] ss:$36 sps:$4 sm:$0xff]  }
  0x1a   :  { %v7591_v11 = vld [vmem:[%s10628_s1 + $0x514] ss:$36 sps:$4 sm:$0xff]   ;;  %v7597_v16 = vld [vmem:[%s10628_s1 + $0x55c] ss:$36 sps:$4 sm:$0xff]   ;;  %v7603_v20 = vld [vmem:[%s10628_s1 + $0x5a4] ss:$36 sps:$4 sm:$0xff]  }
  0x1b   :  { %1386 = vmatpush1.bf16.msra.mxu0 %v7519_v26  ;;  %1468 = vmatpush1.bf16.msra.mxu1 %v7520_v27  ;;  %v7589_v14 = vld [vmem:[%s10628_s1 + $0x510] ss:$36 sps:$4 sm:$0xff]   ;;  %v7592_v15 = vld [vmem:[%s10628_s1 + $0x518] ss:$36 sps:$4 sm:$0xff]   ;;  %v7598_v19 = vld [vmem:[%s10628_s1 + $0x560] ss:$36 sps:$4 sm:$0xff]  }
  0x1c   :  { %1387 = vmatprep.subr.bf16.mxu0 %v7521_v28  ;;  %1469 = vmatprep.subr.bf16.mxu1 %v7523_v29  ;;  %v7595_v18 = vld [vmem:[%s10628_s1 + $0x558] ss:$36 sps:$4 sm:$0xff]   ;;  %v7606_v21 = vld [vmem:[%s10628_s1 + $0x5ac] ss:$36 sps:$4 sm:$0xff]   ;;  %v7601_v22 = vld [vmem:[%s10628_s1 + $0x5a0] ss:$36 sps:$4 sm:$0xff]  }
  0x1d   :  { %v7604_v23 = vld [vmem:[%s10628_s1 + $0x5a8] ss:$36 sps:$4 sm:$0xff]   ;;  %v7612_v25 = vld [vmem:[%s10628_s1 + $0x5f4] ss:$36 sps:$4 sm:$0xff]   ;;  %v7618_v29 = vld [vmem:[%s10628_s1 + $0x63c] ss:$36 sps:$4 sm:$0xff]  }
  0x1e   :  { %v7609_v24 = vld [vmem:[%s10628_s1 + $0x5ec] ss:$36 sps:$4 sm:$0xff]   ;;  %v7615_v28 = vld [vmem:[%s10628_s1 + $0x634] ss:$36 sps:$4 sm:$0xff]  }
  0x1f   :  { %1388 = vmatpush1.bf16.msra.mxu0 %v7525_v30  ;;  %1470 = vmatpush1.bf16.msra.mxu1 %v7526_v31  ;;  %v7607_v26 = vld [vmem:[%s10628_s1 + $0x5e8] ss:$36 sps:$4 sm:$0xff]   ;;  %v7610_v27 = vld [vmem:[%s10628_s1 + $0x5f0] ss:$36 sps:$4 sm:$0xff]   ;;  %v7616_v31 = vld [vmem:[%s10628_s1 + $0x638] ss:$36 sps:$4 sm:$0xff]  }
  0x20   :  { %1389 = vmatprep.subr.bf16.mxu0 %v7527_v32  ;;  %1471 = vmatprep.subr.bf16.mxu1 %v7529_v33  ;;  %v7613_v30 = vld [vmem:[%s10628_s1 + $0x630] ss:$36 sps:$4 sm:$0xff]   ;;  %v7621_v32 = vld [vmem:[%s10628_s1 + $0x67c] ss:$36 sps:$4 sm:$0xff]   ;;  %v7624_v33 = vld [vmem:[%s10628_s1 + $0x684] ss:$36 sps:$4 sm:$0xff]  }
  0x21   :  { %v7643_v46 = vld [vmem:[%s10628_s1 + $0xac] ss:$36 sps:$4 sm:$0xff]  }
  0x23   :  { %1390 = vmatpush1.bf16.msra.mxu0 %v7531_v34  ;;  %1472 = vmatpush1.bf16.msra.mxu1 %v7532_v35  ;;  %v7619_v34 = vld [vmem:[%s10628_s1 + $0x678] ss:$36 sps:$4 sm:$0xff]   ;;  %v7622_v35 = vld [vmem:[%s10628_s1 + $0x680] ss:$36 sps:$4 sm:$0xff]  }
  0x24   :  { %1391 = vmatprep.subr.bf16.mxu0 %v7533_v36  ;;  %1473 = vmatprep.subr.bf16.mxu1 %v7535_v37  ;;  %v7628_v36 = vld [vmem:[%s10628_s1 + $0x14] ss:$36 sps:$4 sm:$0xff]   ;;  %v7631_v37 = vld [vmem:[%s10628_s1 + $0x1c] ss:$36 sps:$4 sm:$0xff]  }
  0x27   :  { %1392 = vmatpush1.bf16.msra.mxu0 %v7537_v38  ;;  %1474 = vmatpush1.bf16.msra.mxu1 %v7538_v39  ;;  %v8663_v38 = vld [vmem:[%s10627_s0 + $0x8] ss:$0 sps:$4 sm:$0xff]   ;;  %v7626_v39 = vld [vmem:[%s10628_s1 + $0x10] ss:$36 sps:$4 sm:$0xff]  }
  0x28   :  { %1393 = vmatprep.subr.bf16.mxu0 %v7539_v40  ;;  %1475 = vmatprep.subr.bf16.mxu1 %v7541_v41  ;;  %v7629_v40 = vld [vmem:[%s10628_s1 + $0x18] ss:$36 sps:$4 sm:$0xff]  }
  0x29   :  { %v7634_v41 = vld [vmem:[%s10628_s1 + $0x5c] ss:$36 sps:$4 sm:$0xff]  }
  0x2b   :  { %1394 = vmatpush1.bf16.msra.mxu0 %v7543_v42  ;;  %1476 = vmatpush1.bf16.msra.mxu1 %v7544_v43  ;;  %v7637_v42 = vld [vmem:[%s10628_s1 + $0x64] ss:$36 sps:$4 sm:$0xff]   ;;  %v7632_v43 = vld [vmem:[%s10628_s1 + $0x58] ss:$36 sps:$4 sm:$0xff]  }
  0x2c   :  { %1395 = vmatprep.subr.bf16.mxu0 %v7545_v44  ;;  %1477 = vmatprep.subr.bf16.mxu1 %v7547_v45  ;;  %v7635_v44 = vld [vmem:[%s10628_s1 + $0x60] ss:$36 sps:$4 sm:$0xff]  }
  0x2d   :  { %v7640_v45 = vld [vmem:[%s10628_s1 + $0xa4] ss:$36 sps:$4 sm:$0xff]  }
  0x2f   :  { %1396 = vmatpush1.bf16.msra.mxu0 %v7549_v47  ;;  %1478 = vmatpush1.bf16.msra.mxu1 %v7550_v49  ;;  %v7638_v47 = vld [vmem:[%s10628_s1 + $0xa0] ss:$36 sps:$4 sm:$0xff]   ;;  %v7641_v49 = vld [vmem:[%s10628_s1 + $0xa8] ss:$36 sps:$4 sm:$0xff]  }
  0x30   :  { %1397 = vmatprep.subr.bf16.mxu0 %v7551_v50  ;;  %1479 = vmatprep.subr.bf16.mxu1 %v7553_v51  ;;  %v7646_v50 = vld [vmem:[%s10628_s1 + $0xec] ss:$36 sps:$4 sm:$0xff]   ;;  %v7649_v51 = vld [vmem:[%s10628_s1 + $0xf4] ss:$36 sps:$4 sm:$0xff]  }
  0x33   :  { %1398 = vmatpush1.bf16.msra.mxu0 %v7555_v52  ;;  %1480 = vmatpush1.bf16.msra.mxu1 %v7556_v53  ;;  %v7644_v52 = vld [vmem:[%s10628_s1 + $0xe8] ss:$36 sps:$4 sm:$0xff]   ;;  %v7647_v53 = vld [vmem:[%s10628_s1 + $0xf0] ss:$36 sps:$4 sm:$0xff]  }
  0x34   :  { %1399 = vmatprep.subr.bf16.mxu0 %v7557_v54  ;;  %1481 = vmatprep.subr.bf16.mxu1 %v7559_v55  ;;  %v7652_v54 = vld [vmem:[%s10628_s1 + $0x134] ss:$36 sps:$4 sm:$0xff]   ;;  %v7655_v55 = vld [vmem:[%s10628_s1 + $0x13c] ss:$36 sps:$4 sm:$0xff]  }
  0x37   :  { %1400 = vmatpush1.bf16.msra.mxu0 %v7561_v56  ;;  %1482 = vmatpush1.bf16.msra.mxu1 %v7562_v57  ;;  %v7650_v56 = vld [vmem:[%s10628_s1 + $0x130] ss:$36 sps:$4 sm:$0xff]   ;;  %v7653_v57 = vld [vmem:[%s10628_s1 + $0x138] ss:$36 sps:$4 sm:$0xff]  }
  0x38   :  { %1401 = vmatprep.subr.bf16.mxu0 %v7563_v58  ;;  %1483 = vmatprep.subr.bf16.mxu1 %v7565_v59  ;;  %v7658_v58 = vld [vmem:[%s10628_s1 + $0x17c] ss:$36 sps:$4 sm:$0xff]   ;;  %v7661_v59 = vld [vmem:[%s10628_s1 + $0x184] ss:$36 sps:$4 sm:$0xff]  }
  0x3b   :  { %1402 = vmatpush1.bf16.msra.mxu0 %v7567_v60  ;;  %1484 = vmatpush1.bf16.msra.mxu1 %v7568_v61  ;;  %v7656_v60 = vld [vmem:[%s10628_s1 + $0x178] ss:$36 sps:$4 sm:$0xff]   ;;  %v7659_v61 = vld [vmem:[%s10628_s1 + $0x180] ss:$36 sps:$4 sm:$0xff]  }
  0x3c   :  { %1403 = vmatprep.subr.bf16.mxu0 %v7569_v62  ;;  %1485 = vmatprep.subr.bf16.mxu1 %v7571_v63  ;;  %v7664_v62 = vld [vmem:[%s10628_s1 + $0x1c4] ss:$36 sps:$4 sm:$0xff]   ;;  %v7667_v63 = vld [vmem:[%s10628_s1 + $0x1cc] ss:$36 sps:$4 sm:$0xff]  }
  0x3f   :  { %1404 = vmatpush1.bf16.msra.mxu0 %v7573_v0  ;;  %1486 = vmatpush1.bf16.msra.mxu1 %v7574_v1  ;;  %v7662_v0 = vld [vmem:[%s10628_s1 + $0x1c0] ss:$36 sps:$4 sm:$0xff]   ;;  %v7665_v1 = vld [vmem:[%s10628_s1 + $0x1c8] ss:$36 sps:$4 sm:$0xff]  }
  0x40   :  { %1414 = vmatprep.subr.bf16.mxu0 %v7578_v2  ;;  %1496 = vmatprep.subr.bf16.mxu1 %v7581_v3  ;;  %v7670_v2 = vld [vmem:[%s10628_s1 + $0x20c] ss:$36 sps:$4 sm:$0xff]   ;;  %v7673_v3 = vld [vmem:[%s10628_s1 + $0x214] ss:$36 sps:$4 sm:$0xff]  }
  0x42   :  { %1406 = vmatmul.mubr.bf16.vlgmr.msra.gmra.mrb[0].mxu0 %v8561_v5  ;;  %1488 = vmatmul.mubr.bf16.vlgmr.msra.gmra.mrb[0].mxu1 %v8561_v5 }
  0x43   :  { %1415 = vmatpush1.bf16.msra.mxu0 %v7576_v4  ;;  %1497 = vmatpush1.bf16.msra.mxu1 %v7579_v6  ;;  %v7668_v4 = vld [vmem:[%s10628_s1 + $0x208] ss:$36 sps:$4 sm:$0xff]   ;;  %v7671_v6 = vld [vmem:[%s10628_s1 + $0x210] ss:$36 sps:$4 sm:$0xff]  }
  0x44   :  { %1416 = vmatprep.subr.bf16.mxu0 %v7585_v7  ;;  %1498 = vmatprep.subr.bf16.mxu1 %v7588_v8  ;;  %v7676_v7 = vld [vmem:[%s10628_s1 + $0x254] ss:$36 sps:$4 sm:$0xff]   ;;  %v7679_v8 = vld [vmem:[%s10628_s1 + $0x25c] ss:$36 sps:$4 sm:$0xff]  }
  0x45   :  { %1446 = vmatprep.mubr.bf16.mxu0 %v8325_v13  ;;  %1528 = vmatprep.mubr.bf16.mxu1 %v8325_v13 }
  0x47   :  { %1417 = vmatpush1.bf16.msra.mxu0 %v7583_v9  ;;  %1499 = vmatpush1.bf16.msra.mxu1 %v7586_v10  ;;  %v7674_v9 = vld [vmem:[%s10628_s1 + $0x250] ss:$36 sps:$4 sm:$0xff]   ;;  %v7677_v10 = vld [vmem:[%s10628_s1 + $0x258] ss:$36 sps:$4 sm:$0xff]  }
  0x48   :  { %1418 = vmatprep.subr.bf16.mxu0 %v7591_v11  ;;  %1500 = vmatprep.subr.bf16.mxu1 %v7594_v12  ;;  %v7682_v11 = vld [vmem:[%s10628_s1 + $0x29c] ss:$36 sps:$4 sm:$0xff]   ;;  %v7685_v12 = vld [vmem:[%s10628_s1 + $0x2a4] ss:$36 sps:$4 sm:$0xff]  }
  0x4b   :  { %1419 = vmatpush1.bf16.msra.mxu0 %v7589_v14  ;;  %1501 = vmatpush1.bf16.msra.mxu1 %v7592_v15  ;;  %v7680_v14 = vld [vmem:[%s10628_s1 + $0x298] ss:$36 sps:$4 sm:$0xff]   ;;  %v7683_v15 = vld [vmem:[%s10628_s1 + $0x2a0] ss:$36 sps:$4 sm:$0xff]  }
  0x4c   :  { %1420 = vmatprep.subr.bf16.mxu0 %v7597_v16  ;;  %1502 = vmatprep.subr.bf16.mxu1 %v7600_v17  ;;  %v7688_v16 = vld [vmem:[%s10628_s1 + $0x2e4] ss:$36 sps:$4 sm:$0xff]   ;;  %v7691_v17 = vld [vmem:[%s10628_s1 + $0x2ec] ss:$36 sps:$4 sm:$0xff]  }
  0x4f   :  { %1421 = vmatpush1.bf16.msra.mxu0 %v7595_v18  ;;  %1503 = vmatpush1.bf16.msra.mxu1 %v7598_v19  ;;  %v7686_v18 = vld [vmem:[%s10628_s1 + $0x2e0] ss:$36 sps:$4 sm:$0xff]   ;;  %v7689_v19 = vld [vmem:[%s10628_s1 + $0x2e8] ss:$36 sps:$4 sm:$0xff]  }
  0x50   :  { %1422 = vmatprep.subr.bf16.mxu0 %v7603_v20  ;;  %1504 = vmatprep.subr.bf16.mxu1 %v7606_v21  ;;  %v7694_v20 = vld [vmem:[%s10628_s1 + $0x32c] ss:$36 sps:$4 sm:$0xff]   ;;  %v7697_v21 = vld [vmem:[%s10628_s1 + $0x334] ss:$36 sps:$4 sm:$0xff]  }
  0x53   :  { %1423 = vmatpush1.bf16.msra.mxu0 %v7601_v22  ;;  %1505 = vmatpush1.bf16.msra.mxu1 %v7604_v23  ;;  %v7692_v22 = vld [vmem:[%s10628_s1 + $0x328] ss:$36 sps:$4 sm:$0xff]   ;;  %v7695_v23 = vld [vmem:[%s10628_s1 + $0x330] ss:$36 sps:$4 sm:$0xff]  }
  0x54   :  { %1424 = vmatprep.subr.bf16.mxu0 %v7609_v24  ;;  %1506 = vmatprep.subr.bf16.mxu1 %v7612_v25  ;;  %v7700_v24 = vld [vmem:[%s10628_s1 + $0x374] ss:$36 sps:$4 sm:$0xff]   ;;  %v7703_v25 = vld [vmem:[%s10628_s1 + $0x37c] ss:$36 sps:$4 sm:$0xff]  }
  0x57   :  { %1425 = vmatpush1.bf16.msra.mxu0 %v7607_v26  ;;  %1507 = vmatpush1.bf16.msra.mxu1 %v7610_v27  ;;  %v7698_v26 = vld [vmem:[%s10628_s1 + $0x370] ss:$36 sps:$4 sm:$0xff]   ;;  %v7701_v27 = vld [vmem:[%s10628_s1 + $0x378] ss:$36 sps:$4 sm:$0xff]  }
  0x58   :  { %1426 = vmatprep.subr.bf16.mxu0 %v7615_v28  ;;  %1508 = vmatprep.subr.bf16.mxu1 %v7618_v29  ;;  %v7706_v28 = vld [vmem:[%s10628_s1 + $0x3bc] ss:$36 sps:$4 sm:$0xff]   ;;  %v7709_v29 = vld [vmem:[%s10628_s1 + $0x3c4] ss:$36 sps:$4 sm:$0xff]  }
  0x5b   :  { %1427 = vmatpush1.bf16.msra.mxu0 %v7613_v30  ;;  %1509 = vmatpush1.bf16.msra.mxu1 %v7616_v31  ;;  %v7704_v30 = vld [vmem:[%s10628_s1 + $0x3b8] ss:$36 sps:$4 sm:$0xff]   ;;  %v7707_v31 = vld [vmem:[%s10628_s1 + $0x3c0] ss:$36 sps:$4 sm:$0xff]  }
  0x5c   :  { %1428 = vmatprep.subr.bf16.mxu0 %v7621_v32  ;;  %1510 = vmatprep.subr.bf16.mxu1 %v7624_v33  ;;  %v7712_v32 = vld [vmem:[%s10628_s1 + $0x404] ss:$36 sps:$4 sm:$0xff]   ;;  %v7715_v33 = vld [vmem:[%s10628_s1 + $0x40c] ss:$36 sps:$4 sm:$0xff]  }
  0x5f   :  { %1429 = vmatpush1.bf16.msra.mxu0 %v7619_v34  ;;  %1511 = vmatpush1.bf16.msra.mxu1 %v7622_v35  ;;  %v7710_v34 = vld [vmem:[%s10628_s1 + $0x400] ss:$36 sps:$4 sm:$0xff]   ;;  %v7713_v35 = vld [vmem:[%s10628_s1 + $0x408] ss:$36 sps:$4 sm:$0xff]  }
  0x60   :  { %1537 = vmatprep.subr.bf16.mxu0 %v7628_v36  ;;  %1619 = vmatprep.subr.bf16.mxu1 %v7631_v37  ;;  %v7718_v36 = vld [vmem:[%s10628_s1 + $0x44c] ss:$36 sps:$4 sm:$0xff]   ;;  %v7721_v37 = vld [vmem:[%s10628_s1 + $0x454] ss:$36 sps:$4 sm:$0xff]  }
  0x62   :  { %1447 = vmatmul.mubr.bf16.vlgmr.msra.gmra.mrb[0].mxu0 %v8663_v38  ;;  %1529 = vmatmul.mubr.bf16.vlgmr.msra.gmra.mrb[0].mxu1 %v8663_v38 }
  0x63   :  { %1538 = vmatpush1.bf16.msra.mxu0 %v7626_v39  ;;  %1620 = vmatpush1.bf16.msra.mxu1 %v7629_v40  ;;  %v7716_v39 = vld [vmem:[%s10628_s1 + $0x448] ss:$36 sps:$4 sm:$0xff]   ;;  %v7719_v40 = vld [vmem:[%s10628_s1 + $0x450] ss:$36 sps:$4 sm:$0xff]  }
  0x64   :  { %1539 = vmatprep.subr.bf16.mxu0 %v7634_v41  ;;  %1621 = vmatprep.subr.bf16.mxu1 %v7637_v42  ;;  %v7724_v41 = vld [vmem:[%s10628_s1 + $0x494] ss:$36 sps:$4 sm:$0xff]   ;;  %v7727_v42 = vld [vmem:[%s10628_s1 + $0x49c] ss:$36 sps:$4 sm:$0xff]  }
  0x65   :  { %1569 = vmatprep.mubr.bf16.mxu0 %v8497_v48  ;;  %1651 = vmatprep.mubr.bf16.mxu1 %v8497_v48 }
  0x67   :  { %1540 = vmatpush1.bf16.msra.mxu0 %v7632_v43  ;;  %1622 = vmatpush1.bf16.msra.mxu1 %v7635_v44  ;;  %v7722_v43 = vld [vmem:[%s10628_s1 + $0x490] ss:$36 sps:$4 sm:$0xff]   ;;  %v7725_v44 = vld [vmem:[%s10628_s1 + $0x498] ss:$36 sps:$4 sm:$0xff]  }
  0x68   :  { %1541 = vmatprep.subr.bf16.mxu0 %v7640_v45  ;;  %1623 = vmatprep.subr.bf16.mxu1 %v7643_v46  ;;  %v7730_v45 = vld [vmem:[%s10628_s1 + $0x4dc] ss:$36 sps:$4 sm:$0xff]   ;;  %v7733_v46 = vld [vmem:[%s10628_s1 + $0x4e4] ss:$36 sps:$4 sm:$0xff]  }
  0x6b   :  { %1542 = vmatpush1.bf16.msra.mxu0 %v7638_v47  ;;  %1624 = vmatpush1.bf16.msra.mxu1 %v7641_v49  ;;  %v7728_v47 = vld [vmem:[%s10628_s1 + $0x4d8] ss:$36 sps:$4 sm:$0xff]   ;;  %v7731_v49 = vld [vmem:[%s10628_s1 + $0x4e0] ss:$36 sps:$4 sm:$0xff]  }
  0x6c   :  { %1543 = vmatprep.subr.bf16.mxu0 %v7646_v50  ;;  %1625 = vmatprep.subr.bf16.mxu1 %v7649_v51  ;;  %v7736_v50 = vld [vmem:[%s10628_s1 + $0x524] ss:$36 sps:$4 sm:$0xff]   ;;  %v7739_v51 = vld [vmem:[%s10628_s1 + $0x52c] ss:$36 sps:$4 sm:$0xff]  }
  0x6f   :  { %1544 = vmatpush1.bf16.msra.mxu0 %v7644_v52  ;;  %1626 = vmatpush1.bf16.msra.mxu1 %v7647_v53  ;;  %v7734_v52 = vld [vmem:[%s10628_s1 + $0x520] ss:$36 sps:$4 sm:$0xff]   ;;  %v7737_v53 = vld [vmem:[%s10628_s1 + $0x528] ss:$36 sps:$4 sm:$0xff]  }
  0x70   :  { %1545 = vmatprep.subr.bf16.mxu0 %v7652_v54  ;;  %1627 = vmatprep.subr.bf16.mxu1 %v7655_v55  ;;  %v7742_v54 = vld [vmem:[%s10628_s1 + $0x56c] ss:$36 sps:$4 sm:$0xff]   ;;  %v7745_v55 = vld [vmem:[%s10628_s1 + $0x574] ss:$36 sps:$4 sm:$0xff]  }
  0x73   :  { %1546 = vmatpush1.bf16.msra.mxu0 %v7650_v56  ;;  %1628 = vmatpush1.bf16.msra.mxu1 %v7653_v57  ;;  %v7740_v56 = vld [vmem:[%s10628_s1 + $0x568] ss:$36 sps:$4 sm:$0xff]   ;;  %v7743_v57 = vld [vmem:[%s10628_s1 + $0x570] ss:$36 sps:$4 sm:$0xff]  }
  0x74   :  { %1547 = vmatprep.subr.bf16.mxu0 %v7658_v58  ;;  %1629 = vmatprep.subr.bf16.mxu1 %v7661_v59  ;;  %v7748_v58 = vld [vmem:[%s10628_s1 + $0x5b4] ss:$36 sps:$4 sm:$0xff]   ;;  %v7751_v59 = vld [vmem:[%s10628_s1 + $0x5bc] ss:$36 sps:$4 sm:$0xff]  }
  0x77   :  { %1548 = vmatpush1.bf16.msra.mxu0 %v7656_v60  ;;  %1630 = vmatpush1.bf16.msra.mxu1 %v7659_v61  ;;  %v7746_v60 = vld [vmem:[%s10628_s1 + $0x5b0] ss:$36 sps:$4 sm:$0xff]   ;;  %v7749_v61 = vld [vmem:[%s10628_s1 + $0x5b8] ss:$36 sps:$4 sm:$0xff]  }
  0x78   :  { %1549 = vmatprep.subr.bf16.mxu0 %v7664_v62  ;;  %1631 = vmatprep.subr.bf16.mxu1 %v7667_v63  ;;  %v7754_v62 = vld [vmem:[%s10628_s1 + $0x5fc] ss:$36 sps:$4 sm:$0xff]   ;;  %v7757_v63 = vld [vmem:[%s10628_s1 + $0x604] ss:$36 sps:$4 sm:$0xff]  }
  0x7b   :  { %1550 = vmatpush1.bf16.msra.mxu0 %v7662_v0  ;;  %1632 = vmatpush1.bf16.msra.mxu1 %v7665_v1  ;;  %v7752_v0 = vld [vmem:[%s10628_s1 + $0x5f8] ss:$36 sps:$4 sm:$0xff]   ;;  %v7755_v1 = vld [vmem:[%s10628_s1 + $0x600] ss:$36 sps:$4 sm:$0xff]  }
  0x7c   :  { %1551 = vmatprep.subr.bf16.mxu0 %v7670_v2  ;;  %1633 = vmatprep.subr.bf16.mxu1 %v7673_v3  ;;  %v7760_v2 = vld [vmem:[%s10628_s1 + $0x644] ss:$36 sps:$4 sm:$0xff]   ;;  %v7763_v3 = vld [vmem:[%s10628_s1 + $0x64c] ss:$36 sps:$4 sm:$0xff]  }
  0x7f   :  { %1552 = vmatpush1.bf16.msra.mxu0 %v7668_v4  ;;  %1634 = vmatpush1.bf16.msra.mxu1 %v7671_v6  ;;  %v7758_v4 = vld [vmem:[%s10628_s1 + $0x640] ss:$36 sps:$4 sm:$0xff]   ;;  %v7761_v6 = vld [vmem:[%s10628_s1 + $0x648] ss:$36 sps:$4 sm:$0xff]  }
  0x80   :  { %1553 = vmatprep.subr.bf16.mxu0 %v7676_v7  ;;  %1635 = vmatprep.subr.bf16.mxu1 %v7679_v8  ;;  %v7766_v7 = vld [vmem:[%s10628_s1 + $0x68c] ss:$36 sps:$4 sm:$0xff]   ;;  %v7769_v8 = vld [vmem:[%s10628_s1 + $0x694] ss:$36 sps:$4 sm:$0xff]  }
  0x83   :  { %1554 = vmatpush1.bf16.msra.mxu0 %v7674_v9  ;;  %1636 = vmatpush1.bf16.msra.mxu1 %v7677_v10  ;;  %v7764_v9 = vld [vmem:[%s10628_s1 + $0x688] ss:$36 sps:$4 sm:$0xff]   ;;  %v7767_v10 = vld [vmem:[%s10628_s1 + $0x690] ss:$36 sps:$4 sm:$0xff]  }
  0x84   :  { %1555 = vmatprep.subr.bf16.mxu0 %v7682_v11  ;;  %1637 = vmatprep.subr.bf16.mxu1 %v7685_v12  ;;  %v7770_v11 = vld [vmem:[%s10628_s1 + $0x260] ss:$36 sps:$4 sm:$0xff]  }
  0x85   :  { %v7771_v12 = vld [vmem:[%s10628_s1 + $0x20] ss:$36 sps:$4 sm:$0xff]  }
  0x87   :  { %1556 = vmatpush1.bf16.msra.mxu0 %v7680_v14  ;;  %1638 = vmatpush1.bf16.msra.mxu1 %v7683_v15  ;;  %v7772_v14 = vld [vmem:[%s10628_s1 + $0x4a0] ss:$36 sps:$4 sm:$0xff]   ;;  %v8326_v15 = vmov 0.0  }
  0x88   :  { %1557 = vmatprep.subr.bf16.mxu0 %v7688_v16  ;;  %1639 = vmatprep.subr.bf16.mxu1 %v7691_v17  ;;  %v7773_v16 = vld [vmem:[%s10628_s1 + $0x2a8] ss:$36 sps:$4 sm:$0xff]  }
  0x89   :  { %v7774_v17 = vld [vmem:[%s10628_s1 + $0x68] ss:$36 sps:$4 sm:$0xff]  }
  0x8b   :  { %1558 = vmatpush1.bf16.msra.mxu0 %v7686_v18  ;;  %1640 = vmatpush1.bf16.msra.mxu1 %v7689_v19  ;;  %v7775_v18 = vld [vmem:[%s10628_s1 + $0x4e8] ss:$36 sps:$4 sm:$0xff]   ;;  %v7776_v19 = vld [vmem:[%s10628_s1 + $0x2f0] ss:$36 sps:$4 sm:$0xff]  }
  0x8c   :  { %1559 = vmatprep.subr.bf16.mxu0 %v7694_v20  ;;  %1641 = vmatprep.subr.bf16.mxu1 %v7697_v21  ;;  %v7777_v20 = vld [vmem:[%s10628_s1 + $0xb0] ss:$36 sps:$4 sm:$0xff]  }
  0x8d   :  { %v7778_v21 = vld [vmem:[%s10628_s1 + $0x530] ss:$36 sps:$4 sm:$0xff]  }
  0x8f   :  { %1560 = vmatpush1.bf16.msra.mxu0 %v7692_v22  ;;  %1642 = vmatpush1.bf16.msra.mxu1 %v7695_v23  ;;  %v7780_v22 = vld [vmem:[%s10628_s1 + $0xf8] ss:$36 sps:$4 sm:$0xff]  }
  0x90   :  { %1561 = vmatprep.subr.bf16.mxu0 %v7700_v24  ;;  %1643 = vmatprep.subr.bf16.mxu1 %v7703_v25  ;;  %v7781_v23 = vld [vmem:[%s10628_s1 + $0x578] ss:$36 sps:$4 sm:$0xff]   ;;  %v7782_v24 = vld [vmem:[%s10628_s1 + $0x380] ss:$36 sps:$4 sm:$0xff]  }
  0x91   :  { %v7783_v25 = vld [vmem:[%s10628_s1 + $0x140] ss:$36 sps:$4 sm:$0xff]  }
  0x93   :  { %1562 = vmatpush1.bf16.msra.mxu0 %v7698_v26  ;;  %1644 = vmatpush1.bf16.msra.mxu1 %v7701_v27  ;;  %v7784_v26 = vld [vmem:[%s10628_s1 + $0x5c0] ss:$36 sps:$4 sm:$0xff]   ;;  %v7785_v27 = vld [vmem:[%s10628_s1 + $0x3c8] ss:$36 sps:$4 sm:$0xff]  }
  0x94   :  { %1563 = vmatprep.subr.bf16.mxu0 %v7706_v28  ;;  %1645 = vmatprep.subr.bf16.mxu1 %v7709_v29  ;;  %v7786_v28 = vld [vmem:[%s10628_s1 + $0x188] ss:$36 sps:$4 sm:$0xff]  }
  0x95   :  { %v7787_v29 = vld [vmem:[%s10628_s1 + $0x608] ss:$36 sps:$4 sm:$0xff]  }
  0x97   :  { %1564 = vmatpush1.bf16.msra.mxu0 %v7704_v30  ;;  %1646 = vmatpush1.bf16.msra.mxu1 %v7707_v31  ;;  %v7788_v30 = vld [vmem:[%s10628_s1 + $0x410] ss:$36 sps:$4 sm:$0xff]  }
  0x98   :  { %1565 = vmatprep.subr.bf16.mxu0 %v7712_v32  ;;  %1647 = vmatprep.subr.bf16.mxu1 %v7715_v33  ;;  %v7789_v31 = vld [vmem:[%s10628_s1 + $0x1d0] ss:$36 sps:$4 sm:$0xff]   ;;  %v7791_v33 = vld [vmem:[%s10628_s1 + $0x458] ss:$36 sps:$4 sm:$0xff]  }
  0x99   :  { %v7790_v32 = vld [vmem:[%s10628_s1 + $0x650] ss:$36 sps:$4 sm:$0xff]  }
  0x9b   :  { %1566 = vmatpush1.bf16.msra.mxu0 %v7710_v34  ;;  %1648 = vmatpush1.bf16.msra.mxu1 %v7713_v35  ;;  %v7792_v34 = vld [vmem:[%s10628_s1 + $0x218] ss:$36 sps:$4 sm:$0xff]  }
  0x9c   :  { %1567 = vmatprep.subr.bf16.mxu0 %v7718_v36  ;;  %1649 = vmatprep.subr.bf16.mxu1 %v7721_v37  ;;  %v7793_v35 = vld [vmem:[%s10628_s1 + $0x698] ss:$36 sps:$4 sm:$0xff]   ;;  %v7796_v36 = vld [vmem:[%s10628_s1 + $0x4] ss:$36 sps:$4 sm:$0xff]   ;;  %v7799_v37 = vld [vmem:[%s10628_s1 + $0xc] ss:$36 sps:$4 sm:$0xff]  }
  0x9f   :  { %1568 = vmatpush1.bf16.msra.mxu0 %v7716_v39  ;;  %1650 = vmatpush1.bf16.msra.mxu1 %v7719_v40  ;;  %v9049_v39 = vld [vmem:[%s10627_s0 + $0xc] sm:$0xff]  ;;  %v7794_v40 = vld [vmem:[%s10628_s1] ss:$36 sps:$4 sm:$0xff]  }
  0xa0   :  { %1578 = vmatprep.subr.bf16.mxu0 %v7724_v41  ;;  %1660 = vmatprep.subr.bf16.mxu1 %v7727_v42  ;;  %v7797_v41 = vld [vmem:[%s10628_s1 + $0x8] ss:$36 sps:$4 sm:$0xff]  }
  0xa1   :  { %v7802_v42 = vld [vmem:[%s10628_s1 + $0x4c] ss:$36 sps:$4 sm:$0xff]  }
  0xa2   :  { %1570 = vmatmul.mubr.bf16.vlgmr.msra.gmra.mrb[4].mxu0 %v8561_v5  ;;  %1652 = vmatmul.mubr.bf16.vlgmr.msra.gmra.mrb[4].mxu1 %v8561_v5 }
  0xa3   :  { %1579 = vmatpush1.bf16.msra.mxu0 %v7722_v43  ;;  %1661 = vmatpush1.bf16.msra.mxu1 %v7725_v44  ;;  %v7805_v43 = vld [vmem:[%s10628_s1 + $0x54] ss:$36 sps:$4 sm:$0xff]   ;;  %v9065_v44 = vcombine.high %v9049_v39, %v9049_v39 }
  0xa4   :  { %1580 = vmatprep.subr.bf16.mxu0 %v7730_v45  ;;  %1662 = vmatprep.subr.bf16.mxu1 %v7733_v46  ;;  %v7800_v45 = vld [vmem:[%s10628_s1 + $0x48] ss:$36 sps:$4 sm:$0xff]   ;;  %v7803_v46 = vld [vmem:[%s10628_s1 + $0x50] ss:$36 sps:$4 sm:$0xff]  }
  0xa5   :  { %1610 = vmatprep.mubr.bf16.mxu0 %v8325_v13  ;;  %1692 = vmatprep.mubr.bf16.mxu1 %v8325_v13 }
  0xa7   :  { %1581 = vmatpush1.bf16.msra.mxu0 %v7728_v47  ;;  %1663 = vmatpush1.bf16.msra.mxu1 %v7731_v49  ;;  %v7808_v47 = vld [vmem:[%s10628_s1 + $0x94] ss:$36 sps:$4 sm:$0xff]  }
  0xa8   :  { %1582 = vmatprep.subr.bf16.mxu0 %v7736_v50  ;;  %1664 = vmatprep.subr.bf16.mxu1 %v7739_v51  ;;  %v7809_v49 = vld [vmem:[%s10628_s1 + $0x98] ss:$36 sps:$4 sm:$0xff]   ;;  %v7817_v51 = vld [vmem:[%s10628_s1 + $0xe4] ss:$36 sps:$4 sm:$0xff]  }
  0xa9   :  { %v7814_v50 = vld [vmem:[%s10628_s1 + $0xdc] ss:$36 sps:$4 sm:$0xff]  }
  0xab   :  { %1583 = vmatpush1.bf16.msra.mxu0 %v7734_v52  ;;  %1665 = vmatpush1.bf16.msra.mxu1 %v7737_v53  ;;  %v7812_v52 = vld [vmem:[%s10628_s1 + $0xd8] ss:$36 sps:$4 sm:$0xff]   ;;  %v7815_v53 = vld [vmem:[%s10628_s1 + $0xe0] ss:$36 sps:$4 sm:$0xff]  }
  0xac   :  { %1584 = vmatprep.subr.bf16.mxu0 %v7742_v54  ;;  %1666 = vmatprep.subr.bf16.mxu1 %v7745_v55  ;;  %v7820_v54 = vld [vmem:[%s10628_s1 + $0x124] ss:$36 sps:$4 sm:$0xff]   ;;  %v7823_v55 = vld [vmem:[%s10628_s1 + $0x12c] ss:$36 sps:$4 sm:$0xff]  }
  0xaf   :  { %1585 = vmatpush1.bf16.msra.mxu0 %v7740_v56  ;;  %1667 = vmatpush1.bf16.msra.mxu1 %v7743_v57  ;;  %v7818_v56 = vld [vmem:[%s10628_s1 + $0x120] ss:$36 sps:$4 sm:$0xff]   ;;  %v7821_v57 = vld [vmem:[%s10628_s1 + $0x128] ss:$36 sps:$4 sm:$0xff]  }
  0xb0   :  { %1586 = vmatprep.subr.bf16.mxu0 %v7748_v58  ;;  %1668 = vmatprep.subr.bf16.mxu1 %v7751_v59  ;;  %v7826_v58 = vld [vmem:[%s10628_s1 + $0x16c] ss:$36 sps:$4 sm:$0xff]   ;;  %v7829_v59 = vld [vmem:[%s10628_s1 + $0x174] ss:$36 sps:$4 sm:$0xff]  }
  0xb3   :  { %1587 = vmatpush1.bf16.msra.mxu0 %v7746_v60  ;;  %1669 = vmatpush1.bf16.msra.mxu1 %v7749_v61  ;;  %v7824_v60 = vld [vmem:[%s10628_s1 + $0x168] ss:$36 sps:$4 sm:$0xff]   ;;  %v7827_v61 = vld [vmem:[%s10628_s1 + $0x170] ss:$36 sps:$4 sm:$0xff]  }
  0xb4   :  { %1588 = vmatprep.subr.bf16.mxu0 %v7754_v62  ;;  %1670 = vmatprep.subr.bf16.mxu1 %v7757_v63  ;;  %v7832_v62 = vld [vmem:[%s10628_s1 + $0x1b4] ss:$36 sps:$4 sm:$0xff]   ;;  %v7835_v63 = vld [vmem:[%s10628_s1 + $0x1bc] ss:$36 sps:$4 sm:$0xff]  }
  0xb7   :  { %1589 = vmatpush1.bf16.msra.mxu0 %v7752_v0  ;;  %1671 = vmatpush1.bf16.msra.mxu1 %v7755_v1  ;;  %v7830_v0 = vld [vmem:[%s10628_s1 + $0x1b0] ss:$36 sps:$4 sm:$0xff]   ;;  %v7833_v1 = vld [vmem:[%s10628_s1 + $0x1b8] ss:$36 sps:$4 sm:$0xff]  }
  0xb8   :  { %1590 = vmatprep.subr.bf16.mxu0 %v7760_v2  ;;  %1672 = vmatprep.subr.bf16.mxu1 %v7763_v3  ;;  %v7838_v2 = vld [vmem:[%s10628_s1 + $0x1fc] ss:$36 sps:$4 sm:$0xff]   ;;  %v7841_v3 = vld [vmem:[%s10628_s1 + $0x204] ss:$36 sps:$4 sm:$0xff]  }
  0xbb   :  { %1591 = vmatpush1.bf16.msra.mxu0 %v7758_v4  ;;  %1673 = vmatpush1.bf16.msra.mxu1 %v7761_v6  ;;  %v7836_v4 = vld [vmem:[%s10628_s1 + $0x1f8] ss:$36 sps:$4 sm:$0xff]   ;;  %v7839_v6 = vld [vmem:[%s10628_s1 + $0x200] ss:$36 sps:$4 sm:$0xff]  }
  0xbc   :  { %1592 = vmatprep.subr.bf16.mxu0 %v7766_v7  ;;  %1674 = vmatprep.subr.bf16.mxu1 %v7769_v8  ;;  %v7844_v7 = vld [vmem:[%s10628_s1 + $0x244] ss:$36 sps:$4 sm:$0xff]   ;;  %v7847_v8 = vld [vmem:[%s10628_s1 + $0x24c] ss:$36 sps:$4 sm:$0xff]  }
  0xbf   :  { %1593 = vmatpush1.bf16.msra.mxu0 %v7764_v9  ;;  %1675 = vmatpush1.bf16.msra.mxu1 %v7767_v10  ;;  %v7842_v9 = vld [vmem:[%s10628_s1 + $0x240] ss:$36 sps:$4 sm:$0xff]   ;;  %v7845_v10 = vld [vmem:[%s10628_s1 + $0x248] ss:$36 sps:$4 sm:$0xff]  }
  0xc0   :  { %7025 = vmatprep.subr.bf16.mxu0 %v7770_v11  ;;  %7197 = vmatprep.subr.bf16.mxu1 %v8326_v15  ;;  %v7850_v11 = vld [vmem:[%s10628_s1 + $0x28c] ss:$36 sps:$4 sm:$0xff]  }
  0xc2   :  { %1611 = vmatmul.mubr.bf16.vlgmr.msra.gmra.mrb[4].mxu0 %v8663_v38  ;;  %1693 = vmatmul.mubr.bf16.vlgmr.msra.gmra.mrb[4].mxu1 %v8663_v38 }
  0xc3   :  { %7026 = vmatpush3.bf16.msra.mxu0 %v7771_v12  ;;  %7198 = vmatpush3.bf16.msra.mxu1 %v7772_v14  ;;  %v7853_v12 = vld [vmem:[%s10628_s1 + $0x294] ss:$36 sps:$4 sm:$0xff]   ;;  %v7848_v14 = vld [vmem:[%s10628_s1 + $0x288] ss:$36 sps:$4 sm:$0xff]  }
  0xc4   :  { %7027 = vmatprep.subr.bf16.mxu0 %v7773_v16  ;;  %7199 = vmatprep.subr.bf16.mxu1 %v8326_v15  ;;  %v7851_v16 = vld [vmem:[%s10628_s1 + $0x290] ss:$36 sps:$4 sm:$0xff]  }
  0xc5   :  { %1733 = vmatprep.mubr.bf16.mxu0 %v8497_v48  ;;  %7213 = vmatprep.mubr.msk.bf16.mxu1 %vm8327_vm0, %v8326_v15  ;;  %v7779_v48 = vld [vmem:[%s10628_s1 + $0x338] ss:$36 sps:$4 sm:$0xff]  }
  0xc7   :  { %7028 = vmatpush3.bf16.msra.mxu0 %v7774_v17  ;;  %7200 = vmatpush3.bf16.msra.mxu1 %v7775_v18  ;;  %v7856_v17 = vld [vmem:[%s10628_s1 + $0x2d4] ss:$36 sps:$4 sm:$0xff]   ;;  %v7859_v18 = vld [vmem:[%s10628_s1 + $0x2dc] ss:$36 sps:$4 sm:$0xff]  }
  0xc8   :  { %7029 = vmatprep.subr.bf16.mxu0 %v7776_v19  ;;  %7201 = vmatprep.subr.bf16.mxu1 %v8326_v15  ;;  %v7854_v19 = vld [vmem:[%s10628_s1 + $0x2d0] ss:$36 sps:$4 sm:$0xff]  }
  0xcb   :  { %7030 = vmatpush3.bf16.msra.mxu0 %v7777_v20  ;;  %7202 = vmatpush3.bf16.msra.mxu1 %v7778_v21  ;;  %v7857_v20 = vld [vmem:[%s10628_s1 + $0x2d8] ss:$36 sps:$4 sm:$0xff]  }
  0xcc   :  { %7031 = vmatprep.subr.bf16.mxu0 %v7779_v48  ;;  %7203 = vmatprep.subr.bf16.mxu1 %v8326_v15  ;;  %v7862_v21 = vld [vmem:[%s10628_s1 + $0x31c] ss:$36 sps:$4 sm:$0xff]   ;;  %v7865_v48 = vld [vmem:[%s10628_s1 + $0x324] ss:$36 sps:$4 sm:$0xff]  }
  0xcf   :  { %7032 = vmatpush3.bf16.msra.mxu0 %v7780_v22  ;;  %7204 = vmatpush3.bf16.msra.mxu1 %v7781_v23  ;;  %v7860_v22 = vld [vmem:[%s10628_s1 + $0x318] ss:$36 sps:$4 sm:$0xff]   ;;  %v7863_v23 = vld [vmem:[%s10628_s1 + $0x320] ss:$36 sps:$4 sm:$0xff]  }
  0xd0   :  { %7033 = vmatprep.subr.bf16.mxu0 %v7782_v24  ;;  %7205 = vmatprep.subr.bf16.mxu1 %v8326_v15  ;;  %v7868_v24 = vld [vmem:[%s10628_s1 + $0x364] ss:$36 sps:$4 sm:$0xff]  }
  0xd3   :  { %7034 = vmatpush3.bf16.msra.mxu0 %v7783_v25  ;;  %7206 = vmatpush3.bf16.msra.mxu1 %v7784_v26  ;;  %v7871_v25 = vld [vmem:[%s10628_s1 + $0x36c] ss:$36 sps:$4 sm:$0xff]   ;;  %v7866_v26 = vld [vmem:[%s10628_s1 + $0x360] ss:$36 sps:$4 sm:$0xff]  }
  0xd4   :  { %7035 = vmatprep.subr.bf16.mxu0 %v7785_v27  ;;  %7207 = vmatprep.subr.bf16.mxu1 %v8326_v15  ;;  %v7869_v27 = vld [vmem:[%s10628_s1 + $0x368] ss:$36 sps:$4 sm:$0xff]  }
  0xd7   :  { %7036 = vmatpush3.bf16.msra.mxu0 %v7786_v28  ;;  %7208 = vmatpush3.bf16.msra.mxu1 %v7787_v29  ;;  %v7874_v28 = vld [vmem:[%s10628_s1 + $0x3ac] ss:$36 sps:$4 sm:$0xff]   ;;  %v7877_v29 = vld [vmem:[%s10628_s1 + $0x3b4] ss:$36 sps:$4 sm:$0xff]  }
  0xd8   :  { %7037 = vmatprep.subr.bf16.mxu0 %v7788_v30  ;;  %7209 = vmatprep.subr.bf16.mxu1 %v8326_v15  ;;  %v7872_v30 = vld [vmem:[%s10628_s1 + $0x3a8] ss:$36 sps:$4 sm:$0xff]  }
  0xdb   :  { %7038 = vmatpush3.bf16.msra.mxu0 %v7789_v31  ;;  %7210 = vmatpush3.bf16.msra.mxu1 %v7790_v32  ;;  %v7875_v31 = vld [vmem:[%s10628_s1 + $0x3b0] ss:$36 sps:$4 sm:$0xff]  }
  0xdc   :  { %7039 = vmatprep.subr.bf16.mxu0 %v7791_v33  ;;  %7211 = vmatprep.subr.bf16.mxu1 %v8326_v15  ;;  %v7880_v32 = vld [vmem:[%s10628_s1 + $0x3f4] ss:$36 sps:$4 sm:$0xff]   ;;  %v7883_v33 = vld [vmem:[%s10628_s1 + $0x3fc] ss:$36 sps:$4 sm:$0xff]  }
  0xdf   :  { %7040 = vmatpush3.bf16.msra.mxu0 %v7792_v34  ;;  %7212 = vmatpush3.bf16.msra.mxu1 %v7793_v35  ;;  %v7878_v34 = vld [vmem:[%s10628_s1 + $0x3f0] ss:$36 sps:$4 sm:$0xff]   ;;  %v7881_v35 = vld [vmem:[%s10628_s1 + $0x3f8] ss:$36 sps:$4 sm:$0xff]  }
  0xe0   :  { %3181 = vmatprep.subr.bf16.mxu0 %v7796_v36  ;;  %3263 = vmatprep.subr.bf16.mxu1 %v7799_v37  ;;  %v7886_v36 = vld [vmem:[%s10628_s1 + $0x43c] ss:$36 sps:$4 sm:$0xff]   ;;  %v7889_v37 = vld [vmem:[%s10628_s1 + $0x444] ss:$36 sps:$4 sm:$0xff]  }
  0xe2   :  { %1734 = vmatmul.mubr.bf16.vlgmr.msra.gmra.mrb[8].mxu0 %v8561_v5  ;;  %7214 = vmatmul.mubr.bf16.vlgmr.msra.gmra.mrb[8].mxu1 %v8663_v38  ;;  %v7811_v5 = vld [vmem:[%s10628_s1 + $0x9c] ss:$36 sps:$4 sm:$0xff]   ;;  %v7806_v38 = vld [vmem:[%s10628_s1 + $0x90] ss:$36 sps:$4 sm:$0xff]  }
  0xe3   :  { %3182 = vmatpush1.bf16.msra.mxu0 %v7794_v40  ;;  %3264 = vmatpush1.bf16.msra.mxu1 %v7797_v41  ;;  %v7884_v40 = vld [vmem:[%s10628_s1 + $0x438] ss:$36 sps:$4 sm:$0xff]   ;;  %v7887_v41 = vld [vmem:[%s10628_s1 + $0x440] ss:$36 sps:$4 sm:$0xff]  }
  0xe4   :  { %3183 = vmatprep.subr.bf16.mxu0 %v7802_v42  ;;  %3265 = vmatprep.subr.bf16.mxu1 %v7805_v43  ;;  %v7893_v42 = vld [vmem:[%s10628_s1 + $0x484] ss:$36 sps:$4 sm:$0xff]   ;;  %v7896_v43 = vld [vmem:[%s10628_s1 + $0x48c] ss:$36 sps:$4 sm:$0xff]  }
  0xe5   :  { %3213 = vmatprep.mubr.bf16.mxu0 %v9065_v44  ;;  %3295 = vmatprep.mubr.bf16.mxu1 %v9065_v44 }
  0xe7   :  { %3184 = vmatpush1.bf16.msra.mxu0 %v7800_v45  ;;  %3266 = vmatpush1.bf16.msra.mxu1 %v7803_v46  ;;  %v7891_v45 = vld [vmem:[%s10628_s1 + $0x480] ss:$36 sps:$4 sm:$0xff]   ;;  %v9256_v46 = vcombine.low %v9049_v39, %v9049_v39  ;;  %v7898_v39 = vld [vmem:[%s10628_s1 + $0x4c8] ss:$36 sps:$4 sm:$0xff]  }
  0xe8   :  { %3185 = vmatprep.subr.bf16.mxu0 %v7808_v47  ;;  %3267 = vmatprep.subr.bf16.mxu1 %v7811_v5  ;;  %v7894_v47 = vld [vmem:[%s10628_s1 + $0x488] ss:$36 sps:$4 sm:$0xff]  }
  0xe9   :  { %v7900_v5 = vld [vmem:[%s10628_s1 + $0x4cc] ss:$36 sps:$4 sm:$0xff]  }
  0xeb   :  { %3186 = vmatpush1.bf16.msra.mxu0 %v7806_v38  ;;  %3268 = vmatpush1.bf16.msra.mxu1 %v7809_v49  ;;  %v7903_v38 = vld [vmem:[%s10628_s1 + $0x4d4] ss:$36 sps:$4 sm:$0xff]  }
  0xec   :  { %3187 = vmatprep.subr.bf16.mxu0 %v7814_v50  ;;  %3269 = vmatprep.subr.bf16.mxu1 %v7817_v51  ;;  %v7901_v49 = vld [vmem:[%s10628_s1 + $0x4d0] ss:$36 sps:$4 sm:$0xff]   ;;  %v7909_v51 = vld [vmem:[%s10628_s1 + $0x51c] ss:$36 sps:$4 sm:$0xff]  }
  0xed   :  { %v7906_v50 = vld [vmem:[%s10628_s1 + $0x514] ss:$36 sps:$4 sm:$0xff]  }
  0xef   :  { %3188 = vmatpush1.bf16.msra.mxu0 %v7812_v52  ;;  %3270 = vmatpush1.bf16.msra.mxu1 %v7815_v53  ;;  %v7904_v52 = vld [vmem:[%s10628_s1 + $0x510] ss:$36 sps:$4 sm:$0xff]   ;;  %v7907_v53 = vld [vmem:[%s10628_s1 + $0x518] ss:$36 sps:$4 sm:$0xff]  }
  0xf0   :  { %3189 = vmatprep.subr.bf16.mxu0 %v7820_v54  ;;  %3271 = vmatprep.subr.bf16.mxu1 %v7823_v55  ;;  %v7912_v54 = vld [vmem:[%s10628_s1 + $0x55c] ss:$36 sps:$4 sm:$0xff]   ;;  %v7915_v55 = vld [vmem:[%s10628_s1 + $0x564] ss:$36 sps:$4 sm:$0xff]  }
  0xf3   :  { %3190 = vmatpush1.bf16.msra.mxu0 %v7818_v56  ;;  %3272 = vmatpush1.bf16.msra.mxu1 %v7821_v57  ;;  %v7910_v56 = vld [vmem:[%s10628_s1 + $0x558] ss:$36 sps:$4 sm:$0xff]   ;;  %v7913_v57 = vld [vmem:[%s10628_s1 + $0x560] ss:$36 sps:$4 sm:$0xff]  }
  0xf4   :  { %3191 = vmatprep.subr.bf16.mxu0 %v7826_v58  ;;  %3273 = vmatprep.subr.bf16.mxu1 %v7829_v59  ;;  %v7918_v58 = vld [vmem:[%s10628_s1 + $0x5a4] ss:$36 sps:$4 sm:$0xff]   ;;  %v7921_v59 = vld [vmem:[%s10628_s1 + $0x5ac] ss:$36 sps:$4 sm:$0xff]  }
  0xf7   :  { %3192 = vmatpush1.bf16.msra.mxu0 %v7824_v60  ;;  %3274 = vmatpush1.bf16.msra.mxu1 %v7827_v61  ;;  %v7916_v60 = vld [vmem:[%s10628_s1 + $0x5a0] ss:$36 sps:$4 sm:$0xff]   ;;  %v7919_v61 = vld [vmem:[%s10628_s1 + $0x5a8] ss:$36 sps:$4 sm:$0xff]  }
  0xf8   :  { %3193 = vmatprep.subr.bf16.mxu0 %v7832_v62  ;;  %3275 = vmatprep.subr.bf16.mxu1 %v7835_v63  ;;  %v7924_v62 = vld [vmem:[%s10628_s1 + $0x5ec] ss:$36 sps:$4 sm:$0xff]   ;;  %v7927_v63 = vld [vmem:[%s10628_s1 + $0x5f4] ss:$36 sps:$4 sm:$0xff]  }
  0xfb   :  { %3194 = vmatpush1.bf16.msra.mxu0 %v7830_v0  ;;  %3276 = vmatpush1.bf16.msra.mxu1 %v7833_v1  ;;  %v7922_v0 = vld [vmem:[%s10628_s1 + $0x5e8] ss:$36 sps:$4 sm:$0xff]   ;;  %v7925_v1 = vld [vmem:[%s10628_s1 + $0x5f0] ss:$36 sps:$4 sm:$0xff]  }
  0xfc   :  { %3195 = vmatprep.subr.bf16.mxu0 %v7838_v2  ;;  %3277 = vmatprep.subr.bf16.mxu1 %v7841_v3  ;;  %v7930_v2 = vld [vmem:[%s10628_s1 + $0x634] ss:$36 sps:$4 sm:$0xff]   ;;  %v7933_v3 = vld [vmem:[%s10628_s1 + $0x63c] ss:$36 sps:$4 sm:$0xff]  }
  0xff   :  { %3196 = vmatpush1.bf16.msra.mxu0 %v7836_v4  ;;  %3278 = vmatpush1.bf16.msra.mxu1 %v7839_v6 }
 0x100   :  { %3197 = vmatprep.subr.bf16.mxu0 %v7844_v7  ;;  %3279 = vmatprep.subr.bf16.mxu1 %v7847_v8  ;;  %v7928_v7 = vld [vmem:[%s10628_s1 + $0x630] ss:$36 sps:$4 sm:$0xff]   ;;  %v7931_v8 = vld [vmem:[%s10628_s1 + $0x638] ss:$36 sps:$4 sm:$0xff]  }
 0x103   :  { %3198 = vmatpush1.bf16.msra.mxu0 %v7842_v9  ;;  %3280 = vmatpush1.bf16.msra.mxu1 %v7845_v10 }
 0x104   :  { %3199 = vmatprep.subr.bf16.mxu0 %v7850_v11  ;;  %3281 = vmatprep.subr.bf16.mxu1 %v7853_v12  ;;  %v7936_v11 = vld [vmem:[%s10628_s1 + $0x67c] ss:$36 sps:$4 sm:$0xff]   ;;  %v7939_v12 = vld [vmem:[%s10628_s1 + $0x684] ss:$36 sps:$4 sm:$0xff]  }
 0x107   :  { %3200 = vmatpush1.bf16.msra.mxu0 %v7848_v14  ;;  %3282 = vmatpush1.bf16.msra.mxu1 %v7851_v16 }
 0x108   :  { %3201 = vmatprep.subr.bf16.mxu0 %v7856_v17  ;;  %3283 = vmatprep.subr.bf16.mxu1 %v7859_v18 }
 0x10b   :  { %3202 = vmatpush1.bf16.msra.mxu0 %v7854_v19  ;;  %3284 = vmatpush1.bf16.msra.mxu1 %v7857_v20 }
 0x10c   :  { %3203 = vmatprep.subr.bf16.mxu0 %v7862_v21  ;;  %3285 = vmatprep.subr.bf16.mxu1 %v7865_v48  ;;  %v7934_v21 = vld [vmem:[%s10628_s1 + $0x678] ss:$36 sps:$4 sm:$0xff]   ;;  %v7937_v48 = vld [vmem:[%s10628_s1 + $0x680] ss:$36 sps:$4 sm:$0xff]  }
 0x10f   :  { %3204 = vmatpush1.bf16.msra.mxu0 %v7860_v22  ;;  %3286 = vmatpush1.bf16.msra.mxu1 %v7863_v23  ;;  %v7943_v22 = vld [vmem:[%s10628_s1 + $0x14] ss:$36 sps:$4 sm:$0xff]   ;;  %v7957_v23 = vld [vmem:[%s10628_s1 + $0x1c] ss:$36 sps:$4 sm:$0xff]  }
 0x110   :  { %3205 = vmatprep.subr.bf16.mxu0 %v7868_v24  ;;  %3287 = vmatprep.subr.bf16.mxu1 %v7871_v25  ;;  %v9358_v24 = vld [vmem:[%s10627_s0 + $0x14] ss:$0 sps:$4 sm:$0xff]  }
 0x111   :  { %v7941_v25 = vld [vmem:[%s10628_s1 + $0x10] ss:$36 sps:$4 sm:$0xff]  }
 0x113   :  { %3206 = vmatpush1.bf16.msra.mxu0 %v7866_v26  ;;  %3288 = vmatpush1.bf16.msra.mxu1 %v7869_v27  ;;  %v7947_v26 = vld [vmem:[%s10628_s1 + $0x5c] ss:$36 sps:$4 sm:$0xff]  }
 0x114   :  { %3207 = vmatprep.subr.bf16.mxu0 %v7874_v28  ;;  %3289 = vmatprep.subr.bf16.mxu1 %v7877_v29  ;;  %v7955_v28 = vld [vmem:[%s10628_s1 + $0x18] ss:$36 sps:$4 sm:$0xff]   ;;  %v7963_v29 = vld [vmem:[%s10628_s1 + $0x64] ss:$36 sps:$4 sm:$0xff]  }
 0x117   :  { %3208 = vmatpush1.bf16.msra.mxu0 %v7872_v30  ;;  %3290 = vmatpush1.bf16.msra.mxu1 %v7875_v31  ;;  %v7945_v31 = vld [vmem:[%s10628_s1 + $0x58] ss:$36 sps:$4 sm:$0xff]  }
 0x118   :  { %3209 = vmatprep.subr.bf16.mxu0 %v7880_v32  ;;  %3291 = vmatprep.subr.bf16.mxu1 %v7883_v33  ;;  %v7951_v33 = vld [vmem:[%s10628_s1 + $0xa4] ss:$36 sps:$4 sm:$0xff]  }
 0x11b   :  { %3210 = vmatpush1.bf16.msra.mxu0 %v7878_v34  ;;  %3292 = vmatpush1.bf16.msra.mxu1 %v7881_v35  ;;  %v7961_v34 = vld [vmem:[%s10628_s1 + $0x60] ss:$36 sps:$4 sm:$0xff]   ;;  %v7969_v35 = vld [vmem:[%s10628_s1 + $0xac] ss:$36 sps:$4 sm:$0xff]  }
 0x11c   :  { %3211 = vmatprep.subr.bf16.mxu0 %v7886_v36  ;;  %3293 = vmatprep.subr.bf16.mxu1 %v7889_v37  ;;  %v7949_v37 = vld [vmem:[%s10628_s1 + $0xa0] ss:$36 sps:$4 sm:$0xff]  }
 0x11f   :  { %3212 = vmatpush1.bf16.msra.mxu0 %v7884_v40  ;;  %3294 = vmatpush1.bf16.msra.mxu1 %v7887_v41  ;;  %v7954_v40 = vld [vmem:[%s10628_s1 + $0xec] ss:$36 sps:$4 sm:$0xff]  }
 0x120   :  { %3222 = vmatprep.subr.bf16.mxu0 %v7893_v42  ;;  %3304 = vmatprep.subr.bf16.mxu1 %v7896_v43  ;;  %v7967_v41 = vld [vmem:[%s10628_s1 + $0xa8] ss:$36 sps:$4 sm:$0xff]   ;;  %v7975_v42 = vld [vmem:[%s10628_s1 + $0xf4] ss:$36 sps:$4 sm:$0xff]  }
 0x121   :  { %v7952_v43 = vld [vmem:[%s10628_s1 + $0xe8] ss:$36 sps:$4 sm:$0xff]  }
 0x122   :  { %3214 = vmatmul.mubr.bf16.vlgmr.msra.gmra.mrb[12].mxu0 %v9256_v46  ;;  %3296 = vmatmul.mubr.bf16.vlgmr.msra.gmra.mrb[12].mxu1 %v9256_v46 }
 0x123   :  { %3223 = vmatpush1.bf16.msra.mxu0 %v7891_v45  ;;  %3305 = vmatpush1.bf16.msra.mxu1 %v7894_v47  ;;  %v7960_v45 = vld [vmem:[%s10628_s1 + $0x134] ss:$36 sps:$4 sm:$0xff]  }
 0x124   :  { %3224 = vmatprep.subr.bf16.mxu0 %v7900_v5  ;;  %3306 = vmatprep.subr.bf16.mxu1 %v7903_v38  ;;  %v7973_v47 = vld [vmem:[%s10628_s1 + $0xf0] ss:$36 sps:$4 sm:$0xff]   ;;  %v7981_v5 = vld [vmem:[%s10628_s1 + $0x13c] ss:$36 sps:$4 sm:$0xff]  }
 0x125   :  { %3254 = vmatprep.mubr.bf16.mxu0 %v8325_v13  ;;  %3336 = vmatprep.mubr.bf16.mxu1 %v8325_v13  ;;  %v7958_v38 = vld [vmem:[%s10628_s1 + $0x130] ss:$36 sps:$4 sm:$0xff]  }
 0x127   :  { %3225 = vmatpush1.bf16.msra.mxu0 %v7898_v39  ;;  %3307 = vmatpush1.bf16.msra.mxu1 %v7901_v49  ;;  %v7966_v39 = vld [vmem:[%s10628_s1 + $0x17c] ss:$36 sps:$4 sm:$0xff]  }
 0x128   :  { %3226 = vmatprep.subr.bf16.mxu0 %v7906_v50  ;;  %3308 = vmatprep.subr.bf16.mxu1 %v7909_v51  ;;  %v7979_v49 = vld [vmem:[%s10628_s1 + $0x138] ss:$36 sps:$4 sm:$0xff]   ;;  %v7987_v50 = vld [vmem:[%s10628_s1 + $0x184] ss:$36 sps:$4 sm:$0xff]  }
 0x129   :  { %v7964_v51 = vld [vmem:[%s10628_s1 + $0x178] ss:$36 sps:$4 sm:$0xff]  }
 0x12b   :  { %3227 = vmatpush1.bf16.msra.mxu0 %v7904_v52  ;;  %3309 = vmatpush1.bf16.msra.mxu1 %v7907_v53  ;;  %v7972_v52 = vld [vmem:[%s10628_s1 + $0x1c4] ss:$36 sps:$4 sm:$0xff]  }
 0x12c   :  { %3228 = vmatprep.subr.bf16.mxu0 %v7912_v54  ;;  %3310 = vmatprep.subr.bf16.mxu1 %v7915_v55  ;;  %v7985_v53 = vld [vmem:[%s10628_s1 + $0x180] ss:$36 sps:$4 sm:$0xff]   ;;  %v7993_v54 = vld [vmem:[%s10628_s1 + $0x1cc] ss:$36 sps:$4 sm:$0xff]  }
 0x12d   :  { %v7970_v55 = vld [vmem:[%s10628_s1 + $0x1c0] ss:$36 sps:$4 sm:$0xff]  }
 0x12f   :  { %3229 = vmatpush1.bf16.msra.mxu0 %v7910_v56  ;;  %3311 = vmatpush1.bf16.msra.mxu1 %v7913_v57  ;;  %v7978_v56 = vld [vmem:[%s10628_s1 + $0x20c] ss:$36 sps:$4 sm:$0xff]  }
 0x130   :  { %3230 = vmatprep.subr.bf16.mxu0 %v7918_v58  ;;  %3312 = vmatprep.subr.bf16.mxu1 %v7921_v59  ;;  %v7991_v57 = vld [vmem:[%s10628_s1 + $0x1c8] ss:$36 sps:$4 sm:$0xff]   ;;  %v7999_v58 = vld [vmem:[%s10628_s1 + $0x214] ss:$36 sps:$4 sm:$0xff]  }
 0x131   :  { %v7976_v59 = vld [vmem:[%s10628_s1 + $0x208] ss:$36 sps:$4 sm:$0xff]  }
 0x133   :  { %3231 = vmatpush1.bf16.msra.mxu0 %v7916_v60  ;;  %3313 = vmatpush1.bf16.msra.mxu1 %v7919_v61  ;;  %v7984_v60 = vld [vmem:[%s10628_s1 + $0x254] ss:$36 sps:$4 sm:$0xff]  }
 0x134   :  { %3232 = vmatprep.subr.bf16.mxu0 %v7924_v62  ;;  %3314 = vmatprep.subr.bf16.mxu1 %v7927_v63  ;;  %v7997_v61 = vld [vmem:[%s10628_s1 + $0x210] ss:$36 sps:$4 sm:$0xff]   ;;  %v8005_v62 = vld [vmem:[%s10628_s1 + $0x25c] ss:$36 sps:$4 sm:$0xff]  }
 0x135   :  { %v1448_v4 = vpop.f32.mrb[0].mxu0  ;;  %v1530_v6 = vpop.f32.mrb[0].mxu1  ;;  %v7982_v63 = vld [vmem:[%s10628_s1 + $0x250] ss:$36 sps:$4 sm:$0xff]  }
 0x136   :  { %v1450_v9 = vpop.f32.mrb[1].mxu0  ;;  %v1532_v10 = vpop.f32.mrb[1].mxu1 }
 0x137   :  { %v7015_v14 = vpack.c.bf16 %v1450_v9, %v1448_v4  ;;  %v7016_v16 = vpack.c.bf16 %v1532_v10, %v1530_v6  ;;  %v1452_v17 = vpop.f32.mrb[2].mxu0  ;;  %3233 = vmatpush1.bf16.msra.mxu0 %v7922_v0  ;;  %3315 = vmatpush1.bf16.msra.mxu1 %v7925_v1  ;;  %v1534_v18 = vpop.f32.mrb[2].mxu1  ;;  %v7990_v0 = vld [vmem:[%s10628_s1 + $0x29c] ss:$36 sps:$4 sm:$0xff]  }
 0x138   :  { %v1453_v19 = vpop.f32.mrb[3].mxu0  ;;  %3234 = vmatprep.subr.bf16.mxu0 %v7930_v2  ;;  %3316 = vmatprep.subr.bf16.mxu1 %v7933_v3  ;;  %v1535_v20 = vpop.f32.mrb[3].mxu1  ;;  %v8003_v1 = vld [vmem:[%s10628_s1 + $0x258] ss:$36 sps:$4 sm:$0xff]   ;;  %v8011_v2 = vld [vmem:[%s10628_s1 + $0x2a4] ss:$36 sps:$4 sm:$0xff]  }
 0x139   :  { %1818 = vst [vmem:[#allocation2] sm:$0xff] %v7015_v14  ;;  %1819 = vst [vmem:[#allocation2 + $0x8] sm:$0xff] %v7016_v16  ;;  %v7988_v3 = vld [vmem:[%s10628_s1 + $0x298] ss:$36 sps:$4 sm:$0xff]  }
 0x13b   :  { %3235 = vmatpush1.bf16.msra.mxu0 %v7928_v7  ;;  %3317 = vmatpush1.bf16.msra.mxu1 %v7931_v8 }
 0x13c   :  { %3236 = vmatprep.subr.bf16.mxu0 %v7936_v11  ;;  %3318 = vmatprep.subr.bf16.mxu1 %v7939_v12 }
 0x13f   :  { %3237 = vmatpush1.bf16.msra.mxu0 %v7934_v21  ;;  %3319 = vmatpush1.bf16.msra.mxu1 %v7937_v48 }
 0x140   :  { %3345 = vmatprep.subr.bf16.mxu0 %v7943_v22  ;;  %v9366_v27 = vld [vmem:[#allocation2 + $0xc] sm:$0xf]  ;;  %3427 = vmatprep.subr.bf16.mxu1 %v7957_v23  ;;  %v9379_v32 = vld [vmem:[#allocation2] sm:$0xf] }
 0x141   :  { %v6826_v30 = vcombine.low %v9366_v27, %v9366_v27  ;;  %v6825_v36 = vcombine.low %v9379_v32, %v9379_v32 }
 0x142   :  { %3255 = vmatmul.mubr.bf16.vlgmr.msra.gmra.mrb[12].mxu0 %v9358_v24  ;;  %3337 = vmatmul.mubr.bf16.vlgmr.msra.gmra.mrb[12].mxu1 %v9358_v24 }
 0x143   :  { %3756 = vrot.lane.b32.xlu0 %v6826_v30, %s8328_s13  ;;  %3346 = vmatpush1.bf16.msra.mxu0 %v7941_v25 }
 0x144   :  { %3347 = vmatprep.subr.bf16.mxu0 %v7947_v26  ;;  %3428 = vmatpush1.bf16.msra.mxu1 %v7955_v28 }
 0x145   :  { %3429 = vmatprep.subr.bf16.mxu1 %v7963_v29  ;;  %3377 = vmatprep.mubr.bf16.mxu0 %v9065_v44 }
 0x146   :  { %3459 = vmatprep.mubr.bf16.mxu1 %v9065_v44 }
 0x147   :  { %3348 = vmatpush1.bf16.msra.mxu0 %v7945_v31  ;;  %3751 = vrot.lane.b32.xlu0 %v6825_v36, %s8328_s13 }
 0x148   :  { %3349 = vmatprep.subr.bf16.mxu0 %v7951_v33  ;;  %3430 = vmatpush1.bf16.msra.mxu1 %v7961_v34 }
 0x149   :  { %3431 = vmatprep.subr.bf16.mxu1 %v7969_v35 }
 0x14b   :  { %3350 = vmatpush1.bf16.msra.mxu0 %v7949_v37 }
 0x14c   :  { %3351 = vmatprep.subr.bf16.mxu0 %v7954_v40  ;;  %3432 = vmatpush1.bf16.msra.mxu1 %v7967_v41 }
 0x14d   :  { %3433 = vmatprep.subr.bf16.mxu1 %v7975_v42 }
 0x14f   :  { %3352 = vmatpush1.bf16.msra.mxu0 %v7952_v43 }
 0x150   :  { %3353 = vmatprep.subr.bf16.mxu0 %v7960_v45  ;;  %3434 = vmatpush1.bf16.msra.mxu1 %v7973_v47 }
 0x151   :  { %3435 = vmatprep.subr.bf16.mxu1 %v7981_v5 }
 0x153   :  { %3354 = vmatpush1.bf16.msra.mxu0 %v7958_v38 }
 0x154   :  { %3355 = vmatprep.subr.bf16.mxu0 %v7966_v39  ;;  %3436 = vmatpush1.bf16.msra.mxu1 %v7979_v49 }
 0x155   :  { %3437 = vmatprep.subr.bf16.mxu1 %v7987_v50 }
 0x157   :  { %3356 = vmatpush1.bf16.msra.mxu0 %v7964_v51 }
 0x158   :  { %3357 = vmatprep.subr.bf16.mxu0 %v7972_v52  ;;  %3438 = vmatpush1.bf16.msra.mxu1 %v7985_v53 }
 0x159   :  { %3439 = vmatprep.subr.bf16.mxu1 %v7993_v54 }
 0x15b   :  { %3358 = vmatpush1.bf16.msra.mxu0 %v7970_v55 }
 0x15c   :  { %3359 = vmatprep.subr.bf16.mxu0 %v7978_v56  ;;  %3440 = vmatpush1.bf16.msra.mxu1 %v7991_v57 }
 0x15d   :  { %3441 = vmatprep.subr.bf16.mxu1 %v7999_v58 }
 0x15f   :  { %3360 = vmatpush1.bf16.msra.mxu0 %v7976_v59 }
 0x160   :  { %3361 = vmatprep.subr.bf16.mxu0 %v7984_v60  ;;  %3442 = vmatpush1.bf16.msra.mxu1 %v7997_v61 }
 0x161   :  { %3443 = vmatprep.subr.bf16.mxu1 %v8005_v62 }
 0x163   :  { %3362 = vmatpush1.bf16.msra.mxu0 %v7982_v63 }
 0x164   :  { %8 = vsyncpa [#allocation5], 0  ;;  %3363 = vmatprep.subr.bf16.mxu0 %v7990_v0  ;;  %v7996_v4 = vld [vmem:[%s10628_s1 + $0x2e4] ss:$36 sps:$4 sm:$0xff]   ;;  %3444 = vmatpush1.bf16.msra.mxu1 %v8003_v1  ;;  %v8017_v7 = vld [vmem:[%s10628_s1 + $0x2ec] ss:$36 sps:$4 sm:$0xff]  }
 0x165   :  { %v8009_v6 = vld [vmem:[%s10628_s1 + $0x2a0] ss:$36 sps:$4 sm:$0xff]   ;;  %3445 = vmatprep.subr.bf16.mxu1 %v8011_v2  ;;  %v8002_v9 = vld [vmem:[%s10628_s1 + $0x32c] ss:$36 sps:$4 sm:$0xff]   ;;  %v8023_v11 = vld [vmem:[%s10628_s1 + $0x334] ss:$36 sps:$4 sm:$0xff]  }
 0x166   :  { %v7994_v8 = vld [vmem:[%s10628_s1 + $0x2e0] ss:$36 sps:$4 sm:$0xff]   ;;  %v8015_v10 = vld [vmem:[%s10628_s1 + $0x2e8] ss:$36 sps:$4 sm:$0xff]   ;;  %v8008_v14 = vld [vmem:[%s10628_s1 + $0x374] ss:$36 sps:$4 sm:$0xff]  }
 0x167   :  { %3364 = vmatpush1.bf16.msra.mxu0 %v7988_v3  ;;  %v8000_v12 = vld [vmem:[%s10628_s1 + $0x328] ss:$36 sps:$4 sm:$0xff]   ;;  %v8021_v16 = vld [vmem:[%s10628_s1 + $0x330] ss:$36 sps:$4 sm:$0xff]   ;;  %v8029_v17 = vld [vmem:[%s10628_s1 + $0x37c] ss:$36 sps:$4 sm:$0xff]  }
 0x168   :  { %3365 = vmatprep.subr.bf16.mxu0 %v7996_v4  ;;  %3446 = vmatpush1.bf16.msra.mxu1 %v8009_v6  ;;  %v8006_v18 = vld [vmem:[%s10628_s1 + $0x370] ss:$36 sps:$4 sm:$0xff]   ;;  %v8014_v19 = vld [vmem:[%s10628_s1 + $0x3bc] ss:$36 sps:$4 sm:$0xff]   ;;  %v8035_v21 = vld [vmem:[%s10628_s1 + $0x3c4] ss:$36 sps:$4 sm:$0xff]  }
 0x169   :  { %3447 = vmatprep.subr.bf16.mxu1 %v8017_v7  ;;  %v8027_v20 = vld [vmem:[%s10628_s1 + $0x378] ss:$36 sps:$4 sm:$0xff]   ;;  %v8020_v22 = vld [vmem:[%s10628_s1 + $0x404] ss:$36 sps:$4 sm:$0xff]   ;;  %v8041_v25 = vld [vmem:[%s10628_s1 + $0x40c] ss:$36 sps:$4 sm:$0xff]  }
 0x16a   :  { %v8012_v48 = vld [vmem:[%s10628_s1 + $0x3b8] ss:$36 sps:$4 sm:$0xff]   ;;  %v8033_v23 = vld [vmem:[%s10628_s1 + $0x3c0] ss:$36 sps:$4 sm:$0xff]   ;;  %v8026_v28 = vld [vmem:[%s10628_s1 + $0x44c] ss:$36 sps:$4 sm:$0xff]  }
 0x16b   :  { %3366 = vmatpush1.bf16.msra.mxu0 %v7994_v8  ;;  %v8018_v26 = vld [vmem:[%s10628_s1 + $0x400] ss:$36 sps:$4 sm:$0xff]   ;;  %v8039_v29 = vld [vmem:[%s10628_s1 + $0x408] ss:$36 sps:$4 sm:$0xff]   ;;  %v8047_v30 = vld [vmem:[%s10628_s1 + $0x454] ss:$36 sps:$4 sm:$0xff]  }
 0x16c   :  { %3367 = vmatprep.subr.bf16.mxu0 %v8002_v9  ;;  %3448 = vmatpush1.bf16.msra.mxu1 %v8015_v10  ;;  %v8024_v31 = vld [vmem:[%s10628_s1 + $0x448] ss:$36 sps:$4 sm:$0xff]   ;;  %v8032_v33 = vld [vmem:[%s10628_s1 + $0x494] ss:$36 sps:$4 sm:$0xff]   ;;  %v8053_v35 = vld [vmem:[%s10628_s1 + $0x49c] ss:$36 sps:$4 sm:$0xff]  }
 0x16d   :  { %3449 = vmatprep.subr.bf16.mxu1 %v8023_v11  ;;  %v8045_v34 = vld [vmem:[%s10628_s1 + $0x450] ss:$36 sps:$4 sm:$0xff]   ;;  %v8038_v37 = vld [vmem:[%s10628_s1 + $0x4dc] ss:$36 sps:$4 sm:$0xff]   ;;  %v8059_v41 = vld [vmem:[%s10628_s1 + $0x4e4] ss:$36 sps:$4 sm:$0xff]  }
 0x16e   :  { %v8030_v36 = vld [vmem:[%s10628_s1 + $0x490] ss:$36 sps:$4 sm:$0xff]   ;;  %v8051_v40 = vld [vmem:[%s10628_s1 + $0x498] ss:$36 sps:$4 sm:$0xff]   ;;  %v8044_v43 = vld [vmem:[%s10628_s1 + $0x524] ss:$36 sps:$4 sm:$0xff]  }
 0x16f   :  { %3368 = vmatpush1.bf16.msra.mxu0 %v8000_v12  ;;  %v8036_v42 = vld [vmem:[%s10628_s1 + $0x4d8] ss:$36 sps:$4 sm:$0xff]   ;;  %v8057_v45 = vld [vmem:[%s10628_s1 + $0x4e0] ss:$36 sps:$4 sm:$0xff]   ;;  %v8065_v47 = vld [vmem:[%s10628_s1 + $0x52c] ss:$36 sps:$4 sm:$0xff]  }
 0x170   :  { %3369 = vmatprep.subr.bf16.mxu0 %v8008_v14  ;;  %3450 = vmatpush1.bf16.msra.mxu1 %v8021_v16  ;;  %v8042_v5 = vld [vmem:[%s10628_s1 + $0x520] ss:$36 sps:$4 sm:$0xff]   ;;  %v8050_v38 = vld [vmem:[%s10628_s1 + $0x56c] ss:$36 sps:$4 sm:$0xff]   ;;  %v8071_v49 = vld [vmem:[%s10628_s1 + $0x574] ss:$36 sps:$4 sm:$0xff]  }
 0x171   :  { %3451 = vmatprep.subr.bf16.mxu1 %v8029_v17  ;;  %v8063_v39 = vld [vmem:[%s10628_s1 + $0x528] ss:$36 sps:$4 sm:$0xff]   ;;  %v8056_v51 = vld [vmem:[%s10628_s1 + $0x5b4] ss:$36 sps:$4 sm:$0xff]   ;;  %v8077_v53 = vld [vmem:[%s10628_s1 + $0x5bc] ss:$36 sps:$4 sm:$0xff]  }
 0x172   :  { %v8048_v50 = vld [vmem:[%s10628_s1 + $0x568] ss:$36 sps:$4 sm:$0xff]   ;;  %v8069_v52 = vld [vmem:[%s10628_s1 + $0x570] ss:$36 sps:$4 sm:$0xff]   ;;  %v8062_v55 = vld [vmem:[%s10628_s1 + $0x5fc] ss:$36 sps:$4 sm:$0xff]  }
 0x173   :  { %3370 = vmatpush1.bf16.msra.mxu0 %v8006_v18  ;;  %v8054_v54 = vld [vmem:[%s10628_s1 + $0x5b0] ss:$36 sps:$4 sm:$0xff]   ;;  %v8075_v56 = vld [vmem:[%s10628_s1 + $0x5b8] ss:$36 sps:$4 sm:$0xff]   ;;  %v8084_v57 = vld [vmem:[%s10628_s1 + $0x604] ss:$36 sps:$4 sm:$0xff]  }
 0x174   :  { %3371 = vmatprep.subr.bf16.mxu0 %v8014_v19  ;;  %3452 = vmatpush1.bf16.msra.mxu1 %v8027_v20  ;;  %v8060_v58 = vld [vmem:[%s10628_s1 + $0x5f8] ss:$36 sps:$4 sm:$0xff]   ;;  %v8068_v59 = vld [vmem:[%s10628_s1 + $0x644] ss:$36 sps:$4 sm:$0xff]   ;;  %v8090_v62 = vld [vmem:[%s10628_s1 + $0x64c] ss:$36 sps:$4 sm:$0xff]  }
 0x175   :  { %3453 = vmatprep.subr.bf16.mxu1 %v8035_v21  ;;  %v8082_v60 = vld [vmem:[%s10628_s1 + $0x600] ss:$36 sps:$4 sm:$0xff]   ;;  %v8074_v9 = vld [vmem:[%s10628_s1 + $0x68c] ss:$36 sps:$4 sm:$0xff]   ;;  %v8096_v12 = vld [vmem:[%s10628_s1 + $0x694] ss:$36 sps:$4 sm:$0xff]  }
 0x176   :  { %v8066_v4 = vld [vmem:[%s10628_s1 + $0x640] ss:$36 sps:$4 sm:$0xff]   ;;  %v8088_v10 = vld [vmem:[%s10628_s1 + $0x648] ss:$36 sps:$4 sm:$0xff]   ;;  %v8094_v17 = vld [vmem:[%s10628_s1 + $0x690] ss:$36 sps:$4 sm:$0xff]  }
 0x177   :  { %3372 = vmatpush1.bf16.msra.mxu0 %v8012_v48  ;;  %v8072_v14 = vld [vmem:[%s10628_s1 + $0x688] ss:$36 sps:$4 sm:$0xff]   ;;  %v8078_v16 = vld [vmem:[%s10628_s1 + $0x260] ss:$36 sps:$4 sm:$0xff]   ;;  %vm3704_vm1 = vcmask 1043456   ;;  %vm3641_vm2 = vcmask 523264  }
 0x178   :  { %3373 = vmatprep.subr.bf16.mxu0 %v8020_v22  ;;  %3454 = vmatpush1.bf16.msra.mxu1 %v8033_v23  ;;  %v8079_v18 = vld [vmem:[%s10628_s1 + $0x20] ss:$36 sps:$4 sm:$0xff]   ;;  %v8085_v21 = vld [vmem:[%s10628_s1 + $0x2a8] ss:$36 sps:$4 sm:$0xff]   ;;  %vm3688_vm4 = vcmask 64512  }
 0x179   :  { %3455 = vmatprep.subr.bf16.mxu1 %v8041_v25  ;;  %v8100_v23 = vld [vmem:[%s10628_s1 + $0x4a0] ss:$36 sps:$4 sm:$0xff]   ;;  %v8086_v25 = vld [vmem:[%s10628_s1 + $0x68] ss:$36 sps:$4 sm:$0xff]  }
 0x17b   :  { %3374 = vmatpush1.bf16.msra.mxu0 %v8018_v26  ;;  %v9686_v26 = vld [vmem:[#allocation2 + $0x4] sm:$0xf] }
 0x17c   :  { %3375 = vmatprep.subr.bf16.mxu0 %v8026_v28  ;;  %3456 = vmatpush1.bf16.msra.mxu1 %v8039_v29  ;;  %v8091_v28 = vld [vmem:[%s10628_s1 + $0x2f0] ss:$36 sps:$4 sm:$0xff]   ;;  %v6832_v29 = vcombine.low %v9686_v26, %v9686_v26 }
 0x17d   :  { %3457 = vmatprep.subr.bf16.mxu1 %v8047_v30  ;;  %v8103_v30 = vld [vmem:[%s10628_s1 + $0x4e8] ss:$36 sps:$4 sm:$0xff]  }
 0x17f   :  { %3376 = vmatpush1.bf16.msra.mxu0 %v8024_v31  ;;  %v8092_v31 = vld [vmem:[%s10628_s1 + $0xb0] ss:$36 sps:$4 sm:$0xff]  }
 0x180   :  { %3386 = vmatprep.subr.bf16.mxu0 %v8032_v33  ;;  %3458 = vmatpush1.bf16.msra.mxu1 %v8045_v34  ;;  %v9704_v33 = vld [vmem:[#allocation2 + $0x8] sm:$0xf] }
 0x181   :  { %3468 = vmatprep.subr.bf16.mxu1 %v8053_v35  ;;  %v6839_v34 = vcombine.low %v9704_v33, %v9704_v33  ;;  %v8106_v35 = vld [vmem:[%s10628_s1 + $0x530] ss:$36 sps:$4 sm:$0xff]  }
 0x182   :  { %3378 = vmatmul.mubr.bf16.vlgmr.msra.gmra.mrb[16].mxu0 %v9256_v46 }
 0x183   :  { %3387 = vmatpush1.bf16.msra.mxu0 %v8030_v36  ;;  %3460 = vmatmul.mubr.bf16.vlgmr.msra.gmra.mrb[16].mxu1 %v9256_v46  ;;  %v8098_v36 = vld [vmem:[%s10628_s1 + $0xf8] ss:$36 sps:$4 sm:$0xff]  }
 0x184   :  { %3388 = vmatprep.subr.bf16.mxu0 %v8038_v37  ;;  %3469 = vmatpush1.bf16.msra.mxu1 %v8051_v40  ;;  %v8099_v37 = vld [vmem:[%s10628_s1 + $0x380] ss:$36 sps:$4 sm:$0xff]   ;;  %v8109_v40 = vld [vmem:[%s10628_s1 + $0x578] ss:$36 sps:$4 sm:$0xff]  }
 0x185   :  { %3470 = vmatprep.subr.bf16.mxu1 %v8059_v41  ;;  %3418 = vmatprep.mubr.bf16.mxu0 %v8325_v13  ;;  %v8101_v41 = vld [vmem:[%s10628_s1 + $0x140] ss:$36 sps:$4 sm:$0xff]  }
 0x186   :  { %3500 = vmatprep.mubr.bf16.mxu1 %v8325_v13 }
 0x187   :  { %3389 = vmatpush1.bf16.msra.mxu0 %v8036_v42  ;;  %v8102_v42 = vld [vmem:[%s10628_s1 + $0x3c8] ss:$36 sps:$4 sm:$0xff]  }
 0x188   :  { %3390 = vmatprep.subr.bf16.mxu0 %v8044_v43  ;;  %3471 = vmatpush1.bf16.msra.mxu1 %v8057_v45  ;;  %v8111_v43 = vld [vmem:[%s10628_s1 + $0x5c0] ss:$36 sps:$4 sm:$0xff]   ;;  %v8104_v45 = vld [vmem:[%s10628_s1 + $0x188] ss:$36 sps:$4 sm:$0xff]  }
 0x189   :  { %3472 = vmatprep.subr.bf16.mxu1 %v8065_v47  ;;  %v8105_v47 = vld [vmem:[%s10628_s1 + $0x410] ss:$36 sps:$4 sm:$0xff]  }
 0x18b   :  { %3391 = vmatpush1.bf16.msra.mxu0 %v8042_v5 }
 0x18c   :  { %3392 = vmatprep.subr.bf16.mxu0 %v8050_v38  ;;  %3473 = vmatpush1.bf16.msra.mxu1 %v8063_v39 }
 0x18d   :  { %3474 = vmatprep.subr.bf16.mxu1 %v8071_v49  ;;  %v8112_v49 = vld [vmem:[%s10628_s1 + $0x608] ss:$36 sps:$4 sm:$0xff]  }
 0x18f   :  { %3393 = vmatpush1.bf16.msra.mxu0 %v8048_v50 }
 0x190   :  { %3394 = vmatprep.subr.bf16.mxu0 %v8056_v51  ;;  %3475 = vmatpush1.bf16.msra.mxu1 %v8069_v52  ;;  %v8107_v52 = vld [vmem:[%s10628_s1 + $0x1d0] ss:$36 sps:$4 sm:$0xff]  }
 0x191   :  { %3476 = vmatprep.subr.bf16.mxu1 %v8077_v53 }
 0x193   :  { %3395 = vmatpush1.bf16.msra.mxu0 %v8054_v54 }
 0x194   :  { %3396 = vmatprep.subr.bf16.mxu0 %v8062_v55  ;;  %3477 = vmatpush1.bf16.msra.mxu1 %v8075_v56  ;;  %v8108_v55 = vld [vmem:[%s10628_s1 + $0x458] ss:$36 sps:$4 sm:$0xff]  }
 0x195   :  { %v1612_v61 = vpop.f32.mrb[4].mxu0  ;;  %3478 = vmatprep.subr.bf16.mxu1 %v8084_v57  ;;  %v1694_v63 = vpop.f32.mrb[4].mxu1 }
 0x196   :  { %v1614_v0 = vpop.f32.mrb[5].mxu0  ;;  %v1696_v1 = vpop.f32.mrb[5].mxu1 }
 0x197   :  { %v7017_v2 = vpack.c.bf16 %v1614_v0, %v1612_v61  ;;  %v1616_v3 = vpop.f32.mrb[6].mxu0  ;;  %3397 = vmatpush1.bf16.msra.mxu0 %v8060_v58  ;;  %v7018_v6 = vpack.c.bf16 %v1696_v1, %v1694_v63  ;;  %v1698_v7 = vpop.f32.mrb[6].mxu1  ;;  %v8110_v61 = vld [vmem:[%s10628_s1 + $0x218] ss:$36 sps:$4 sm:$0xff]  }
 0x198   :  { %v1617_v8 = vpop.f32.mrb[7].mxu0  ;;  %3398 = vmatprep.subr.bf16.mxu0 %v8068_v59  ;;  %3479 = vmatpush1.bf16.msra.mxu1 %v8082_v60  ;;  %v1699_v11 = vpop.f32.mrb[7].mxu1  ;;  %v8113_v59 = vld [vmem:[%s10628_s1 + $0x650] ss:$36 sps:$4 sm:$0xff]  }
 0x199   :  { %1820 = vst [vmem:[#allocation2 + $0x10] sm:$0xff] %v7017_v2  ;;  %3480 = vmatprep.subr.bf16.mxu1 %v8090_v62  ;;  %1821 = vst [vmem:[#allocation2 + $0x18] sm:$0xff] %v7018_v6  ;;  %v8114_v62 = vld [vmem:[%s10628_s1 + $0x698] ss:$36 sps:$4 sm:$0xff]  }
 0x19b   :  { %3399 = vmatpush1.bf16.msra.mxu0 %v8066_v4 }
 0x19c   :  { %3400 = vmatprep.subr.bf16.mxu0 %v8074_v9  ;;  %3481 = vmatpush1.bf16.msra.mxu1 %v8088_v10 }
 0x19d   :  { %3482 = vmatprep.subr.bf16.mxu1 %v8096_v12 }
 0x19f   :  { %3401 = vmatpush1.bf16.msra.mxu0 %v8072_v14 }
 0x1a0   :  { %7056 = vmatprep.subr.bf16.mxu0 %v8078_v16  ;;  %v9666_v19 = vld [vmem:[#allocation2 + $0x14] sm:$0xf]  ;;  %v9668_v20 = vld [vmem:[#allocation2 + $0x10] sm:$0xf]  ;;  %3483 = vmatpush1.bf16.msra.mxu1 %v8094_v17  ;;  %v9766_v63 = vld [vmem:[#allocation2 + $0x18] sm:$0xf] }
 0x1a1   :  { %v6840_v48 = vcombine.low %v9666_v19, %v9666_v19  ;;  %v6833_v22 = vcombine.low %v9668_v20, %v9668_v20  ;;  %7217 = vmatprep.subr.bf16.mxu1 %v8326_v15  ;;  %v3706_v0 = vsel %vm3704_vm1, %v9766_v63, 0 }
 0x1a2   :  { %3419 = vmatmul.mubr.bf16.vlgmr.msra.gmra.mrb[16].mxu0 %v9358_v24 }
 0x1a3   :  { %7057 = vmatpush3.bf16.msra.mxu0 %v8079_v18  ;;  %4222 = vrot.lane.b32.xlu0 %v6840_v48, %s8328_s13  ;;  %v4114_v18 = vsel %vm3641_vm2, %v9666_v19, 0 }
 0x1a4   :  { %3989 = vrot.lane.b32.xlu1 %v6833_v22, %s8328_s13  ;;  %7058 = vmatprep.subr.bf16.mxu0 %v8085_v21 }
 0x1a5   :  { %3501 = vmatmul.mubr.bf16.vlgmr.msra.gmra.mrb[16].mxu1 %v9358_v24  ;;  %3541 = vmatprep.mubr.bf16.mxu0 %v9065_v44  ;;  %v8097_v44 = vld [vmem:[%s10628_s1 + $0x338] ss:$36 sps:$4 sm:$0xff]  }
 0x1a6   :  { %7218 = vmatpush3.bf16.msra.mxu1 %v8100_v23  ;;  %7233 = vmatprep.mubr.msk.bf16.mxu1 %vm8327_vm0, %v8326_v15 }
 0x1a7   :  { %7059 = vmatpush3.bf16.msra.mxu0 %v8086_v25  ;;  %7219 = vmatprep.subr.bf16.mxu1 %v8326_v15 }
 0x1a8   :  { %3984 = vrot.lane.b32.xlu1 %v6832_v29, %s8328_s13  ;;  %7060 = vmatprep.subr.bf16.mxu0 %v8091_v28 }
 0x1aa   :  { %7220 = vmatpush3.bf16.msra.mxu1 %v8103_v30 }
 0x1ab   :  { %7061 = vmatpush3.bf16.msra.mxu0 %v8092_v31  ;;  %7221 = vmatprep.subr.bf16.mxu1 %v8326_v15 }
 0x1ac   :  { %4217 = vrot.lane.b32.xlu1 %v6839_v34, %s8328_s13  ;;  %7062 = vmatprep.subr.bf16.mxu0 %v8097_v44 }
 0x1ae   :  { %7222 = vmatpush3.bf16.msra.mxu1 %v8106_v35 }
 0x1af   :  { %7063 = vmatpush3.bf16.msra.mxu0 %v8098_v36  ;;  %7223 = vmatprep.subr.bf16.mxu1 %v8326_v15 }
 0x1b0   :  { %7064 = vmatprep.subr.bf16.mxu0 %v8099_v37 }
 0x1b2   :  { %7224 = vmatpush3.bf16.msra.mxu1 %v8109_v40 }
 0x1b3   :  { %7065 = vmatpush3.bf16.msra.mxu0 %v8101_v41  ;;  %7225 = vmatprep.subr.bf16.mxu1 %v8326_v15 }
 0x1b4   :  { %7066 = vmatprep.subr.bf16.mxu0 %v8102_v42 }
 0x1b5   :  { %v7041_v5 = vpop.f32.mrb[8].mxu0  ;;  %v1775_v39 = vpop.f32.mrb[8].mxu1 }
 0x1b6   :  { %v7042_v38 = vpop.f32.mrb[9].mxu0  ;;  %7226 = vmatpush3.bf16.msra.mxu1 %v8111_v43  ;;  %v7215_v53 = vpop.f32.mrb[9].mxu1 }
 0x1b7   :  { %v7043_v50 = vadd.f32 %v7042_v38, %v7041_v5  ;;  %v7044_v51 = vpop.f32.mrb[10].mxu0  ;;  %7067 = vmatpush3.bf16.msra.mxu0 %v8104_v45  ;;  %7227 = vmatprep.subr.bf16.mxu1 %v8326_v15  ;;  %v1778_v56 = vpop.f32.mrb[10].mxu1  ;;  %v3632_v45 = vlaneseq }
 0x1b8   :  { %v7045_v54 = vpop.f32.mrb[11].mxu0  ;;  %7068 = vmatprep.subr.bf16.mxu0 %v8105_v47  ;;  %v7216_v58 = vpop.f32.mrb[11].mxu1 }
 0x1b9   :  { %v1776_v57 = vadd.f32 %v7043_v50, %v1775_v39  ;;  %v3757_v1 = vpop.permute.xlu0 %3756  ;;  %v3633_v51 = vshrl.u32 %v3632_v45, 7 }
 0x1ba   :  { %7228 = vmatpush3.bf16.msra.mxu1 %v8112_v49  ;;  %v3762_v2 = vsel %vm3641_vm2, %v3757_v1, 0 }
 0x1bb   :  { %v7019_v60 = vpack.c.bf16 %v1776_v57, %v1776_v57  ;;  %7069 = vmatpush3.bf16.msra.mxu0 %v8107_v52  ;;  %7229 = vmatprep.subr.bf16.mxu1 %v8326_v15  ;;  %v3635_v52 = vand.u32 127, %v3632_v45 }
 0x1bc   :  { %7070 = vmatprep.subr.bf16.mxu0 %v8108_v55  ;;  %v8329_v55 = vmov -1e+30  }
 0x1bd   :  { %1822 = vst [vmem:[#allocation2 + $0x20] sm:$0xf] %v7019_v60  ;;  %vm3636_vm3 = vcmp.ge.s32.totalorder %v3633_v51, %v3635_v52 }
 0x1be   :  { %7230 = vmatpush3.bf16.msra.mxu1 %v8113_v59  ;;  %v9841_v56 = vsel %vm3636_vm3, 0.0, %v8329_v55 }
 0x1bf   :  { %7071 = vmatpush3.bf16.msra.mxu0 %v8110_v61  ;;  %7231 = vmatprep.subr.bf16.mxu1 %v8326_v15 }
 0x1c0   :  { %7237 = vmatprep.subr.bf16.mxu0 %v8326_v15 }
 0x1c2   :  { %3542 = vmatmul.mubr.bf16.vlgmr.msra.gmra.mrb[20].mxu0 %v9256_v46  ;;  %7232 = vmatpush3.bf16.msra.mxu1 %v8114_v62  ;;  %v3646_v46 = vsel %vm3641_vm2, %v9366_v27, 0  ;;  %v3881_v27 = vsel %vm3641_vm2, %v9668_v20, 0 }
 0x1c3   :  { %7239 = vmatprep.mubr.msk.bf16.mxu0 %vm8327_vm0, %v8326_v15  ;;  %7243 = vmatprep.subr.bf16.mxu1 %v8326_v15 }
 0x1c5   :  { %7234 = vmatmul.mubr.bf16.vlgmr.msra.gmra.mrb[20].mxu1 %v9358_v24  ;;  %v3752_v24 = vpop.permute.xlu0 %3751 }
 0x1c6   :  { %7244 = vmatpush3.bf16.msra.mxu1 %v3706_v0  ;;  %7245 = vmatprep.mubr.msk.bf16.mxu1 %vm8327_vm0, %v8326_v15 }
 0x1c7   :  { %7255 = vmatprep.subr.bf16.mxu1 %v8326_v15 }
 0x1c8   :  { %7238 = vmatpush3.bf16.xpose.msra.mxu0 %v3646_v46 }
 0x1c9   :  { %7249 = vmatprep.subr.bf16.mxu0 %v8326_v15 }
 0x1cf   :  { %7240 = vmatmul.mubr.msk.bf16.vlgmr.msra.gmra.mrb[24].mxu0 %vm3641_vm2, %v9379_v32 }
 0x1d0   :  { %7250 = vmatpush3.bf16.xpose.msra.mxu0 %v3762_v2  ;;  %7251 = vmatprep.mubr.msk.bf16.mxu0 %vm8327_vm0, %v8326_v15 }
 0x1d1   :  { %7261 = vmatprep.subr.bf16.mxu0 %v8326_v15 }
 0x1d7   :  { %7252 = vmatmul.mubr.msk.bf16.vlgmr.msra.gmra.mrb[28].mxu0 %vm3641_vm2, %v3752_v24 }
 0x1d8   :  { %7262 = vmatpush3.bf16.xpose.msra.mxu0 %v3881_v27  ;;  %7263 = vmatprep.mubr.msk.bf16.mxu0 %vm8327_vm0, %v8326_v15 }
 0x1d9   :  { %7273 = vmatprep.subr.bf16.mxu0 %v8326_v15 }
 0x1df   :  { %7264 = vmatmul.mubr.msk.bf16.vlgmr.msra.gmra.mrb[32].mxu0 %vm3641_vm2, %v9686_v26 }
 0x1e0   :  { %7275 = vmatprep.mubr.msk.bf16.mxu0 %vm8327_vm0, %v8326_v15 }
 0x215   :  { %v3338_v32 = vpop.f32.mrb[12].mxu1  ;;  %v3256_v4 = vpop.f32.mrb[12].mxu0 }
 0x216   :  { %v3990_v3 = vpop.permute.xlu1 %3989  ;;  %v3258_v7 = vpop.f32.mrb[13].mxu0 }
 0x217   :  { %v3995_v6 = vsel %vm3641_vm2, %v3990_v3, 0  ;;  %v3340_v8 = vpop.f32.mrb[13].mxu1  ;;  %v7020_v9 = vpack.c.bf16 %v3258_v7, %v3256_v4  ;;  %v3260_v11 = vpop.f32.mrb[14].mxu0 }
 0x218   :  { %v7021_v10 = vpack.c.bf16 %v3340_v8, %v3338_v32  ;;  %7274 = vmatpush3.bf16.xpose.msra.mxu0 %v3995_v6  ;;  %v3342_v12 = vpop.f32.mrb[14].mxu1  ;;  %v3261_v14 = vpop.f32.mrb[15].mxu0 }
 0x219   :  { %7285 = vmatprep.subr.bf16.mxu0 %v8326_v15  ;;  %v3343_v16 = vpop.f32.mrb[15].mxu1  ;;  %3627 = vst [vmem:[#allocation2 + $0x24] sm:$0xff] %v7020_v9  ;;  %v4223_v25 = vpop.permute.xlu0 %4222 }
 0x21a   :  { %3628 = vst [vmem:[#allocation2 + $0x2c] sm:$0xff] %v7021_v10  ;;  %v3985_v17 = vpop.permute.xlu1 %3984  ;;  %v4228_v28 = vsel %vm3641_vm2, %v4223_v25, 0 }
 0x21e   :  { %v4218_v31 = vpop.permute.xlu1 %4217 }
 0x21f   :  { %7276 = vmatmul.mubr.msk.bf16.vlgmr.msra.gmra.mrb[36].mxu0 %vm3641_vm2, %v3985_v17 }
 0x220   :  { %7286 = vmatpush3.bf16.xpose.msra.mxu0 %v4114_v18  ;;  %7287 = vmatprep.mubr.msk.bf16.mxu0 %vm8327_vm0, %v8326_v15  ;;  %v4340_v21 = vld [vmem:[#allocation2 + $0x24] sm:$0xf]  ;;  %v9805_v23 = vld [vmem:[#allocation2 + $0x28] sm:$0xf] }
 0x221   :  { %v4341_v20 = vld [vmem:[#allocation2 + $0x30] sm:$0xf]  ;;  %7297 = vmatprep.subr.bf16.mxu0 %v8326_v15  ;;  %v6846_v22 = vcombine.low %v4340_v21, %v4340_v21  ;;  %v9809_v26 = vld [vmem:[#allocation2 + $0x2c] sm:$0xf]  ;;  %v6853_v19 = vcombine.low %v9805_v23, %v9805_v23 }
 0x222   :  { %v6847_v48 = vcombine.low %v4341_v20, %v4341_v20  ;;  %v6860_v29 = vcombine.low %v9809_v26, %v9809_v26  ;;  %v4347_v30 = vsel %vm3641_vm2, %v4341_v20, 0 }
 0x223   :  { %4450 = vrot.lane.b32.xlu1 %v6846_v22, %s8328_s13 }
 0x224   :  { %4455 = vrot.lane.b32.xlu0 %v6847_v48, %s8328_s13 }
 0x227   :  { %7288 = vmatmul.mubr.msk.bf16.vlgmr.msra.gmra.mrb[40].mxu0 %vm3641_vm2, %v9704_v33  ;;  %4684 = vrot.lane.b32.xlu1 %v6853_v19, %s8328_s13 }
 0x228   :  { %7298 = vmatpush3.bf16.xpose.msra.mxu0 %v4228_v28  ;;  %7299 = vmatprep.mubr.msk.bf16.mxu0 %vm8327_vm0, %v8326_v15 }
 0x229   :  { %7309 = vmatprep.subr.bf16.mxu0 %v8326_v15 }
 0x22b   :  { %4917 = vrot.lane.b32.xlu1 %v6860_v29, %s8328_s13 }
 0x22f   :  { %7300 = vmatmul.mubr.msk.bf16.vlgmr.msra.gmra.mrb[44].mxu0 %vm3641_vm2, %v4218_v31 }
 0x230   :  { %7310 = vmatpush3.bf16.xpose.msra.mxu0 %v4347_v30  ;;  %7311 = vmatprep.mubr.msk.bf16.mxu0 %vm8327_vm0, %v8326_v15 }
 0x231   :  { %7321 = vmatprep.subr.bf16.mxu0 %v8326_v15 }
 0x237   :  { %7312 = vmatmul.mubr.msk.bf16.vlgmr.msra.gmra.mrb[48].mxu0 %vm3641_vm2, %v4340_v21 }
 0x238   :  { %7323 = vmatprep.mubr.msk.bf16.mxu0 %vm8327_vm0, %v8326_v15 }
 0x275   :  { %v3420_v33 = vpop.f32.mrb[16].mxu0 }
 0x276   :  { %v3422_v44 = vpop.f32.mrb[17].mxu0 }
 0x277   :  { %v7022_v34 = vpack.c.bf16 %v3422_v44, %v3420_v33  ;;  %v3424_v35 = vpop.f32.mrb[18].mxu0 }
 0x278   :  { %v3425_v36 = vpop.f32.mrb[19].mxu0  ;;  %v3502_v9 = vpop.f32.mrb[16].mxu1 }
 0x279   :  { %3629 = vst [vmem:[#allocation2 + $0x34] sm:$0xff] %v7022_v34  ;;  %v3504_v10 = vpop.f32.mrb[17].mxu1 }
 0x27a   :  { %v7023_v11 = vpack.c.bf16 %v3504_v10, %v3502_v9  ;;  %v3506_v12 = vpop.f32.mrb[18].mxu1 }
 0x27b   :  { %v3507_v14 = vpop.f32.mrb[19].mxu1 }
 0x27c   :  { %3630 = vst [vmem:[#allocation2 + $0x3c] sm:$0xff] %v7023_v11 }
 0x280   :  { %v4575_v37 = vld [vmem:[#allocation2 + $0x34] sm:$0xf]  ;;  %v9831_v41 = vld [vmem:[#allocation2 + $0x38] sm:$0xf] }
 0x281   :  { %v6854_v40 = vcombine.low %v4575_v37, %v4575_v37  ;;  %v6861_v42 = vcombine.low %v9831_v41, %v9831_v41  ;;  %v4581_v54 = vsel %vm3641_vm2, %v4575_v37, 0 }
 0x283   :  { %4689 = vrot.lane.b32.xlu0 %v6854_v40, %s8328_s13 }
 0x287   :  { %4922 = vrot.lane.b32.xlu0 %v6861_v42, %s8328_s13  ;;  %v4814_v42 = vsel %vm3641_vm2, %v9831_v41, 0 }
 0x295   :  { %v7072_v43 = vpop.f32.mrb[20].mxu0  ;;  %v4451_v53 = vpop.permute.xlu1 %4450 }
 0x296   :  { %v4456_v47 = vpop.permute.xlu0 %4455  ;;  %v7073_v38 = vpop.f32.mrb[21].mxu0 }
 0x297   :  { %v4461_v5 = vsel %vm3641_vm2, %v4456_v47, 0  ;;  %v7074_v39 = vadd.f32 %v7073_v38, %v7072_v43  ;;  %v7075_v49 = vpop.f32.mrb[22].mxu0 }
 0x298   :  { %7322 = vmatpush3.bf16.xpose.msra.mxu0 %v4461_v5  ;;  %v7076_v50 = vpop.f32.mrb[23].mxu0  ;;  %v3583_v16 = vpop.f32.mrb[20].mxu1 }
 0x299   :  { %7333 = vmatprep.subr.bf16.mxu0 %v8326_v15  ;;  %v3584_v17 = vadd.f32 %v7074_v39, %v3583_v16  ;;  %v7235_v18 = vpop.f32.mrb[21].mxu1  ;;  %v4685_v36 = vpop.permute.xlu1 %4684 }
 0x29a   :  { %v3586_v20 = vpop.f32.mrb[22].mxu1 }
 0x29b   :  { %v7024_v21 = vpack.c.bf16 %v3584_v17, %v3584_v17  ;;  %v7236_v48 = vpop.f32.mrb[23].mxu1 }
 0x29d   :  { %3631 = vst [vmem:[#allocation2 + $0x44] sm:$0xf] %v7024_v21 }
 0x29f   :  { %7324 = vmatmul.mubr.msk.bf16.vlgmr.msra.gmra.mrb[52].mxu0 %vm3641_vm2, %v4451_v53 }
 0x2a0   :  { %7334 = vmatpush3.bf16.xpose.msra.mxu0 %v4581_v54  ;;  %7335 = vmatprep.mubr.msk.bf16.mxu0 %vm8327_vm0, %v8326_v15  ;;  %v4918_v54 = vpop.permute.xlu1 %4917 }
 0x2a1   :  { %7345 = vmatprep.subr.bf16.mxu0 %v8326_v15 }
 0x2a2   :  { %v3682_v57 = vpop.f32.mrb[24].mxu0 }
 0x2a3   :  { %v9847_v58 = vadd.f32 %v3682_v57, %v9841_v56  ;;  %v7241_v59 = vpop.f32.mrb[25].mxu0 }
 0x2a4   :  { %v3685_v60 = vpop.f32.mrb[26].mxu0 }
 0x2a5   :  { %v7242_v61 = vpop.f32.mrb[27].mxu0  ;;  %v3689_v62 = vsel %vm3688_vm4, %v9847_v58, -inf }
 0x2a6   :  { %3690 = vmax.xlane.f32.xlu0 %v3689_v62 }
 0x2a7   :  { %7336 = vmatmul.mubr.msk.bf16.vlgmr.msra.gmra.mrb[56].mxu0 %vm3641_vm2, %v9805_v23 }
 0x2a8   :  { %7347 = vmatprep.mubr.msk.bf16.mxu0 %vm8327_vm0, %v8326_v15 }
 0x2aa   :  { %v3798_v0 = vpop.f32.mrb[28].mxu0 }
 0x2ab   :  { %v9856_v46 = vadd.f32 %v3798_v0, %v9841_v56  ;;  %v7253_v1 = vpop.f32.mrb[29].mxu0 }
 0x2ac   :  { %v3801_v2 = vpop.f32.mrb[30].mxu0 }
 0x2ad   :  { %v7254_v24 = vpop.f32.mrb[31].mxu0  ;;  %v3804_v27 = vsel %vm3688_vm4, %v9856_v46, -inf }
 0x2ae   :  { %3805 = vmax.xlane.f32.xlu1 %v3804_v27 }
 0x2b2   :  { %v3917_v32 = vpop.f32.mrb[32].mxu0 }
 0x2b3   :  { %v9861_v3 = vadd.f32 %v3917_v32, %v9841_v56  ;;  %v7265_v4 = vpop.f32.mrb[33].mxu0 }
 0x2b4   :  { %v3920_v6 = vpop.f32.mrb[34].mxu0 }
 0x2b5   :  { %v7266_v7 = vpop.f32.mrb[35].mxu0  ;;  %v3923_v8 = vsel %vm3688_vm4, %v9861_v3, -inf }
 0x2b6   :  { %3924 = vmax.xlane.f32.xlu0 %v3923_v8 }
 0x2f2   :  { %v4031_v22 = vpop.f32.mrb[36].mxu0 }
 0x2f3   :  { %v9866_v23 = vadd.f32 %v4031_v22, %v9841_v56  ;;  %v7277_v25 = vpop.f32.mrb[37].mxu0 }
 0x2f4   :  { %v4034_v19 = vpop.f32.mrb[38].mxu0 }
 0x2f5   :  { %v7278_v28 = vpop.f32.mrb[39].mxu0  ;;  %v4690_v29 = vpop.permute.xlu0 %4689  ;;  %v4037_v30 = vsel %vm3688_vm4, %v9866_v23, -inf }
 0x2f6   :  { %v4695_v31 = vsel %vm3641_vm2, %v4690_v29, 0  ;;  %4038 = vmax.xlane.f32.xlu0 %v4037_v30  ;;  %v6828_v28 = vcombine.low %v9766_v63, %v9766_v63 }
 0x2f7   :  { %7346 = vmatpush3.bf16.xpose.msra.mxu0 %v4695_v31 }
 0x2f8   :  { %7357 = vmatprep.subr.bf16.mxu0 %v8326_v15 }
 0x2f9   :  { %v4923_v45 = vpop.permute.xlu0 %4922 }
 0x2fa   :  { %v4150_v33 = vpop.f32.mrb[40].mxu0  ;;  %v4928_v50 = vsel %vm3641_vm2, %v4923_v45, 0 }
 0x2fb   :  { %v9873_v44 = vadd.f32 %v4150_v33, %v9841_v56  ;;  %v7289_v34 = vpop.f32.mrb[41].mxu0 }
 0x2fc   :  { %v4153_v35 = vpop.f32.mrb[42].mxu0 }
 0x2fd   :  { %v7290_v37 = vpop.f32.mrb[43].mxu0  ;;  %v4156_v40 = vsel %vm3688_vm4, %v9873_v44, -inf }
 0x2fe   :  { %4157 = vmax.xlane.f32.xlu1 %v4156_v40  ;;  %7348 = vmatmul.mubr.msk.bf16.vlgmr.msra.gmra.mrb[60].mxu0 %vm3641_vm2, %v4685_v36 }
 0x2ff   :  { %7358 = vmatpush3.bf16.xpose.msra.mxu0 %v4814_v42  ;;  %7359 = vmatprep.mubr.msk.bf16.mxu0 %vm8327_vm0, %v8326_v15 }
 0x300   :  { %7369 = vmatprep.subr.bf16.mxu0 %v8326_v15 }
 0x302   :  { %v4264_v43 = vpop.f32.mrb[44].mxu0 }
 0x303   :  { %v9884_v47 = vadd.f32 %v4264_v43, %v9841_v56  ;;  %v7301_v5 = vpop.f32.mrb[45].mxu0 }
 0x304   :  { %v4267_v38 = vpop.f32.mrb[46].mxu0 }
 0x305   :  { %v7302_v39 = vpop.f32.mrb[47].mxu0  ;;  %v4270_v49 = vsel %vm3688_vm4, %v9884_v47, -inf }
 0x306   :  { %4271 = vmax.xlane.f32.xlu0 %v4270_v49  ;;  %7360 = vmatmul.mubr.msk.bf16.vlgmr.msra.gmra.mrb[64].mxu0 %vm3641_vm2, %v9809_v26  ;;  %v9947_v39 = vld [vmem:[#allocation2 + $0x20] sm:$0xf] }
 0x307   :  { %7370 = vmatpush3.bf16.xpose.msra.mxu0 %v4928_v50  ;;  %7371 = vmatprep.mubr.msk.bf16.mxu0 %vm8327_vm0, %v8326_v15 }
 0x30a   :  { %v4383_v41 = vpop.f32.mrb[48].mxu0 }
 0x30b   :  { %v9894_v51 = vadd.f32 %v4383_v41, %v9841_v56  ;;  %v7313_v52 = vpop.f32.mrb[49].mxu0  ;;  %v9949_v41 = vld [vmem:[#allocation2 + $0x3c] sm:$0xf] }
 0x30c   :  { %v4386_v53 = vpop.f32.mrb[50].mxu0 }
 0x30d   :  { %v7314_v55 = vpop.f32.mrb[51].mxu0  ;;  %v4389_v57 = vsel %vm3688_vm4, %v9894_v51, -inf }
 0x30e   :  { %4390 = vmax.xlane.f32.xlu0 %v4389_v57  ;;  %7372 = vmatmul.mubr.msk.bf16.vlgmr.msra.gmra.mrb[68].mxu0 %vm3641_vm2, %v4918_v54  ;;  %v6842_v54 = vcombine.low %v9947_v39, %v9947_v39  ;;  %v6849_v57 = vcombine.low %v9949_v41, %v9949_v41 }
 0x333   :  { %v3691_v59 = vpop.xlane.xlu0 %3690 }
 0x334   :  { %v3692_v26 = vsub.f32 %v9847_v58, %v3691_v59 }
 0x336   :  { %v3693_v60 = vmul.f32 1.442695, %v3692_v26  ;;  %v9957_v26 = vld [vmem:[#allocation2 + $0x40] sm:$0xf] }
 0x338   :  { %8253 = vpow2.f32 %v3693_v60 }
 0x33b   :  { %v3806_v61 = vpop.xlane.xlu1 %3805 }
 0x33c   :  { %v3807_v62 = vsub.f32 %v9856_v46, %v3806_v61 }
 0x33e   :  { %v3808_v0 = vmul.f32 1.442695, %v3807_v62  ;;  %v6856_v62 = vcombine.low %v9957_v26, %v9957_v26 }
 0x340   :  { %8255 = vpow2.f32 %v3808_v0 }
 0x342   :  { %v9901_v1 = vpop.eup %8253 }
 0x343   :  { %v3925_v2 = vpop.xlane.xlu0 %3924  ;;  %v3695_v24 = vsel %vm3688_vm4, %v9901_v1, 0.0 }
 0x344   :  { %v3926_v27 = vsub.f32 %v9861_v3, %v3925_v2  ;;  %3696 = vadd.xlane.f32.xlu1 %v3695_v24  ;;  %v9965_v2 = vld [vmem:[#allocation2 + $0x44] sm:$0xf]  ;;  %v3876_v24 = vld [vmem:[#allocation2 + $0x1c] sm:$0xf] }
 0x346   :  { %v3927_v32 = vmul.f32 1.442695, %v3926_v27  ;;  %v6863_v27 = vcombine.low %v9965_v2, %v9965_v2 }
 0x348   :  { %8257 = vpow2.f32 %v3927_v32  ;;  %v6835_v32 = vcombine.low %v3876_v24, %v3876_v24 }
 0x34a   :  { %v9906_v4 = vpop.eup %8255 }
 0x34b   :  { %v3810_v58 = vsel %vm3688_vm4, %v9906_v4, 0.0 }
 0x34c   :  { %3811 = vadd.xlane.f32.xlu1 %v3810_v58 }
 0x352   :  { %v9910_v46 = vpop.eup %8257 }
 0x353   :  { %v3929_v6 = vsel %vm3688_vm4, %v9910_v46, 0.0 }
 0x354   :  { %3930 = vadd.xlane.f32.xlu1 %v3929_v6 }
 0x372   :  { %v4497_v7 = vpop.f32.mrb[52].mxu0 }
 0x373   :  { %v9915_v8 = vadd.f32 %v4497_v7, %v9841_v56  ;;  %v7325_v3 = vpop.f32.mrb[53].mxu0 }
 0x374   :  { %v4500_v9 = vpop.f32.mrb[54].mxu0 }
 0x375   :  { %v7326_v10 = vpop.f32.mrb[55].mxu0  ;;  %v4503_v11 = vsel %vm3688_vm4, %v9915_v8, -inf }
 0x376   :  { %4504 = vmax.xlane.f32.xlu0 %v4503_v11 }
 0x37a   :  { %v4617_v12 = vpop.f32.mrb[56].mxu0 }
 0x37b   :  { %v9920_v14 = vadd.f32 %v4617_v12, %v9841_v56  ;;  %v7337_v16 = vpop.f32.mrb[57].mxu0 }
 0x37c   :  { %v4620_v17 = vpop.f32.mrb[58].mxu0 }
 0x37d   :  { %v7338_v18 = vpop.f32.mrb[59].mxu0  ;;  %v4623_v20 = vsel %vm3688_vm4, %v9920_v14, -inf }
 0x37e   :  { %4624 = vmax.xlane.f32.xlu0 %v4623_v20 }
 0x383   :  { %v4039_v21 = vpop.xlane.xlu0 %4038 }
 0x384   :  { %v4040_v48 = vsub.f32 %v9866_v23, %v4039_v21 }
 0x386   :  { %v4041_v22 = vmul.f32 1.442695, %v4040_v48 }
 0x388   :  { %8259 = vpow2.f32 %v4041_v22 }
 0x38b   :  { %v4158_v29 = vpop.xlane.xlu1 %4157 }
 0x38c   :  { %v4159_v30 = vsub.f32 %v9873_v44, %v4158_v29 }
 0x38e   :  { %v4160_v33 = vmul.f32 1.442695, %v4159_v30 }
 0x390   :  { %8261 = vpow2.f32 %v4160_v33 }
 0x392   :  { %v9925_v25 = vpop.eup %8259 }
 0x393   :  { %v4043_v19 = vsel %vm3688_vm4, %v9925_v25, 0.0  ;;  %v4272_v31 = vpop.xlane.xlu0 %4271 }
 0x394   :  { %4044 = vadd.xlane.f32.xlu1 %v4043_v19  ;;  %v4273_v23 = vsub.f32 %v9884_v47, %v4272_v31 }
 0x396   :  { %v4274_v34 = vmul.f32 1.442695, %v4273_v23 }
 0x398   :  { %8263 = vpow2.f32 %v4274_v34 }
 0x39a   :  { %v9934_v35 = vpop.eup %8261 }
 0x39b   :  { %v4162_v36 = vsel %vm3688_vm4, %v9934_v35, 0.0  ;;  %v4391_v58 = vpop.xlane.xlu0 %4390 }
 0x39c   :  { %v4392_v6 = vsub.f32 %v9894_v51, %v4391_v58 }
 0x39e   :  { %v4393_v7 = vmul.f32 1.442695, %v4392_v6 }
 0x3a2   :  { %v9938_v37 = vpop.eup %8263 }
 0x3a3   :  { %v4276_v63 = vsel %vm3688_vm4, %v9938_v37, 0.0 }
 0x3a5   :  { %3819 = vrot.lane.b32.xlu1 %v6828_v28, %s8328_s13 }
 0x3c9   :  { %4163 = vadd.xlane.f32.xlu1 %v4162_v36 }
 0x3cd   :  { %4277 = vadd.xlane.f32.xlu1 %v4276_v63  ;;  %v3939_v63 = vsel %vm3704_vm1, %v3876_v24, 0 }
 0x3d1   :  { %v3697_v44 = vpop.xlane.xlu1 %3696  ;;  %v4731_v40 = vpop.f32.mrb[60].mxu0 }
 0x3d2   :  { %8265 = vrcp.f32 %v3697_v44  ;;  %v9943_v42 = vadd.f32 %v4731_v40, %v9841_v56  ;;  %v7349_v43 = vpop.f32.mrb[61].mxu0 }
 0x3d3   :  { %v4734_v45 = vpop.f32.mrb[62].mxu0  ;;  %8267 = vpow2.f32 %v4393_v7 }
 0x3d4   :  { %v7350_v47 = vpop.f32.mrb[63].mxu0  ;;  %v4737_v5 = vsel %vm3688_vm4, %v9943_v42, -inf }
 0x3d5   :  { %4738 = vmax.xlane.f32.xlu0 %v4737_v5 }
 0x3d9   :  { %v4850_v38 = vpop.f32.mrb[64].mxu0  ;;  %v3812_v48 = vpop.xlane.xlu1 %3811 }
 0x3da   :  { %v7361_v49 = vpop.f32.mrb[65].mxu0  ;;  %v9975_v10 = vadd.f32 %v4850_v38, %v9841_v56 }
 0x3db   :  { %v4853_v50 = vpop.f32.mrb[66].mxu0 }
 0x3dc   :  { %v8266_v52 = vpop.eup %8265  ;;  %v7362_v53 = vpop.f32.mrb[67].mxu0  ;;  %v4856_v16 = vsel %vm3688_vm4, %v9975_v10, -inf }
 0x3dd   :  { %v3699_v55 = vmul.f32 %v8266_v52, %v9901_v1  ;;  %v9985_v20 = vpop.eup %8267 }
 0x3de   :  { %4285 = vrot.lane.b32.xlu1 %v6842_v54, %s8328_s13  ;;  %v4395_v21 = vsel %vm3688_vm4, %v9985_v20, 0.0  ;;  %v4172_v54 = vsel %vm3704_vm1, %v9947_v39, 0 }
 0x3df   :  { %v3700_v59 = vpack.c.bf16 %v3699_v55, %v3699_v55 }
 0x3e1   :  { %7246 = vmatmul.mubr.msk.bf16.vlgmr.msra.gmra.mrb[24].mxu1 %vm3688_vm4, %v3700_v59  ;;  %v4964_v60 = vpop.f32.mrb[68].mxu0  ;;  %v3931_v28 = vpop.xlane.xlu1 %3930 }
 0x3e2   :  { %4518 = vrot.lane.b32.xlu1 %v6849_v57, %s8328_s13  ;;  %v7373_v61 = vpop.f32.mrb[69].mxu0  ;;  %7257 = vmatprep.mubr.msk.bf16.mxu1 %vm8327_vm0, %v8326_v15  ;;  %v9978_v12 = vadd.f32 %v4964_v60, %v9841_v56 }
 0x3e3   :  { %v4967_v0 = vpop.f32.mrb[70].mxu0 }
 0x3e4   :  { %v7374_v1 = vpop.f32.mrb[71].mxu0  ;;  %v4970_v18 = vsel %vm3688_vm4, %v9978_v12, -inf }
 0x3e6   :  { %4752 = vrot.lane.b32.xlu1 %v6856_v62, %s8328_s13  ;;  %v4405_v62 = vsel %vm3704_vm1, %v9949_v41, 0 }
 0x3ea   :  { %4985 = vrot.lane.b32.xlu1 %v6863_v27, %s8328_s13 }
 0x3eb   :  { %4052 = vrot.lane.b32.xlu0 %v6835_v32, %s8328_s13 }
 0x403   :  { %v4505_v3 = vpop.xlane.xlu0 %4504 }
 0x404   :  { %v4506_v9 = vsub.f32 %v9915_v8, %v4505_v3 }
 0x406   :  { %v4507_v11 = vmul.f32 1.442695, %v4506_v9 }
 0x408   :  { %8269 = vpow2.f32 %v4507_v11 }
 0x40a   :  { %4857 = vmax.xlane.f32.xlu0 %v4856_v16 }
 0x40b   :  { %v4625_v17 = vpop.xlane.xlu0 %4624 }
 0x40c   :  { %v4626_v51 = vsub.f32 %v9920_v14, %v4625_v17 }
 0x40e   :  { %v4627_v8 = vmul.f32 1.442695, %v4626_v51  ;;  %4971 = vmax.xlane.f32.xlu0 %v4970_v18 }
 0x410   :  { %8271 = vpow2.f32 %v4627_v8 }
 0x411   :  { %8273 = vrcp.f32 %v3812_v48 }
 0x412   :  { %v9989_v56 = vpop.eup %8269  ;;  %4396 = vadd.xlane.f32.xlu0 %v4395_v21  ;;  %8275 = vrcp.f32 %v3931_v28 }
 0x413   :  { %v4509_v22 = vsel %vm3688_vm4, %v9989_v56, 0.0 }
 0x416   :  { %4510 = vadd.xlane.f32.xlu0 %v4509_v22 }
 0x41a   :  { %v9993_v14 = vpop.eup %8271 }
 0x41b   :  { %v4629_v19 = vsel %vm3688_vm4, %v9993_v14, 0.0  ;;  %v8274_v29 = vpop.eup %8273 }
 0x41c   :  { %4630 = vadd.xlane.f32.xlu0 %v4629_v19  ;;  %v3814_v31 = vmul.f32 %v8274_v29, %v9906_v4  ;;  %v8276_v36 = vpop.eup %8275  ;;  %v4639_v29 = vsel %vm3704_vm1, %v9957_v26, 0 }
 0x41d   :  { %v3933_v44 = vmul.f32 %v8276_v36, %v9910_v46 }
 0x41e   :  { %v3815_v34 = vpack.c.bf16 %v3814_v31, %v3814_v31 }
 0x41f   :  { %v3934_v4 = vpack.c.bf16 %v3933_v44, %v3933_v44  ;;  %v10077_v44 = vld [vmem:[%s10629_s2] ss:$12 sps:$4 sm:$0xff]  }
 0x421   :  { %v4045_v30 = vpop.xlane.xlu1 %4044 }
 0x422   :  { %8277 = vrcp.f32 %v4045_v30 }
 0x425   :  { %v3820_v33 = vpop.permute.xlu1 %3819 }
 0x426   :  { %v3825_v23 = vsel %vm3704_vm1, %v3820_v33, 0 }
 0x427   :  { %7256 = vmatpush3.bf16.msra.mxu1 %v3825_v23 }
 0x428   :  { %7267 = vmatprep.subr.bf16.mxu1 %v8326_v15 }
 0x42a   :  { %7258 = vmatmul.mubr.msk.bf16.vlgmr.msra.gmra.mrb[28].mxu1 %vm3688_vm4, %v3815_v34 }
 0x42b   :  { %7268 = vmatpush3.bf16.msra.mxu1 %v3939_v63  ;;  %7269 = vmatprep.mubr.msk.bf16.mxu1 %vm8327_vm0, %v8326_v15  ;;  %v10072_v63 = vld [vmem:[%s10629_s2 + $0x4] ss:$12 sps:$4 sm:$0xff]  }
 0x42c   :  { %7279 = vmatprep.subr.bf16.mxu1 %v8326_v15  ;;  %v8278_v43 = vpop.eup %8277  ;;  %5533 = vmatprep.subr.bf16.mxu0 %v10072_v63 }
 0x42d   :  { %v4047_v5 = vmul.f32 %v8278_v43, %v9925_v25  ;;  %5534 = vmatpush1.bf16.msra.mxu0 %v10077_v44  ;;  %v10086_v43 = vld [vmem:[%s10629_s2 + $0x18] ss:$12 sps:$4 sm:$0xff]  }
 0x42f   :  { %v4048_v52 = vpack.c.bf16 %v4047_v5, %v4047_v5 }
 0x432   :  { %7270 = vmatmul.mubr.msk.bf16.vlgmr.msra.gmra.mrb[32].mxu1 %vm3688_vm4, %v3934_v4 }
 0x433   :  { %7281 = vmatprep.mubr.msk.bf16.mxu1 %vm8327_vm0, %v8326_v15 }
 0x456   :  { %v4164_v40 = vpop.xlane.xlu1 %4163 }
 0x457   :  { %8279 = vrcp.f32 %v4164_v40 }
 0x45a   :  { %v4278_v38 = vpop.xlane.xlu1 %4277 }
 0x461   :  { %v8280_v53 = vpop.eup %8279 }
 0x462   :  { %v4739_v45 = vpop.xlane.xlu0 %4738  ;;  %v4166_v25 = vmul.f32 %v8280_v53, %v9934_v35  ;;  %v10111_v53 = vld [vmem:[%s10629_s2 + $0x48] ss:$12 sps:$4 sm:$0xff]  }
 0x463   :  { %v4740_v47 = vsub.f32 %v9943_v42, %v4739_v45  ;;  %v4286_v42 = vpop.permute.xlu1 %4285  ;;  %v10091_v45 = vld [vmem:[%s10629_s2 + $0x1c] ss:$12 sps:$4 sm:$0xff]  }
 0x464   :  { %v4167_v57 = vpack.c.bf16 %v4166_v25, %v4166_v25  ;;  %v4291_v61 = vsel %vm3704_vm1, %v4286_v42, 0  ;;  %5535 = vmatprep.subr.bf16.mxu0 %v10091_v45  ;;  %v4872_v25 = vsel %vm3704_vm1, %v9965_v2, 0  ;;  %v10129_v42 = vld [vmem:[%s10629_s2 + $0x64] ss:$12 sps:$4 sm:$0xff]  }
 0x465   :  { %v4741_v49 = vmul.f32 1.442695, %v4740_v47  ;;  %5536 = vmatpush1.bf16.msra.mxu0 %v10086_v43  ;;  %v10141_v2 = vld [vmem:[%s10629_s2 + $0x78] ss:$12 sps:$4 sm:$0xff]  }
 0x466   :  { %v4053_v46 = vpop.permute.xlu0 %4052 }
 0x467   :  { %8281 = vpow2.f32 %v4741_v49  ;;  %v4058_v50 = vsel %vm3704_vm1, %v4053_v46, 0  ;;  %v4519_v16 = vpop.permute.xlu1 %4518  ;;  %v10098_v49 = vld [vmem:[%s10629_s2 + $0x34] ss:$12 sps:$4 sm:$0xff]  }
 0x468   :  { %8283 = vrcp.f32 %v4278_v38  ;;  %7280 = vmatpush3.bf16.msra.mxu1 %v4058_v50  ;;  %v4524_v17 = vsel %vm3704_vm1, %v4519_v16, 0  ;;  %v10104_v50 = vld [vmem:[%s10629_s2 + $0x30] ss:$12 sps:$4 sm:$0xff]   ;;  %5537 = vmatprep.subr.bf16.mxu0 %v10098_v49 }
 0x469   :  { %7291 = vmatprep.subr.bf16.mxu1 %v8326_v15  ;;  %5538 = vmatpush1.bf16.msra.mxu0 %v10104_v50  ;;  %v10254_v16 = vld [vmem:[%s10629_s2 + $0x150] ss:$12 sps:$4 sm:$0xff]  }
 0x46b   :  { %7282 = vmatmul.mubr.msk.bf16.vlgmr.msra.gmra.mrb[36].mxu1 %vm3688_vm4, %v4048_v52  ;;  %v4753_v30 = vpop.permute.xlu1 %4752 }
 0x46c   :  { %7292 = vmatpush3.bf16.msra.mxu1 %v4172_v54  ;;  %7293 = vmatprep.mubr.msk.bf16.mxu1 %vm8327_vm0, %v8326_v15  ;;  %v4758_v31 = vsel %vm3704_vm1, %v4753_v30, 0  ;;  %v10116_v54 = vld [vmem:[%s10629_s2 + $0x4c] ss:$12 sps:$4 sm:$0xff]   ;;  %v8154_v30 = vld [vmem:[%s10629_s2 + $0xc8] ss:$12 sps:$4 sm:$0xff]  }
 0x46d   :  { %7303 = vmatprep.subr.bf16.mxu1 %v8326_v15  ;;  %5539 = vmatprep.subr.bf16.mxu0 %v10116_v54 }
 0x46e   :  { %5540 = vmatpush1.bf16.msra.mxu0 %v10111_v53 }
 0x46f   :  { %5541 = vmatprep.subr.bf16.mxu0 %v10129_v42 }
 0x471   :  { %v10020_v55 = vpop.eup %8281 }
 0x472   :  { %v8284_v59 = vpop.eup %8283  ;;  %v4743_v60 = vsel %vm3688_vm4, %v10020_v55, 0.0 }
 0x473   :  { %4744 = vadd.xlane.f32.xlu0 %v4743_v60  ;;  %7294 = vmatmul.mubr.msk.bf16.vlgmr.msra.gmra.mrb[40].mxu1 %vm3688_vm4, %v4167_v57  ;;  %v4280_v35 = vmul.f32 %v8284_v59, %v9938_v37  ;;  %v10146_v57 = vld [vmem:[%s10629_s2 + $0x7c] ss:$12 sps:$4 sm:$0xff]   ;;  %v10151_v59 = vld [vmem:[%s10629_s2 + $0x94] ss:$12 sps:$4 sm:$0xff]  }
 0x474   :  { %7304 = vmatpush3.bf16.msra.mxu1 %v4291_v61  ;;  %7305 = vmatprep.mubr.msk.bf16.mxu1 %vm8327_vm0, %v8326_v15  ;;  %v10158_v60 = vld [vmem:[%s10629_s2 + $0x90] ss:$12 sps:$4 sm:$0xff]   ;;  %v10164_v61 = vld [vmem:[%s10629_s2 + $0xac] ss:$12 sps:$4 sm:$0xff]  }
 0x475   :  { %7315 = vmatprep.subr.bf16.mxu1 %v8326_v15  ;;  %v4281_v39 = vpack.c.bf16 %v4280_v35, %v4280_v35  ;;  %v10170_v35 = vld [vmem:[%s10629_s2 + $0xa8] ss:$12 sps:$4 sm:$0xff]  }
 0x47b   :  { %7306 = vmatmul.mubr.msk.bf16.vlgmr.msra.gmra.mrb[44].mxu1 %vm3688_vm4, %v4281_v39  ;;  %v10176_v39 = vld [vmem:[%s10629_s2 + $0xc4] ss:$12 sps:$4 sm:$0xff]  }
 0x47c   :  { %7316 = vmatpush3.bf16.msra.mxu1 %v4405_v62  ;;  %7317 = vmatprep.mubr.msk.bf16.mxu1 %vm8327_vm0, %v8326_v15  ;;  %v10182_v62 = vld [vmem:[%s10629_s2 + $0xc0] ss:$12 sps:$4 sm:$0xff]  }
 0x47d   :  { %7327 = vmatprep.subr.bf16.mxu1 %v8326_v15 }
 0x497   :  { %v4858_v0 = vpop.xlane.xlu0 %4857 }
 0x498   :  { %v4859_v1 = vsub.f32 %v9975_v10, %v4858_v0  ;;  %v10188_v0 = vld [vmem:[%s10629_s2 + $0xdc] ss:$12 sps:$4 sm:$0xff]  }
 0x49a   :  { %v4860_v24 = vmul.f32 1.442695, %v4859_v1  ;;  %v10194_v1 = vld [vmem:[%s10629_s2 + $0xd8] ss:$12 sps:$4 sm:$0xff]  }
 0x49b   :  { %v4972_v27 = vpop.xlane.xlu0 %4971 }
 0x49c   :  { %8285 = vpow2.f32 %v4860_v24  ;;  %v4973_v37 = vsub.f32 %v9978_v12, %v4972_v27  ;;  %v10200_v24 = vld [vmem:[%s10629_s2 + $0xf4] ss:$12 sps:$4 sm:$0xff]   ;;  %v10206_v27 = vld [vmem:[%s10629_s2 + $0xf0] ss:$12 sps:$4 sm:$0xff]  }
 0x49e   :  { %v4974_v32 = vmul.f32 1.442695, %v4973_v37  ;;  %v10212_v37 = vld [vmem:[%s10629_s2 + $0x10c] ss:$12 sps:$4 sm:$0xff]  }
 0x49f   :  { %v4397_v58 = vpop.xlane.xlu0 %4396 }
 0x4a0   :  { %8287 = vpow2.f32 %v4974_v32  ;;  %v10218_v32 = vld [vmem:[%s10629_s2 + $0x108] ss:$12 sps:$4 sm:$0xff]  }
 0x4a1   :  { %8289 = vrcp.f32 %v4397_v58  ;;  %v10224_v58 = vld [vmem:[%s10629_s2 + $0x124] ss:$12 sps:$4 sm:$0xff]  }
 0x4a3   :  { %v4511_v41 = vpop.xlane.xlu0 %4510 }
 0x4a4   :  { %8291 = vrcp.f32 %v4511_v41  ;;  %v10230_v41 = vld [vmem:[%s10629_s2 + $0x120] ss:$12 sps:$4 sm:$0xff]  }
 0x4a6   :  { %v10038_v6 = vpop.eup %8285 }
 0x4a7   :  { %v4862_v7 = vsel %vm3688_vm4, %v10038_v6, 0.0 }
 0x4a8   :  { %4863 = vadd.xlane.f32.xlu0 %v4862_v7 }
 0x4a9   :  { %v4631_v9 = vpop.xlane.xlu0 %4630 }
 0x4aa   :  { %v10042_v3 = vpop.eup %8287  ;;  %8293 = vrcp.f32 %v4631_v9  ;;  %v10237_v9 = vld [vmem:[%s10629_s2 + $0x13c] ss:$12 sps:$4 sm:$0xff]  }
 0x4ab   :  { %v8290_v10 = vpop.eup %8289  ;;  %v4976_v11 = vsel %vm3688_vm4, %v10042_v3, 0.0 }
 0x4ac   :  { %v4399_v12 = vmul.f32 %v8290_v10, %v9985_v20  ;;  %4977 = vadd.xlane.f32.xlu0 %v4976_v11  ;;  %v10242_v10 = vld [vmem:[%s10629_s2 + $0x138] ss:$12 sps:$4 sm:$0xff]  }
 0x4ae   :  { %v4400_v51 = vpack.c.bf16 %v4399_v12, %v4399_v12  ;;  %v8292_v18 = vpop.eup %8291  ;;  %v10248_v12 = vld [vmem:[%s10629_s2 + $0x154] ss:$12 sps:$4 sm:$0xff]  }
 0x4af   :  { %v4513_v8 = vmul.f32 %v8292_v18, %v9989_v56  ;;  %v10266_v18 = vld [vmem:[%s10629_s2 + $0x168] ss:$12 sps:$4 sm:$0xff]  }
 0x4b0   :  { %7318 = vmatmul.mubr.msk.bf16.vlgmr.msra.gmra.mrb[48].mxu1 %vm3688_vm4, %v4400_v51 }
 0x4b1   :  { %7328 = vmatpush3.bf16.msra.mxu1 %v4524_v17  ;;  %7329 = vmatprep.mubr.msk.bf16.mxu1 %vm8327_vm0, %v8326_v15  ;;  %v4514_v22 = vpack.c.bf16 %v4513_v8, %v4513_v8  ;;  %v10260_v17 = vld [vmem:[%s10629_s2 + $0x16c] ss:$12 sps:$4 sm:$0xff]  }
 0x4b2   :  { %7339 = vmatprep.subr.bf16.mxu1 %v8326_v15 }
 0x4b4   :  { %v10053_v21 = vpop.f32.mrb[24].mxu1  ;;  %v8294_v19 = vpop.eup %8293 }
 0x4b5   :  { %v7247_v20 = vpop.f32.mrb[25].mxu1  ;;  %v4633_v56 = vmul.f32 %v8294_v19, %v9993_v14 }
 0x4b6   :  { %v3745_v48 = vpop.f32.mrb[26].mxu1 }
 0x4b7   :  { %v7248_v28 = vpop.f32.mrb[27].mxu1  ;;  %v4634_v33 = vpack.c.bf16 %v4633_v56, %v4633_v56 }
 0x4b8   :  { %7330 = vmatmul.mubr.msk.bf16.vlgmr.msra.gmra.mrb[52].mxu1 %vm3688_vm4, %v4514_v22 }
 0x4b9   :  { %7340 = vmatpush3.bf16.msra.mxu1 %v4639_v29  ;;  %7341 = vmatprep.mubr.msk.bf16.mxu1 %vm8327_vm0, %v8326_v15  ;;  %v4986_v29 = vpop.permute.xlu1 %4985 }
 0x4ba   :  { %7351 = vmatprep.subr.bf16.mxu1 %v8326_v15 }
 0x4c0   :  { %7342 = vmatmul.mubr.msk.bf16.vlgmr.msra.gmra.mrb[56].mxu1 %vm3688_vm4, %v4634_v33 }
 0x4c1   :  { %7352 = vmatpush3.bf16.msra.mxu1 %v4758_v31  ;;  %7353 = vmatprep.mubr.msk.bf16.mxu1 %vm8327_vm0, %v8326_v15  ;;  %v10279_v31 = vld [vmem:[%s10629_s2 + $0x184] ss:$12 sps:$4 sm:$0xff]  }
 0x4c2   :  { %7363 = vmatprep.subr.bf16.mxu1 %v8326_v15 }
 0x4fd   :  { %v10067_v26 = vpop.f32.mrb[28].mxu1 }
 0x4fe   :  { %v7259_v23 = vpop.f32.mrb[29].mxu1 }
 0x4ff   :  { %v3864_v34 = vpop.f32.mrb[30].mxu1 }
 0x500   :  { %v7260_v36 = vpop.f32.mrb[31].mxu1  ;;  %v4745_v14 = vpop.xlane.xlu0 %4744 }
 0x501   :  { %8295 = vrcp.f32 %v4745_v14 }
 0x505   :  { %v10079_v4 = vpop.f32.mrb[32].mxu1 }
 0x506   :  { %v7271_v40 = vpop.f32.mrb[33].mxu1 }
 0x507   :  { %v3978_v47 = vpop.f32.mrb[34].mxu1  ;;  %v8155_v40 = vld [vmem:[%s10629_s2 + $0x8] ss:$12 sps:$4 sm:$0xff]  }
 0x508   :  { %v7272_v5 = vpop.f32.mrb[35].mxu1 }
 0x509   :  { %v8159_v5 = vld [vmem:[%s10629_s2 + $0xe0] ss:$12 sps:$4 sm:$0xff]  }
 0x50b   :  { %v8296_v38 = vpop.eup %8295 }
 0x50c   :  { %v4747_v46 = vmul.f32 %v8296_v38, %v10020_v55  ;;  %v10134_v55 = vld [vmem:[%s10629_s2 + $0x60] ss:$12 sps:$4 sm:$0xff]  }
 0x50d   :  { %5542 = vmatpush1.bf16.msra.mxu0 %v10134_v55 }
 0x50e   :  { %v4748_v52 = vpack.c.bf16 %v4747_v46, %v4747_v46  ;;  %5543 = vmatprep.subr.bf16.mxu0 %v10146_v57 }
 0x510   :  { %7354 = vmatmul.mubr.msk.bf16.vlgmr.msra.gmra.mrb[60].mxu1 %vm3688_vm4, %v4748_v52  ;;  %v8164_v52 = vld [vmem:[%s10629_s2 + $0xf8] ss:$12 sps:$4 sm:$0xff]  }
 0x511   :  { %7364 = vmatpush3.bf16.msra.mxu1 %v4872_v25  ;;  %7365 = vmatprep.mubr.msk.bf16.mxu1 %vm8327_vm0, %v8326_v15 }
 0x512   :  { %7375 = vmatprep.subr.bf16.mxu1 %v8326_v15  ;;  %5544 = vmatpush1.bf16.msra.mxu0 %v10141_v2 }
 0x513   :  { %5545 = vmatprep.subr.bf16.mxu0 %v10151_v59 }
 0x516   :  { %5546 = vmatpush1.bf16.msra.mxu0 %v10158_v60 }
 0x517   :  { %5547 = vmatprep.subr.bf16.mxu0 %v10164_v61 }
 0x51a   :  { %5548 = vmatpush1.bf16.msra.mxu0 %v10170_v35 }
 0x51b   :  { %5549 = vmatprep.subr.bf16.mxu0 %v10176_v39 }
 0x51e   :  { %5550 = vmatpush1.bf16.msra.mxu0 %v10182_v62 }
 0x51f   :  { %5551 = vmatprep.subr.bf16.mxu0 %v10188_v0 }
 0x522   :  { %5552 = vmatpush1.bf16.msra.mxu0 %v10194_v1 }
 0x523   :  { %5553 = vmatprep.subr.bf16.mxu0 %v10200_v24 }
 0x526   :  { %5554 = vmatpush1.bf16.msra.mxu0 %v10206_v27 }
 0x527   :  { %5555 = vmatprep.subr.bf16.mxu0 %v10212_v37 }
 0x52a   :  { %5556 = vmatpush1.bf16.msra.mxu0 %v10218_v32 }
 0x52b   :  { %5557 = vmatprep.subr.bf16.mxu0 %v10224_v58 }
 0x52e   :  { %5558 = vmatpush1.bf16.msra.mxu0 %v10230_v41 }
 0x52f   :  { %5559 = vmatprep.subr.bf16.mxu0 %v10237_v9 }
 0x532   :  { %5560 = vmatpush1.bf16.msra.mxu0 %v10242_v10 }
 0x533   :  { %5561 = vmatprep.subr.bf16.mxu0 %v10248_v12 }
 0x535   :  { %v4864_v7 = vpop.xlane.xlu0 %4863 }
 0x536   :  { %8297 = vrcp.f32 %v4864_v7  ;;  %5562 = vmatpush1.bf16.msra.mxu0 %v10254_v16 }
 0x537   :  { %5563 = vmatprep.subr.bf16.mxu0 %v10260_v17 }
 0x539   :  { %v4978_v11 = vpop.xlane.xlu0 %4977 }
 0x53a   :  { %8299 = vrcp.f32 %v4978_v11  ;;  %5564 = vmatpush1.bf16.msra.mxu0 %v10266_v18  ;;  %v8165_v11 = vld [vmem:[%s10629_s2 + $0x38] ss:$12 sps:$4 sm:$0xff]  }
 0x53b   :  { %5574 = vmatprep.subr.bf16.mxu0 %v10279_v31 }
 0x53e   :  { %v4094_v51 = vpop.f32.mrb[36].mxu1 }
 0x53f   :  { %v7469_v8 = vpack.i.bf16 %v4094_v51, %v10067_v26  ;;  %v7283_v20 = vpop.f32.mrb[37].mxu1  ;;  %v4991_v26 = vsel %vm3704_vm1, %v4986_v29, 0  ;;  %v8169_v51 = vld [vmem:[%s10629_s2 + $0x110] ss:$12 sps:$4 sm:$0xff]   ;;  %v8185_v29 = vld [vmem:[%s10629_s2 + $0x98] ss:$12 sps:$4 sm:$0xff]  }
 0x540   :  { %v8298_v48 = vpop.eup %8297  ;;  %v4097_v22 = vpop.f32.mrb[38].mxu1  ;;  %v8174_v20 = vld [vmem:[%s10629_s2 + $0x128] ss:$12 sps:$4 sm:$0xff]  }
 0x541   :  { %v4866_v19 = vmul.f32 %v8298_v48, %v10038_v6  ;;  %v7284_v28 = vpop.f32.mrb[39].mxu1  ;;  %7470 = vrot.lane.b32.xlu0 %v7469_v8, %s8328_s13  ;;  %v8170_v8 = vld [vmem:[%s10629_s2 + $0x50] ss:$12 sps:$4 sm:$0xff]   ;;  %v8175_v48 = vld [vmem:[%s10629_s2 + $0x68] ss:$12 sps:$4 sm:$0xff]  }
 0x542   :  { %v8179_v22 = vld [vmem:[%s10629_s2 + $0x140] ss:$12 sps:$4 sm:$0xff]   ;;  %v8184_v28 = vld [vmem:[%s10629_s2 + $0x158] ss:$12 sps:$4 sm:$0xff]  }
 0x543   :  { %v4867_v56 = vpack.c.bf16 %v4866_v19, %v4866_v19  ;;  %v8180_v19 = vld [vmem:[%s10629_s2 + $0x80] ss:$12 sps:$4 sm:$0xff]  }
 0x544   :  { %v8300_v33 = vpop.eup %8299 }
 0x545   :  { %7366 = vmatmul.mubr.msk.bf16.vlgmr.msra.gmra.mrb[64].mxu1 %vm3688_vm4, %v4867_v56  ;;  %v4980_v23 = vmul.f32 %v8300_v33, %v10042_v3  ;;  %v8160_v3 = vld [vmem:[%s10629_s2 + $0x20] ss:$12 sps:$4 sm:$0xff]   ;;  %v8189_v56 = vld [vmem:[%s10629_s2 + $0x170] ss:$12 sps:$4 sm:$0xff]  }
 0x546   :  { %7376 = vmatpush3.bf16.msra.mxu1 %v4991_v26  ;;  %v10284_v6 = vpop.f32.mrb[40].mxu1  ;;  %7377 = vmatprep.mubr.msk.bf16.mxu1 %vm8327_vm0, %v8326_v15 }
 0x547   :  { %v7295_v34 = vpop.f32.mrb[41].mxu1  ;;  %7135 = vmatprep.subr.bf16.mxu1 %v8154_v30  ;;  %v4981_v47 = vpack.c.bf16 %v4980_v23, %v4980_v23  ;;  %v8190_v30 = vld [vmem:[%s10629_s2 + $0xb0] ss:$12 sps:$4 sm:$0xff]  }
 0x548   :  { %v4211_v36 = vpop.f32.mrb[42].mxu1 }
 0x549   :  { %v7296_v14 = vpop.f32.mrb[43].mxu1 }
 0x54d   :  { %7378 = vmatmul.mubr.msk.bf16.vlgmr.msra.gmra.mrb[68].mxu1 %vm3688_vm4, %v4981_v47 }
 0x54e   :  { %v4327_v38 = vpop.f32.mrb[44].mxu1  ;;  %7136 = vmatpush3.bf16.msra.mxu1 %v8155_v40 }
 0x54f   :  { %4334 = vrot.lane.b32.xlu1 %v4327_v38, %s8328_s13  ;;  %v7307_v46 = vpop.f32.mrb[45].mxu1  ;;  %7137 = vmatprep.subr.bf16.mxu1 %v8159_v5 }
 0x550   :  { %v4330_v25 = vpop.f32.mrb[46].mxu1 }
 0x551   :  { %v7308_v7 = vpop.f32.mrb[47].mxu1 }
 0x552   :  { %7138 = vmatpush3.bf16.msra.mxu1 %v8160_v3 }
 0x553   :  { %7139 = vmatprep.subr.bf16.mxu1 %v8164_v52 }
 0x556   :  { %7140 = vmatpush3.bf16.msra.mxu1 %v8165_v11 }
 0x557   :  { %7141 = vmatprep.subr.bf16.mxu1 %v8169_v51 }
 0x55a   :  { %7142 = vmatpush3.bf16.msra.mxu1 %v8170_v8 }
 0x55b   :  { %7143 = vmatprep.subr.bf16.mxu1 %v8174_v20 }
 0x55e   :  { %7144 = vmatpush3.bf16.msra.mxu1 %v8175_v48 }
 0x55f   :  { %7145 = vmatprep.subr.bf16.mxu1 %v8179_v22 }
 0x562   :  { %7146 = vmatpush3.bf16.msra.mxu1 %v8180_v19 }
 0x563   :  { %7147 = vmatprep.subr.bf16.mxu1 %v8184_v28 }
 0x566   :  { %7148 = vmatpush3.bf16.msra.mxu1 %v8185_v29  ;;  %v10350_v29 = vld [vmem:[%s10629_s2 + $0x180] ss:$12 sps:$4 sm:$0xff]  }
 0x567   :  { %7149 = vmatprep.subr.bf16.mxu1 %v8189_v56  ;;  %v10360_v56 = vld [vmem:[%s10629_s2 + $0x19c] ss:$12 sps:$4 sm:$0xff]  }
 0x56a   :  { %7150 = vmatpush3.bf16.msra.mxu1 %v8190_v30 }
 0x56b   :  { %7381 = vmatprep.subr.bf16.mxu1 %v8326_v15 }
 0x583   :  { %v10337_v33 = vpop.f32.mrb[48].mxu1 }
 0x584   :  { %v7319_v26 = vpop.f32.mrb[49].mxu1 }
 0x585   :  { %v4444_v23 = vpop.f32.mrb[50].mxu1  ;;  %v10366_v26 = vld [vmem:[%s10629_s2 + $0x198] ss:$12 sps:$4 sm:$0xff]  }
 0x586   :  { %v7320_v34 = vpop.f32.mrb[51].mxu1  ;;  %v10376_v23 = vld [vmem:[%s10629_s2 + $0x1b4] ss:$12 sps:$4 sm:$0xff]  }
 0x587   :  { %v10385_v34 = vld [vmem:[%s10629_s2 + $0x1b0] ss:$12 sps:$4 sm:$0xff]  }
 0x58b   :  { %v10339_v36 = vpop.f32.mrb[52].mxu1 }
 0x58c   :  { %v7331_v14 = vpop.f32.mrb[53].mxu1 }
 0x58d   :  { %v4563_v40 = vpop.f32.mrb[54].mxu1  ;;  %v8204_v14 = vld [vmem:[%s10629_s2 + $0x1b8] ss:$12 sps:$4 sm:$0xff]  }
 0x58e   :  { %v7332_v47 = vpop.f32.mrb[55].mxu1  ;;  %v10395_v40 = vld [vmem:[%s10629_s2 + $0x1cc] ss:$12 sps:$4 sm:$0xff]  }
 0x58f   :  { %v10401_v47 = vld [vmem:[%s10629_s2 + $0x1c8] ss:$12 sps:$4 sm:$0xff]  }
 0x593   :  { %v10341_v5 = vpop.f32.mrb[56].mxu1 }
 0x594   :  { %v7343_v38 = vpop.f32.mrb[57].mxu1 }
 0x595   :  { %v4678_v3 = vpop.f32.mrb[58].mxu1  ;;  %v8208_v38 = vld [vmem:[%s10629_s2 + $0x1d0] ss:$12 sps:$4 sm:$0xff]  }
 0x596   :  { %v7344_v46 = vpop.f32.mrb[59].mxu1  ;;  %v10411_v3 = vld [vmem:[%s10629_s2 + $0x1e4] ss:$12 sps:$4 sm:$0xff]  }
 0x597   :  { %v10417_v46 = vld [vmem:[%s10629_s2 + $0x1e0] ss:$12 sps:$4 sm:$0xff]  }
 0x5b3   :  { %v7471_v52 = vpop.permute.xlu0 %7470 }
 0x5b4   :  { %v7473_v25 = vunpack.i.h.bf16 %v7471_v52  ;;  %v7472_v7 = vunpack.i.l.bf16 %v7471_v52  ;;  %v8212_v52 = vld [vmem:[%s10629_s2 + $0x1e8] ss:$12 sps:$4 sm:$0xff]  }
 0x5b6   :  { %v4104_v11 = vsel %vm3641_vm2, %v10079_v4, %v7473_v25  ;;  %v3871_v51 = vsel %vm3641_vm2, %v10053_v21, %v7472_v7  ;;  %v8196_v4 = vld [vmem:[%s10629_s2 + $0x188] ss:$12 sps:$4 sm:$0xff]   ;;  %v10433_v7 = vld [vmem:[%s10629_s2 + $0x1f8] ss:$12 sps:$4 sm:$0xff]  }
 0x5b7   :  { %v4105_v8 = vpack.c.bf16 %v4104_v11, %v4104_v11  ;;  %v3872_v20 = vpack.c.bf16 %v3871_v51, %v3871_v51  ;;  %v10427_v25 = vld [vmem:[%s10629_s2 + $0x1fc] ss:$12 sps:$4 sm:$0xff]   ;;  %v8216_v11 = vld [vmem:[%s10629_s2 + $0x200] ss:$12 sps:$4 sm:$0xff]  }
 0x5b8   :  { %v10443_v51 = vld [vmem:[%s10629_s2 + $0x214] ss:$12 sps:$4 sm:$0xff]  }
 0x5b9   :  { %4106 = vst [vmem:[#allocation3 + $0x4] sm:$0xf] %v4105_v8  ;;  %3873 = vst [vmem:[#allocation3] sm:$0xf] %v3872_v20  ;;  %v10449_v8 = vld [vmem:[%s10629_s2 + $0x210] ss:$12 sps:$4 sm:$0xff]  }
 0x5ba   :  { %v8220_v20 = vld [vmem:[%s10629_s2 + $0x218] ss:$12 sps:$4 sm:$0xff]  }
 0x5c0   :  { %v5040_v48 = vld [vmem:[#allocation3] sm:$0xff] }
 0x5c1   :  { %v4335_v22 = vpop.permute.xlu1 %4334  ;;  %v6865_v19 = vcombine.low %v5040_v48, %v5040_v48  ;;  %v6866_v28 = vcombine.high %v5040_v48, %v5040_v48  ;;  %v10459_v48 = vld [vmem:[%s10629_s2 + $0x22c] ss:$12 sps:$4 sm:$0xff]  }
 0x5c2   :  { %v4337_v21 = vsel %vm3641_vm2, %v10284_v6, %v4335_v22  ;;  %v8200_v6 = vld [vmem:[%s10629_s2 + $0x1a0] ss:$12 sps:$4 sm:$0xff]   ;;  %v10465_v22 = vld [vmem:[%s10629_s2 + $0x228] ss:$12 sps:$4 sm:$0xff]  }
 0x5c3   :  { %v4338_v30 = vpack.c.bf16 %v4337_v21, %v4337_v21  ;;  %5565 = vmatprep.mubr.bf16.mxu0 %v6866_v28  ;;  %5647 = vmatprep.mubr.bf16.mxu1 %v6866_v28  ;;  %v8226_v28 = vld [vmem:[%s10629_s2 + $0xc8] ss:$12 sps:$4 sm:$0xff]  }
 0x5c4   :  { %5566 = vmatmul.mubr.bf16.vlgmr.msra.gmra.mrb[72].mxu0 %v6865_v19  ;;  %5648 = vmatmul.mubr.bf16.vlgmr.msra.gmra.mrb[72].mxu1 %v6865_v19  ;;  %v8224_v19 = vld [vmem:[%s10629_s2 + $0x230] ss:$12 sps:$4 sm:$0xff]  }
 0x5c5   :  { %4339 = vst [vmem:[#allocation3 + $0x8] sm:$0xf] %v4338_v30  ;;  %5575 = vmatpush1.bf16.msra.mxu0 %v10350_v29  ;;  %7382 = vmatpush3.bf16.msra.mxu1 %v8196_v4  ;;  %v8227_v4 = vld [vmem:[%s10629_s2 + $0x8] ss:$12 sps:$4 sm:$0xff]  }
 0x5c6   :  { %5576 = vmatprep.subr.bf16.mxu0 %v10360_v56  ;;  %7383 = vmatprep.subr.bf16.mxu1 %v8326_v15 }
 0x5c7   :  { %5606 = vmatprep.mubr.bf16.mxu0 %v8325_v13  ;;  %7397 = vmatprep.mubr.msk.bf16.mxu1 %vm8327_vm0, %v8326_v15 }
 0x5c9   :  { %5577 = vmatpush1.bf16.msra.mxu0 %v10366_v26  ;;  %7384 = vmatpush3.bf16.msra.mxu1 %v8200_v6  ;;  %v8228_v6 = vld [vmem:[%s10629_s2 + $0xe0] ss:$12 sps:$4 sm:$0xff]  }
 0x5ca   :  { %5578 = vmatprep.subr.bf16.mxu0 %v10376_v23  ;;  %7385 = vmatprep.subr.bf16.mxu1 %v8326_v15 }
 0x5cc   :  { %v8225_v21 = vld [vmem:[#allocation3 + $0x8] ss:$0 sps:$4 sm:$0xff]  }
 0x5cd   :  { %5579 = vmatpush1.bf16.msra.mxu0 %v10385_v34  ;;  %7386 = vmatpush3.bf16.msra.mxu1 %v8204_v14 }
 0x5ce   :  { %5580 = vmatprep.subr.bf16.mxu0 %v10395_v40  ;;  %7387 = vmatprep.subr.bf16.mxu1 %v8326_v15 }
 0x5d1   :  { %5581 = vmatpush1.bf16.msra.mxu0 %v10401_v47  ;;  %7388 = vmatpush3.bf16.msra.mxu1 %v8208_v38 }
 0x5d2   :  { %5582 = vmatprep.subr.bf16.mxu0 %v10411_v3  ;;  %7389 = vmatprep.subr.bf16.mxu1 %v8326_v15 }
 0x5d5   :  { %5583 = vmatpush1.bf16.msra.mxu0 %v10417_v46  ;;  %7390 = vmatpush3.bf16.msra.mxu1 %v8212_v52 }
 0x5d6   :  { %5584 = vmatprep.subr.bf16.mxu0 %v10427_v25  ;;  %7391 = vmatprep.subr.bf16.mxu1 %v8326_v15 }
 0x5d9   :  { %5585 = vmatpush1.bf16.msra.mxu0 %v10433_v7  ;;  %7392 = vmatpush3.bf16.msra.mxu1 %v8216_v11  ;;  %v8229_v11 = vld [vmem:[%s10629_s2 + $0x20] ss:$12 sps:$4 sm:$0xff]  }
 0x5da   :  { %5586 = vmatprep.subr.bf16.mxu0 %v10443_v51  ;;  %7393 = vmatprep.subr.bf16.mxu1 %v8326_v15 }
 0x5dd   :  { %5587 = vmatpush1.bf16.msra.mxu0 %v10449_v8  ;;  %7394 = vmatpush3.bf16.msra.mxu1 %v8220_v20  ;;  %v8232_v20 = vld [vmem:[%s10629_s2 + $0x110] ss:$12 sps:$4 sm:$0xff]  }
 0x5de   :  { %5588 = vmatprep.subr.bf16.mxu0 %v10459_v48  ;;  %7395 = vmatprep.subr.bf16.mxu1 %v8326_v15 }
 0x5e1   :  { %5589 = vmatpush1.bf16.msra.mxu0 %v10465_v22  ;;  %7396 = vmatpush3.bf16.msra.mxu1 %v8224_v19 }
 0x5e2   :  { %6191 = vmatprep.subr.bf16.mxu1 %v10072_v63  ;;  %7166 = vmatprep.subr.bf16.mxu0 %v8226_v28 }
 0x5e3   :  { %v4794_v30 = vpop.f32.mrb[60].mxu1 }
 0x5e4   :  { %v7474_v14 = vpack.i.bf16 %v4794_v30, %v10339_v36  ;;  %5607 = vmatmul.mubr.bf16.vlgmr.msra.gmra.mrb[72].mxu0 %v8225_v21  ;;  %7398 = vmatmul.mubr.bf16.vlgmr.msra.gmra.mrb[76].mxu1 %v8225_v21  ;;  %v7355_v38 = vpop.f32.mrb[61].mxu1  ;;  %v8230_v36 = vld [vmem:[%s10629_s2 + $0xf8] ss:$12 sps:$4 sm:$0xff]  }
 0x5e5   :  { %v4797_v52 = vpop.f32.mrb[62].mxu1  ;;  %6192 = vmatpush1.bf16.msra.mxu1 %v10077_v44  ;;  %7167 = vmatpush3.bf16.msra.mxu0 %v8227_v4  ;;  %v8231_v44 = vld [vmem:[%s10629_s2 + $0x38] ss:$12 sps:$4 sm:$0xff]  }
 0x5e6   :  { %7475 = vrot.lane.b32.xlu1 %v7474_v14, %s8328_s13  ;;  %v7356_v63 = vpop.f32.mrb[63].mxu1  ;;  %6193 = vmatprep.subr.bf16.mxu1 %v10091_v45  ;;  %v8233_v45 = vld [vmem:[%s10629_s2 + $0x50] ss:$12 sps:$4 sm:$0xff]  }
 0x5e7   :  { %7168 = vmatprep.subr.bf16.mxu0 %v8228_v6 }
 0x5e9   :  { %6194 = vmatpush1.bf16.msra.mxu1 %v10086_v43  ;;  %7169 = vmatpush3.bf16.msra.mxu0 %v8229_v11  ;;  %v8234_v43 = vld [vmem:[%s10629_s2 + $0x128] ss:$12 sps:$4 sm:$0xff]  }
 0x5ea   :  { %6195 = vmatprep.subr.bf16.mxu1 %v10098_v49  ;;  %7170 = vmatprep.subr.bf16.mxu0 %v8230_v36  ;;  %v8235_v49 = vld [vmem:[%s10629_s2 + $0x68] ss:$12 sps:$4 sm:$0xff]  }
 0x5ed   :  { %6196 = vmatpush1.bf16.msra.mxu1 %v10104_v50  ;;  %7171 = vmatpush3.bf16.msra.mxu0 %v8231_v44  ;;  %v8236_v50 = vld [vmem:[%s10629_s2 + $0x140] ss:$12 sps:$4 sm:$0xff]  }
 0x5ee   :  { %6197 = vmatprep.subr.bf16.mxu1 %v10116_v54  ;;  %7172 = vmatprep.subr.bf16.mxu0 %v8232_v20  ;;  %v8237_v54 = vld [vmem:[%s10629_s2 + $0x80] ss:$12 sps:$4 sm:$0xff]  }
 0x5f1   :  { %6198 = vmatpush1.bf16.msra.mxu1 %v10111_v53  ;;  %7173 = vmatpush3.bf16.msra.mxu0 %v8233_v45  ;;  %v8238_v53 = vld [vmem:[%s10629_s2 + $0x158] ss:$12 sps:$4 sm:$0xff]  }
 0x5f2   :  { %6199 = vmatprep.subr.bf16.mxu1 %v10129_v42  ;;  %7174 = vmatprep.subr.bf16.mxu0 %v8234_v43  ;;  %v8239_v42 = vld [vmem:[%s10629_s2 + $0x98] ss:$12 sps:$4 sm:$0xff]  }
 0x5f5   :  { %6200 = vmatpush1.bf16.msra.mxu1 %v10134_v55  ;;  %7175 = vmatpush3.bf16.msra.mxu0 %v8235_v49  ;;  %v8240_v55 = vld [vmem:[%s10629_s2 + $0x170] ss:$12 sps:$4 sm:$0xff]  }
 0x5f6   :  { %6201 = vmatprep.subr.bf16.mxu1 %v10146_v57  ;;  %7176 = vmatprep.subr.bf16.mxu0 %v8236_v50  ;;  %v8241_v57 = vld [vmem:[%s10629_s2 + $0xb0] ss:$12 sps:$4 sm:$0xff]  }
 0x5f9   :  { %6202 = vmatpush1.bf16.msra.mxu1 %v10141_v2  ;;  %7177 = vmatpush3.bf16.msra.mxu0 %v8237_v54 }
 0x5fa   :  { %6203 = vmatprep.subr.bf16.mxu1 %v10151_v59  ;;  %7178 = vmatprep.subr.bf16.mxu0 %v8238_v53 }
 0x5fd   :  { %6204 = vmatpush1.bf16.msra.mxu1 %v10158_v60  ;;  %7179 = vmatpush3.bf16.msra.mxu0 %v8239_v42 }
 0x5fe   :  { %6205 = vmatprep.subr.bf16.mxu1 %v10164_v61  ;;  %7180 = vmatprep.subr.bf16.mxu0 %v8240_v55 }
 0x601   :  { %6206 = vmatpush1.bf16.msra.mxu1 %v10170_v35  ;;  %7181 = vmatpush3.bf16.msra.mxu0 %v8241_v57 }
 0x602   :  { %6207 = vmatprep.subr.bf16.mxu1 %v10176_v39  ;;  %7401 = vmatprep.subr.bf16.mxu0 %v8326_v15 }
 0x605   :  { %6208 = vmatpush1.bf16.msra.mxu1 %v10182_v62 }
 0x606   :  { %6209 = vmatprep.subr.bf16.mxu1 %v10188_v0 }
 0x609   :  { %6210 = vmatpush1.bf16.msra.mxu1 %v10194_v1 }
 0x60a   :  { %6211 = vmatprep.subr.bf16.mxu1 %v10200_v24 }
 0x60d   :  { %6212 = vmatpush1.bf16.msra.mxu1 %v10206_v27 }
 0x60e   :  { %6213 = vmatprep.subr.bf16.mxu1 %v10212_v37 }
 0x611   :  { %6214 = vmatpush1.bf16.msra.mxu1 %v10218_v32 }
 0x612   :  { %6215 = vmatprep.subr.bf16.mxu1 %v10224_v58 }
 0x615   :  { %6216 = vmatpush1.bf16.msra.mxu1 %v10230_v41 }
 0x616   :  { %6217 = vmatprep.subr.bf16.mxu1 %v10237_v9 }
 0x618   :  { %v10551_v2 = vpop.f32.mrb[64].mxu1 }
 0x619   :  { %v7367_v59 = vpop.f32.mrb[65].mxu1  ;;  %6218 = vmatpush1.bf16.msra.mxu1 %v10242_v10 }
 0x61a   :  { %v4911_v60 = vpop.f32.mrb[66].mxu1  ;;  %6219 = vmatprep.subr.bf16.mxu1 %v10248_v12 }
 0x61b   :  { %v7368_v61 = vpop.f32.mrb[67].mxu1 }
 0x61d   :  { %6220 = vmatpush1.bf16.msra.mxu1 %v10254_v16  ;;  %v8244_v16 = vld [vmem:[%s10629_s2 + $0x188] ss:$12 sps:$4 sm:$0xff]  }
 0x61e   :  { %6221 = vmatprep.subr.bf16.mxu1 %v10260_v17  ;;  %v8245_v17 = vld [vmem:[%s10629_s2 + $0x1a0] ss:$12 sps:$4 sm:$0xff]  }
 0x620   :  { %v5027_v35 = vpop.f32.mrb[68].mxu1 }
 0x621   :  { %5034 = vrot.lane.b32.xlu1 %v5027_v35, %s8328_s13  ;;  %v7379_v39 = vpop.f32.mrb[69].mxu1  ;;  %6222 = vmatpush1.bf16.msra.mxu1 %v10266_v18  ;;  %v8246_v18 = vld [vmem:[%s10629_s2 + $0x1b8] ss:$12 sps:$4 sm:$0xff]  }
 0x622   :  { %v5030_v62 = vpop.f32.mrb[70].mxu1  ;;  %6232 = vmatprep.subr.bf16.mxu1 %v10279_v31  ;;  %v8248_v31 = vld [vmem:[%s10629_s2 + $0x1e8] ss:$12 sps:$4 sm:$0xff]  }
 0x623   :  { %v7380_v0 = vpop.f32.mrb[71].mxu1 }
 0x658   :  { %v7476_v1 = vpop.permute.xlu1 %7475 }
 0x659   :  { %v7478_v24 = vunpack.i.h.bf16 %v7476_v1  ;;  %v7477_v27 = vunpack.i.l.bf16 %v7476_v1 }
 0x65b   :  { %v4804_v37 = vsel %vm3641_vm2, %v10341_v5, %v7478_v24  ;;  %v4570_v32 = vsel %vm3641_vm2, %v10337_v33, %v7477_v27  ;;  %v8249_v33 = vld [vmem:[%s10629_s2 + $0x200] ss:$12 sps:$4 sm:$0xff]   ;;  %v8250_v5 = vld [vmem:[%s10629_s2 + $0x218] ss:$12 sps:$4 sm:$0xff]  }
 0x65c   :  { %v4805_v58 = vpack.c.bf16 %v4804_v37, %v4804_v37  ;;  %v4571_v41 = vpack.c.bf16 %v4570_v32, %v4570_v32 }
 0x65e   :  { %4806 = vst [vmem:[#allocation3 + $0x10] sm:$0xf] %v4805_v58  ;;  %4573 = vst [vmem:[#allocation3 + $0xc] sm:$0xf] %v4571_v41 }
 0x665   :  { %v5698_v9 = vld [vmem:[#allocation3 + $0xc] sm:$0xff] }
 0x666   :  { %v6940_v10 = vcombine.low %v5698_v9, %v5698_v9  ;;  %v6941_v12 = vcombine.high %v5698_v9, %v5698_v9 }
 0x668   :  { %6223 = vmatprep.mubr.bf16.mxu1 %v6941_v12  ;;  %6305 = vmatprep.mubr.bf16.mxu0 %v6941_v12 }
 0x669   :  { %6224 = vmatmul.mubr.bf16.vlgmr.msra.gmra.mrb[80].mxu1 %v6940_v10  ;;  %6306 = vmatmul.mubr.bf16.vlgmr.msra.gmra.mrb[76].mxu0 %v6940_v10 }
 0x66a   :  { %6233 = vmatpush1.bf16.msra.mxu1 %v10350_v29  ;;  %7402 = vmatpush3.bf16.msra.mxu0 %v8244_v16  ;;  %v8251_v29 = vld [vmem:[%s10629_s2 + $0x230] ss:$12 sps:$4 sm:$0xff]  }
 0x66b   :  { %6234 = vmatprep.subr.bf16.mxu1 %v10360_v56  ;;  %7403 = vmatprep.subr.bf16.mxu0 %v8326_v15 }
 0x66c   :  { %6264 = vmatprep.mubr.bf16.mxu1 %v8325_v13  ;;  %7417 = vmatprep.mubr.msk.bf16.mxu0 %vm8327_vm0, %v8326_v15  ;;  %v8247_v13 = vld [vmem:[%s10629_s2 + $0x1d0] ss:$12 sps:$4 sm:$0xff]   ;;  %s8330_s2 = smov [#allocation4]  }
 0x66d   :  { %s6362_s15 = sshll.u32 %s8330_s2, 4  ;;  %s6363_s15 = int_to_ptr.vmem [resolvable:$true] %s6362_s15 }
 0x66e   :  { %6235 = vmatpush1.bf16.msra.mxu1 %v10366_v26  ;;  %7404 = vmatpush3.bf16.msra.mxu0 %v8245_v17  ;;  %s8301_s16 = scalar_lea.vmem %s6363_s15, 768  ;;  %p8306_p1 = scmp.lt.s32.totalorder %s6363_s15, %s6363_s15 }
 0x66f   :  { %6236 = vmatprep.subr.bf16.mxu1 %v10376_v23  ;;  %7405 = vmatprep.subr.bf16.mxu0 %v8326_v15  ;;  %p8302_p0 = scmp.ne.s32.totalorder %s6363_s15, %s8301_s16  ;;  %p8307_p2 = scmp.lt.s32.totalorder %s8301_s16, %s8301_s16 }
 0x671   :  { %p8308_p3 = por %p8307_p2, %p8306_p1 }
 0x672   :  { %6237 = vmatpush1.bf16.msra.mxu1 %v10385_v34  ;;  %7406 = vmatpush3.bf16.msra.mxu0 %v8246_v18 }
 0x673   :  { %6238 = vmatprep.subr.bf16.mxu1 %v10395_v40  ;;  %7407 = vmatprep.subr.bf16.mxu0 %v8326_v15  ;;  %p8309_p4 = pnand %p8308_p3, %p8302_p0 }
 0x676   :  { %6239 = vmatpush1.bf16.msra.mxu1 %v10401_v47  ;;  %7408 = vmatpush3.bf16.msra.mxu0 %v8247_v13 }
 0x677   :  { %6240 = vmatprep.subr.bf16.mxu1 %v10411_v3  ;;  %7409 = vmatprep.subr.bf16.mxu0 %v8326_v15 }
 0x67a   :  { %6241 = vmatpush1.bf16.msra.mxu1 %v10417_v46  ;;  %7410 = vmatpush3.bf16.msra.mxu0 %v8248_v31 }
 0x67b   :  { %6242 = vmatprep.subr.bf16.mxu1 %v10427_v25  ;;  %7411 = vmatprep.subr.bf16.mxu0 %v8326_v15 }
 0x67e   :  { %6243 = vmatpush1.bf16.msra.mxu1 %v10433_v7  ;;  %7412 = vmatpush3.bf16.msra.mxu0 %v8249_v33 }
 0x67f   :  { %6244 = vmatprep.subr.bf16.mxu1 %v10443_v51  ;;  %7413 = vmatprep.subr.bf16.mxu0 %v8326_v15 }
 0x682   :  { %6245 = vmatpush1.bf16.msra.mxu1 %v10449_v8  ;;  %7414 = vmatpush3.bf16.msra.mxu0 %v8250_v5 }
 0x683   :  { %6246 = vmatprep.subr.bf16.mxu1 %v10459_v48  ;;  %7415 = vmatprep.subr.bf16.mxu0 %v8326_v15 }
 0x686   :  { %6247 = vmatpush1.bf16.msra.mxu1 %v10465_v22  ;;  %7416 = vmatpush3.bf16.msra.mxu0 %v8251_v29 }
 0x693   :  { %v5035_v56 = vpop.permute.xlu1 %5034 }
 0x694   :  { %v5037_v26 = vsel %vm3641_vm2, %v10551_v2, %v5035_v56 }
 0x695   :  { %v5038_v23 = vpack.c.bf16 %v5037_v26, %v5037_v26 }
 0x697   :  { %5039 = vst [vmem:[#allocation3 + $0x14] sm:$0xf] %v5038_v23  ;;  %v7151_v34 = vpop.f32.mrb[72].mxu1 }
 0x698   :  { %v7152_v40 = vpop.f32.mrb[73].mxu1 }
 0x699   :  { %v7153_v47 = vadd.f32 %v7152_v40, %v7151_v34  ;;  %v7154_v3 = vpop.f32.mrb[74].mxu1 }
 0x69a   :  { %v7155_v46 = vpop.f32.mrb[75].mxu1 }
 0x69e   :  { %v8252_v25 = vld [vmem:[#allocation3 + $0x14] ss:$0 sps:$4 sm:$0xff]  }
 0x69f   :  { %6265 = vmatmul.mubr.bf16.vlgmr.msra.gmra.mrb[80].mxu1 %v8252_v25  ;;  %7418 = vmatmul.mubr.bf16.vlgmr.msra.gmra.mrb[80].mxu0 %v8252_v25 }
 0x6b7   :  { %v5608_v7 = vpop.f32.mrb[72].mxu0  ;;  %v5689_v51 = vpop.f32.mrb[76].mxu1 }
 0x6b8   :  { %5695 = vst [vmem:[#allocation4] sm:$0xff] %v5608_v7  ;;  %v5690_v15 = vadd.f32 %v7153_v47, %v5689_v51  ;;  %v5610_v8 = vpop.f32.mrb[73].mxu0  ;;  %v7399_v48 = vpop.f32.mrb[77].mxu1 }
 0x6b9   :  { %5696 = vst [vmem:[#allocation4 + $0x8] sm:$0xff] %v5610_v8  ;;  %v5612_v22 = vpop.f32.mrb[74].mxu0  ;;  %v5692_v19 = vpop.f32.mrb[78].mxu1 }
 0x6ba   :  { %5697 = vst [vmem:[#allocation4 + $0x10] sm:$0xff] %v5690_v15  ;;  %v5613_v28 = vpop.f32.mrb[75].mxu0  ;;  %v7400_v4 = vpop.f32.mrb[79].mxu1 }
 0x73c   :  { %v7182_v21 = vpop.f32.mrb[76].mxu0 }
 0x73d   :  { %v7183_v30 = vpop.f32.mrb[77].mxu0 }
 0x73e   :  { %v7184_v6 = vadd.f32 %v7183_v30, %v7182_v21  ;;  %v7185_v14 = vpop.f32.mrb[78].mxu0 }
 0x73f   :  { %v7186_v38 = vpop.f32.mrb[79].mxu0 }
 0x772   :  { %v6266_v52 = vpop.f32.mrb[80].mxu1  ;;  %v6347_v11 = vpop.f32.mrb[80].mxu0 }
 0x773   :  { %6354 = vst [vmem:[#allocation4 + $0x18] sm:$0xff] %v6266_v52  ;;  %v6348_v63 = vadd.f32 %v7184_v6, %v6347_v11  ;;  %v6268_v36 = vpop.f32.mrb[81].mxu1  ;;  %v7419_v44 = vpop.f32.mrb[81].mxu0 }
 0x774   :  { %6355 = vst [vmem:[#allocation4 + $0x20] sm:$0xff] %v6268_v36  ;;  %v6270_v20 = vpop.f32.mrb[82].mxu1  ;;  %v6350_v45 = vpop.f32.mrb[82].mxu0 }
 0x775   :  { %6356 = vst [vmem:[#allocation4 + $0x28] sm:$0xff] %v6348_v63  ;;  %v6271_v43 = vpop.f32.mrb[83].mxu1  ;;  %v7420_v49 = vpop.f32.mrb[83].mxu0 }
 0x776   :  { %8312 = shalt.err (!%p8309_p4)
}
 0x777   :  { %s8313_s19 = scalar_lea.hbm %s10630_s3, 768 }
 0x778   :  { %p8314_p5 = scmp.ne.s32.totalorder %s10630_s3, %s8313_s19  ;;  %p8317_p6 = scmp.lt.u32.totalorder %s8313_s19, %s10630_s3 }
 0x77a   :  { %p8319_p7 = pnand %p8317_p6, %p8314_p5 }
 0x77c   :  { %8322 = shalt.err (!%p8319_p7)
}
 0x77d   :  { %s8331_s23 = smov 384   ;;  %s8332_s24 = smov 24  }
 0x77e   :  { %6368 = dma.vmem_to_hbm [thread:$0]  %s6363_s15, 768, %s10630_s3, [#allocation5], %s8331_s23, %s8331_s23, %s8332_s24  }
 0x77f   :  { %8323 = dma.done.wait [#allocation5], 768  }
 0x780   :  { %8324 = vsyncadd [#allocation5], 4294966528 }
 0x781   :  { %6372 = vsyncpa [#allocation5], 1 }

</bundles_post_ra>
